<compile_context>
chip_gen: v5e
topology: v5e:2x2
jax: 0.10.0
libtpu: 0.0.40
codegen_flags: <defaults>
</compile_context>

<pallas_src>
import functools
import math

import jax
import jax.numpy as jnp
from jax import lax
from jax.experimental import pallas as pl
from jax.experimental.pallas import tpu as pltpu


TM_MAX = 512                        # row tile for M-tiled GEMM kernels
VMEM_LIMIT = 48 * 1024 * 1024       # fits v7x's 64 MiB physical VMEM; fine on v5e/v6e


def _cparams(n_grid_dims):
    return pltpu.CompilerParams(
        dimension_semantics=("parallel",) * n_grid_dims,
        vmem_limit_bytes=VMEM_LIMIT)


def _row_tile(m):
    return m if m <= TM_MAX else TM_MAX


def _ln(x, g, b, eps):
    mu = jnp.mean(x, axis=-1, keepdims=True)
    var = jnp.mean(jnp.square(x - mu), axis=-1, keepdims=True)
    return (x - mu) * lax.rsqrt(var + eps) * g + b


# ----------------------------- Pallas kernels -----------------------------

def _mm_kernel(x_ref, w_ref, b_ref, o_ref, *, act):
    """y = act(x @ w + b); bf16 MXU inputs, f32 accumulation."""
    y = jnp.dot(x_ref[...].astype(jnp.bfloat16), w_ref[...],
                preferred_element_type=jnp.float32) + b_ref[...]
    if act == "relu":
        y = jnp.maximum(y, 0.0)
    elif act == "silu":
        y = y * jax.nn.sigmoid(y)
    o_ref[...] = y.astype(o_ref.dtype)


def _ln_mm_kernel(x_ref, g_ref, b_ref, w_ref, bias_ref, o_ref, *, eps, act):
    """y = act(LayerNorm(x) @ w + bias)."""
    xn = _ln(x_ref[...], g_ref[...], b_ref[...], eps)
    y = jnp.dot(xn.astype(jnp.bfloat16), w_ref[...],
                preferred_element_type=jnp.float32) + bias_ref[...]
    if act == "silu":
        y = y * jax.nn.sigmoid(y)
    elif act == "relu":
        y = jnp.maximum(y, 0.0)
    o_ref[...] = y.astype(o_ref.dtype)


def _ln_mm_glu_kernel(x_ref, g_ref, b_ref, wa_ref, ba_ref, wg_ref, bg_ref,
                      o_ref, *, eps):
    """GLU(LayerNorm(x) @ [wa|wg] + [ba|bg]) with the two halves as separate
    weights (avoids lane-offset value slicing)."""
    xn = _ln(x_ref[...], g_ref[...], b_ref[...], eps).astype(jnp.bfloat16)
    a = jnp.dot(xn, wa_ref[...], preferred_element_type=jnp.float32) + ba_ref[...]
    g = jnp.dot(xn, wg_ref[...], preferred_element_type=jnp.float32) + bg_ref[...]
    o_ref[...] = (a * jax.nn.sigmoid(g)).astype(o_ref.dtype)


def _mm_res_kernel(x_ref, w_ref, bias_ref, res_ref, g_ref, b_ref, o_ref, *,
                   scale, final_ln, eps):
    """y = res + scale * (x @ w + bias); optional fused block-final LayerNorm."""
    y = jnp.dot(x_ref[...].astype(jnp.bfloat16), w_ref[...],
                preferred_element_type=jnp.float32) + bias_ref[...]
    y = res_ref[...] + scale * y
    if final_ln:
        y = _ln(y, g_ref[...], b_ref[...], eps)
    o_ref[...] = y.astype(o_ref.dtype)


def _attn_kernel(q_ref, k_ref, v_ref, bias_ref, o_ref, *, scale):
    """Masked softmax attention, all heads of one batch item per grid step."""
    # TODO(synk): switch to a flash-style KV-blocked online softmax for
    # production sequence lengths (~1500); full softmax is fine at toy T.
    q = q_ref[0]                      # (H, T, dk) bf16
    k = k_ref[0]
    v = v_ref[0]
    b = bias_ref[0]                   # (1, T) f32 additive pad bias (-1e9)
    s = jnp.einsum('htd,hsd->hts', q, k,
                   preferred_element_type=jnp.float32) * scale
    s = s + b                         # broadcast over (H, T, T)
    m = jnp.max(s, axis=-1, keepdims=True)
    p = jnp.exp(s - m)
    denom = jnp.sum(p, axis=-1, keepdims=True)
    p = p * pl.reciprocal(denom, approx=True)
    ctx = jnp.einsum('hts,hsd->htd', p.astype(jnp.bfloat16), v,
                     preferred_element_type=jnp.float32)
    o_ref[0] = ctx.astype(o_ref.dtype)


def _dwconv_kernel(x_ref, w_ref, b_ref, o_ref, *, ksize, tlen):
    """Depthwise 1-D conv ('same') with BatchNorm pre-folded into w/b and a
    fused SiLU epilogue.  Elementwise math kept in f32 (v5e has no bf16 VPU)."""
    acc = x_ref[0, 0:tlen, :].astype(jnp.float32) * w_ref[0, :]
    for j in range(1, ksize):
        acc = acc + x_ref[0, j:j + tlen, :].astype(jnp.float32) * w_ref[j, :]
    y = acc + b_ref[...]
    y = y * jax.nn.sigmoid(y)
    o_ref[0] = y.astype(o_ref.dtype)


def _cross_kv_kernel(x_ref, wk_ref, bk_ref, wv_ref, bv_ref, ko_ref, vo_ref):
    """Per-decoder-layer w_ks / w_vs projections; x is read once per grid step
    and both projections run from the resident tile."""
    x = x_ref[...].astype(jnp.bfloat16)
    ko_ref[0] = (jnp.dot(x, wk_ref[0], preferred_element_type=jnp.float32)
                 + bk_ref[0]).astype(ko_ref.dtype)
    vo_ref[0] = (jnp.dot(x, wv_ref[0], preferred_element_type=jnp.float32)
                 + bv_ref[0]).astype(vo_ref.dtype)


# ----------------------------- kernel wrappers -----------------------------

def linear_act(x2d, w, bias, *, act="none", out_dtype=jnp.bfloat16):
    M, K = x2d.shape
    N = w.shape[1]
    tm = _row_tile(M)
    return pl.pallas_call(
        functools.partial(_mm_kernel, act=act),
        out_shape=jax.ShapeDtypeStruct((M, N), out_dtype),
        grid=(pl.cdiv(M, tm),),
        in_specs=[
            pl.BlockSpec((tm, K), lambda i: (i, 0)),
            pl.BlockSpec((K, N), lambda i: (0, 0)),
            pl.BlockSpec((1, N), lambda i: (0, 0)),
        ],
        out_specs=pl.BlockSpec((tm, N), lambda i: (i, 0)),
        compiler_params=_cparams(1),
    )(x2d, w, bias.reshape(1, N))


def ln_linear(x2d, gamma, beta, w, bias, *, act="none", out_dtype=jnp.bfloat16):
    M, D = x2d.shape
    N = w.shape[1]
    tm = _row_tile(M)
    return pl.pallas_call(
        functools.partial(_ln_mm_kernel, eps=1e-5, act=act),
        out_shape=jax.ShapeDtypeStruct((M, N), out_dtype),
        grid=(pl.cdiv(M, tm),),
        in_specs=[
            pl.BlockSpec((tm, D), lambda i: (i, 0)),
            pl.BlockSpec((1, D), lambda i: (0, 0)),
            pl.BlockSpec((1, D), lambda i: (0, 0)),
            pl.BlockSpec((D, N), lambda i: (0, 0)),
            pl.BlockSpec((1, N), lambda i: (0, 0)),
        ],
        out_specs=pl.BlockSpec((tm, N), lambda i: (i, 0)),
        compiler_params=_cparams(1),
    )(x2d, gamma.reshape(1, D), beta.reshape(1, D), w, bias.reshape(1, N))


def ln_linear_glu(x2d, gamma, beta, wa, ba, wg, bg, *, out_dtype=jnp.bfloat16):
    M, D = x2d.shape
    N = wa.shape[1]
    tm = _row_tile(M)
    return pl.pallas_call(
        functools.partial(_ln_mm_glu_kernel, eps=1e-5),
        out_shape=jax.ShapeDtypeStruct((M, N), out_dtype),
        grid=(pl.cdiv(M, tm),),
        in_specs=[
            pl.BlockSpec((tm, D), lambda i: (i, 0)),
            pl.BlockSpec((1, D), lambda i: (0, 0)),
            pl.BlockSpec((1, D), lambda i: (0, 0)),
            pl.BlockSpec((D, N), lambda i: (0, 0)),
            pl.BlockSpec((1, N), lambda i: (0, 0)),
            pl.BlockSpec((D, N), lambda i: (0, 0)),
            pl.BlockSpec((1, N), lambda i: (0, 0)),
        ],
        out_specs=pl.BlockSpec((tm, N), lambda i: (i, 0)),
        compiler_params=_cparams(1),
    )(x2d, gamma.reshape(1, D), beta.reshape(1, D),
      wa, ba.reshape(1, N), wg, bg.reshape(1, N))


def mm_residual(x2d, w, bias, res2d, *, scale, final_ln=None):
    M, K = x2d.shape
    N = w.shape[1]
    tm = _row_tile(M)
    if final_ln is None:
        has_ln = False
        g = jnp.zeros((1, N), jnp.float32)
        b = jnp.zeros((1, N), jnp.float32)
    else:
        has_ln = True
        g = final_ln[0].reshape(1, N)
        b = final_ln[1].reshape(1, N)
    return pl.pallas_call(
        functools.partial(_mm_res_kernel, scale=scale, final_ln=has_ln, eps=1e-5),
        out_shape=jax.ShapeDtypeStruct((M, N), jnp.float32),
        grid=(pl.cdiv(M, tm),),
        in_specs=[
            pl.BlockSpec((tm, K), lambda i: (i, 0)),
            pl.BlockSpec((K, N), lambda i: (0, 0)),
            pl.BlockSpec((1, N), lambda i: (0, 0)),
            pl.BlockSpec((tm, N), lambda i: (i, 0)),
            pl.BlockSpec((1, N), lambda i: (0, 0)),
            pl.BlockSpec((1, N), lambda i: (0, 0)),
        ],
        out_specs=pl.BlockSpec((tm, N), lambda i: (i, 0)),
        compiler_params=_cparams(1),
    )(x2d, w, bias.reshape(1, N), res2d, g, b)


def attn_core(q, k, v, bias, scale):
    """q,k,v: (B, H, T, dk) bf16; bias: (B, 1, T) additive (-1e9 on pads)."""
    B, H, T, dk = q.shape
    return pl.pallas_call(
        functools.partial(_attn_kernel, scale=scale),
        out_shape=jax.ShapeDtypeStruct((B, H, T, dk), jnp.bfloat16),
        grid=(B,),
        in_specs=[
            pl.BlockSpec((1, H, T, dk), lambda b: (b, 0, 0, 0)),
            pl.BlockSpec((1, H, T, dk), lambda b: (b, 0, 0, 0)),
            pl.BlockSpec((1, H, T, dk), lambda b: (b, 0, 0, 0)),
            pl.BlockSpec((1, 1, T), lambda b: (b, 0, 0)),
        ],
        out_specs=pl.BlockSpec((1, H, T, dk), lambda b: (b, 0, 0, 0)),
        compiler_params=_cparams(1),
    )(q, k, v, bias)


def depthwise_conv_bn_silu(x, w_eff, b_eff):
    """x: (B, T, D) bf16; w_eff: (K, D), b_eff: (1, D) with BN folded in."""
    B, T, D = x.shape
    K = w_eff.shape[0]
    pad = (K - 1) // 2
    xp = jnp.pad(x, ((0, 0), (pad, pad), (0, 0)))
    return pl.pallas_call(
        functools.partial(_dwconv_kernel, ksize=K, tlen=T),
        out_shape=jax.ShapeDtypeStruct((B, T, D), jnp.bfloat16),
        grid=(B,),
        in_specs=[
            pl.BlockSpec((1, T + 2 * pad, D), lambda i: (i, 0, 0)),
            pl.BlockSpec((K, D), lambda i: (0, 0)),
            pl.BlockSpec((1, D), lambda i: (0, 0)),
        ],
        out_specs=pl.BlockSpec((1, T, D), lambda i: (i, 0, 0)),
        compiler_params=_cparams(1),
    )(xp, w_eff, b_eff)


def cross_kv(x2d, wk, bk, wv, bv):
    """Per-decoder-layer K/V projections of the encoder output."""
    M, D = x2d.shape
    L, _, N = wk.shape
    tm = _row_tile(M)
    return pl.pallas_call(
        _cross_kv_kernel,
        out_shape=(jax.ShapeDtypeStruct((L, M, N), jnp.float32),
                   jax.ShapeDtypeStruct((L, M, N), jnp.float32)),
        grid=(L, pl.cdiv(M, tm)),
        in_specs=[
            pl.BlockSpec((tm, D), lambda l, i: (i, 0)),
            pl.BlockSpec((1, D, N), lambda l, i: (l, 0, 0)),
            pl.BlockSpec((1, 1, N), lambda l, i: (l, 0, 0)),
            pl.BlockSpec((1, D, N), lambda l, i: (l, 0, 0)),
            pl.BlockSpec((1, 1, N), lambda l, i: (l, 0, 0)),
        ],
        out_specs=(pl.BlockSpec((1, tm, N), lambda l, i: (l, i, 0)),
                   pl.BlockSpec((1, tm, N), lambda l, i: (l, i, 0))),
        compiler_params=_cparams(2),
    )(x2d, wk, bk, wv, bv)


# ----------------------------- encoder glue -----------------------------

def conv2d_s2_im2col(x_nhwc, w2_bf16, bias):
    """3x3 stride-2 valid conv + ReLU as im2col + M-tiled bf16 Pallas GEMM."""
    # TODO(synk): stream the 9 taps via BlockSpec index maps at production
    # sizes instead of materializing the (B,Ho,Wo,9C) patch tensor in HBM.
    B, H, W, C = x_nhwc.shape
    kh = kw = 3
    s = 2
    Ho = (H - kh) // s + 1
    Wo = (W - kw) // s + 1
    cols = []
    for i in range(kh):
        for j in range(kw):
            cols.append(x_nhwc[:, i:i + s * (Ho - 1) + 1:s,
                               j:j + s * (Wo - 1) + 1:s, :])
    patches = jnp.concatenate(cols, axis=-1)                 # (B, Ho, Wo, 9C)
    y = linear_act(patches.reshape(-1, kh * kw * C), w2_bf16, bias,
                   act="relu", out_dtype=jnp.bfloat16)
    return y.reshape(B, Ho, Wo, -1)


def sinusoid_pe(T, D):
    pos = jnp.arange(T, dtype=jnp.float32)[:, None]
    i = jnp.arange(D // 2, dtype=jnp.float32)[None, :]
    angle = pos / jnp.power(10000.0, 2.0 * i / D)
    pe = jnp.zeros((T, D), jnp.float32)
    pe = pe.at[:, 0::2].set(jnp.sin(angle))
    pe = pe.at[:, 1::2].set(jnp.cos(angle))
    return pe


def conformer_block(x, attn_bias, p, n_head):
    B, T, D = x.shape
    x2 = x.reshape(-1, D)

    # FFN #1 (half-step): LN fused into w1+SiLU, residual fused into w2.
    f = p["ffn1"]
    h = ln_linear(x2, f["ln_g"], f["ln_b"], f["w1"], f["b1"], act="silu")
    x2 = mm_residual(h, f["w2"], f["b2"], x2, scale=0.5)

    # MHSA: LN + fused QKV projection, all heads per grid step, output
    # projection fused with the residual add.
    a = p["attn"]
    dk = D // n_head
    qkv = ln_linear(x2, a["ln_g"], a["ln_b"], a["wqkv"], a["bqkv"])   # (M,3D) bf16
    qkv = qkv.reshape(B, T, 3, n_head, dk).transpose(2, 0, 3, 1, 4)    # (3,B,H,T,dk)
    ctx = attn_core(qkv[0], qkv[1], qkv[2], attn_bias,
                    scale=1.0 / math.sqrt(dk))                         # (B,H,T,dk) bf16
    ctx = ctx.transpose(0, 2, 1, 3).reshape(-1, D)
    x2 = mm_residual(ctx, a["wo"], a["bo"], x2, scale=1.0)

    # Convolution module: LN+pw1+GLU fused, depthwise conv with folded
    # BatchNorm + SiLU, pw2 fused with residual.
    c = p["conv"]
    g = ln_linear_glu(x2, c["ln_g"], c["ln_b"], c["wa"], c["ba"], c["wg"], c["bg"])
    g = depthwise_conv_bn_silu(g.reshape(B, T, D), c["dw_w"], c["dw_b"])
    x2 = mm_residual(g.reshape(-1, D), c["pw2_w"], c["pw2_b"], x2, scale=1.0)

    # FFN #2 (half-step) with the block-final LayerNorm fused into the epilogue.
    f = p["ffn2"]
    h = ln_linear(x2, f["ln_g"], f["ln_b"], f["w1"], f["b1"], act="silu")
    x2 = mm_residual(h, f["w2"], f["b2"], x2, scale=0.5,
                     final_ln=(p["ln_final_g"], p["ln_final_b"]))
    return x2.reshape(B, T, D)


def conformer_encoder(p, x, lengths, n_head):
    """x: (B, T, F) features, lengths: (B,).  Returns (B,T',D), mask (B,1,T')."""
    B, T, F = x.shape
    mask = (jnp.arange(T)[None, :] < lengths[:, None]).astype(jnp.float32)[:, None, :]

    # Conv2dSubsampling (x4 in time): PyTorch NCHW convs as NHWC im2col GEMMs.
    h = x[:, :, :, None]                                     # (B, T, F, 1)
    h = conv2d_s2_im2col(h, p["conv1_w"], p["conv1_b"])
    h = conv2d_s2_im2col(h, p["conv2_w"], p["conv2_b"])
    _, T2, F2, C = h.shape
    h = jnp.transpose(h, (0, 1, 3, 2)).reshape(B, T2, C * F2)  # (B,C,T,F)->(B,T,C*F)
    h = linear_act(h.reshape(-1, C * F2), p["sub_out_w"], p["sub_out_b"],
                   out_dtype=jnp.float32)
    D = h.shape[-1]
    h = h.reshape(B, T2, D) + sinusoid_pe(T2, D)[None]         # sqrt(D) folded in w/b
    mask = mask[:, :, :-2:2][:, :, :-2:2]                      # subsampled mask
    attn_bias = (1.0 - mask) * jnp.float32(-1e9)               # additive pad bias
    for lp in p["layers"]:
        h = conformer_block(h, attn_bias, lp, n_head)
    return h, mask


@functools.partial(jax.jit, static_argnames=("n_head",))
def audio_encoder_tensor_cache(params, x, lengths, *, n_head):
    enc_out, enc_mask = conformer_encoder(params["encoder"], x, lengths, n_head)
    B, Tp, D = enc_out.shape
    K, V = cross_kv(enc_out.reshape(-1, D), params["dec_wk"], params["dec_bk"],
                    params["dec_wv"], params["dec_bv"])
    L, _, N = params["dec_wk"].shape
    K = K.reshape(L, B, Tp, N)
    V = V.reshape(L, B, Tp, N)
    # torch: mask.float(); mask[mask==0]=-inf; mask[mask==1]=0.0
    mask_out = jnp.where(enc_mask > 0.0, jnp.float32(0.0), jnp.float32(-jnp.inf))
    return K, V, mask_out


# ----------------------------- parameters -----------------------------

def init_params(key, *, idim, d_model, n_head, d_ff, n_enc_layers,
                n_dec_layers, dw_kernel):
    keys = iter(jax.random.split(key, 512))

    def w(shape, scale=0.02):
        return jax.random.normal(next(keys), shape, jnp.float32) * scale

    zeros = lambda s: jnp.zeros(s, jnp.float32)
    ones = lambda s: jnp.ones(s, jnp.float32)

    f1 = (idim - 3) // 2 + 1
    f2 = (f1 - 3) // 2 + 1
    enc = {
        "conv1_w": w((d_model, 1, 3, 3)), "conv1_b": zeros((1, d_model)),
        "conv2_w": w((d_model, d_model, 3, 3)), "conv2_b": zeros((1, d_model)),
        "sub_out_w": w((d_model * f2, d_model)), "sub_out_b": zeros((1, d_model)),
        "enc_layers": [],
    }

    def ffn_p():
        return {"ln_g": ones((d_model,)), "ln_b": zeros((d_model,)),
                "w1": w((d_model, d_ff)), "b1": zeros((1, d_ff)),
                "w2": w((d_ff, d_model)), "b2": zeros((1, d_model))}

    for _ in range(n_enc_layers):
        enc["enc_layers"].append({
            "ffn1": ffn_p(),
            "ffn2": ffn_p(),
            "attn": {"ln_g": ones((d_model,)), "ln_b": zeros((d_model,)),
                     "wq": w((d_model, d_model)), "bq": zeros((1, d_model)),
                     "wk": w((d_model, d_model)), "bk": zeros((1, d_model)),
                     "wv": w((d_model, d_model)), "bv": zeros((1, d_model)),
                     "wo": w((d_model, d_model)), "bo": zeros((1, d_model))},
            "conv": {"ln_g": ones((d_model,)), "ln_b": zeros((d_model,)),
                     "pw1_w": w((d_model, 2 * d_model)), "pw1_b": zeros((1, 2 * d_model)),
                     "dw_w": w((dw_kernel, d_model)), "dw_b": zeros((1, d_model)),
                     "bn_mean": zeros((d_model,)), "bn_var": ones((d_model,)),
                     "bn_g": ones((d_model,)), "bn_b": zeros((d_model,)),
                     "pw2_w": w((d_model, d_model)), "pw2_b": zeros((1, d_model))},
            "ln_final_g": ones((d_model,)), "ln_final_b": zeros((d_model,)),
        })

    hdk = n_head * (d_model // n_head)
    return {
        "encoder": enc,
        "dec_wk": w((n_dec_layers, d_model, hdk)),
        "dec_bk": zeros((n_dec_layers, 1, hdk)),
        "dec_wv": w((n_dec_layers, d_model, hdk)),
        "dec_bv": zeros((n_dec_layers, 1, hdk)),
    }


def prepare_params(params):
    """Fold/convert raw (PyTorch-layout) parameters into kernel-ready form:
    bf16 matmul weights, fused QKV weight, split GLU halves, BatchNorm folded
    into the depthwise conv, sqrt(D) folded into the subsampling projection."""
    bf = lambda a: a.astype(jnp.bfloat16)
    enc = params["encoder"]
    d_model = enc["sub_out_w"].shape[1]
    sqrt_d = math.sqrt(d_model)

    def conv_w(w_oihw):
        cout, cin, kh, kw = w_oihw.shape
        return bf(jnp.transpose(w_oihw, (2, 3, 1, 0)).reshape(kh * kw * cin, cout))

    def ffn(fp):
        return {"ln_g": fp["ln_g"], "ln_b": fp["ln_b"],
                "w1": bf(fp["w1"]), "b1": fp["b1"],
                "w2": bf(fp["w2"]), "b2": fp["b2"]}

    p_enc = {
        "conv1_w": conv_w(enc["conv1_w"]), "conv1_b": enc["conv1_b"],
        "conv2_w": conv_w(enc["conv2_w"]), "conv2_b": enc["conv2_b"],
        "sub_out_w": bf(enc["sub_out_w"] * sqrt_d),
        "sub_out_b": enc["sub_out_b"] * sqrt_d,
        "layers": [],
    }
    for lp in enc["enc_layers"]:
        at, cv = lp["attn"], lp["conv"]
        D = d_model
        bn_scale = cv["bn_g"] / jnp.sqrt(cv["bn_var"] + 1e-5)
        bn_shift = cv["bn_b"] - cv["bn_mean"] * bn_scale
        p_enc["layers"].append({
            "ffn1": ffn(lp["ffn1"]),
            "ffn2": ffn(lp["ffn2"]),
            "attn": {"ln_g": at["ln_g"], "ln_b": at["ln_b"],
                     "wqkv": bf(jnp.concatenate([at["wq"], at["wk"], at["wv"]], axis=1)),
                     "bqkv": jnp.concatenate([at["bq"], at["bk"], at["bv"]], axis=1),
                     "wo": bf(at["wo"]), "bo": at["bo"]},
            "conv": {"ln_g": cv["ln_g"], "ln_b": cv["ln_b"],
                     "wa": bf(cv["pw1_w"][:, :D]), "ba": cv["pw1_b"][:, :D],
                     "wg": bf(cv["pw1_w"][:, D:]), "bg": cv["pw1_b"][:, D:],
                     "dw_w": cv["dw_w"] * bn_scale[None, :],
                     "dw_b": cv["dw_b"] * bn_scale[None, :] + bn_shift[None, :],
                     "pw2_w": bf(cv["pw2_w"]), "pw2_b": cv["pw2_b"]},
            "ln_final_g": lp["ln_final_g"], "ln_final_b": lp["ln_final_b"],
        })
    return {
        "encoder": p_enc,
        "dec_wk": bf(params["dec_wk"]), "dec_bk": params["dec_bk"],
        "dec_wv": bf(params["dec_wv"]), "dec_bv": params["dec_bv"],
    }


# ----------------------------- main -----------------------------

if __name__ == "__main__":
    B, T, idim = 2, 32, 20
    d_model, n_head, d_ff = 32, 4, 64
    n_enc_layers, n_dec_layers = 2, 3
    dw_kernel = 7

    key = jax.random.PRNGKey(0)
    pkey, xkey = jax.random.split(key)
    raw_params = init_params(pkey, idim=idim, d_model=d_model, n_head=n_head,
                             d_ff=d_ff, n_enc_layers=n_enc_layers,
                             n_dec_layers=n_dec_layers, dw_kernel=dw_kernel)
    params = prepare_params(raw_params)

    x = jax.random.normal(xkey, (B, T, idim), jnp.float32)
    input_length = jnp.array([T, T - 7], jnp.int32)

    k_cache, v_cache, enc_mask = audio_encoder_tensor_cache(
        params, x, input_length, n_head=n_head)
    jax.block_until_ready((k_cache, v_cache, enc_mask))

    Tp = 7  # 32 -> 15 -> 7 after the two stride-2 convs
    assert k_cache.shape == (n_dec_layers, B, Tp, d_model), k_cache.shape
    assert v_cache.shape == (n_dec_layers, B, Tp, d_model), v_cache.shape
    assert enc_mask.shape == (B, 1, Tp) and enc_mask.dtype == jnp.float32
    assert bool(jnp.all(jnp.isfinite(k_cache))) and bool(jnp.all(jnp.isfinite(v_cache)))
    # mask values must be exactly {0, -inf}
    assert bool(jnp.all((enc_mask == 0.0) | (enc_mask == -jnp.inf)))

    print("KERNEL_OK")
</pallas_src>

<mosaic_0001>
module attributes {stable_mosaic.version = 11 : i64} {
  func.func @_mm_kernel(%arg0: i32, %arg1: memref<270x9xf32, #tpu.memory_space<vmem>>, %arg2: memref<9x32xbf16, #tpu.memory_space<vmem>>, %arg3: memref<1x32xf32, #tpu.memory_space<vmem>>, %arg4: memref<270x32xbf16, #tpu.memory_space<vmem>>) attributes {dimension_semantics = [#tpu.dimension_semantics<parallel>], iteration_bounds = array<i64: 1>, scalar_prefetch = 0 : i64, scratch_operands = 0 : i64, tpu.core_type = #tpu.core_type<tc>, window_params = [{transform_indices = @transform_0, window_bounds = array<i64: 270, 9>}, {pipeline_mode = #tpu.pipeline_mode<synchronous>, transform_indices = @transform_1, window_bounds = array<i64: 9, 32>}, {pipeline_mode = #tpu.pipeline_mode<synchronous>, transform_indices = @transform_2, window_bounds = array<i64: 1, 32>}, {transform_indices = @transform_3, window_bounds = array<i64: 270, 32>}]} {
    %c0 = arith.constant 0 : index
    %c0_0 = arith.constant 0 : index
    %0 = vector.load %arg1[%c0, %c0_0] : memref<270x9xf32, #tpu.memory_space<vmem>>, vector<270x9xf32>
    %1 = arith.truncf %0 : vector<270x9xf32> to vector<270x9xbf16>
    %c0_1 = arith.constant 0 : index
    %c0_2 = arith.constant 0 : index
    %2 = vector.load %arg2[%c0_1, %c0_2] : memref<9x32xbf16, #tpu.memory_space<vmem>>, vector<9x32xbf16>
    %cst = arith.constant dense<0.000000e+00> : vector<270x32xf32>
    %3 = tpu.matmul %1, %2, %cst {dimension_numbers = #tpu.dot_dimension_numbers<[1], [0], [0], [1], [0, 0, 1, 1], [], []>} : vector<270x9xbf16>, vector<9x32xbf16>, vector<270x32xf32> -> vector<270x32xf32>
    %c0_3 = arith.constant 0 : index
    %c0_4 = arith.constant 0 : index
    %4 = vector.load %arg3[%c0_3, %c0_4] : memref<1x32xf32, #tpu.memory_space<vmem>>, vector<1x32xf32>
    %5 = vector.broadcast %4 : vector<1x32xf32> to vector<270x32xf32>
    %6 = arith.addf %3, %5 : vector<270x32xf32>
    %cst_5 = arith.constant 0.000000e+00 : f32
    %7 = vector.broadcast %cst_5 : f32 to vector<270x32xf32>
    %8 = arith.maximumf %6, %7 : vector<270x32xf32>
    %9 = arith.truncf %8 : vector<270x32xf32> to vector<270x32xbf16>
    %c0_6 = arith.constant 0 : index
    %c0_7 = arith.constant 0 : index
    %10 = vector.load %arg4[%c0_6, %c0_7] : memref<270x32xbf16, #tpu.memory_space<vmem>>, vector<270x32xbf16>
    tpu.vector_store %arg4[%c0_6, %c0_7], %9 {strides = array<i32>} : memref<270x32xbf16, #tpu.memory_space<vmem>>, vector<270x32xbf16>,
    return
  }
  func.func @transform_0(%arg0: i32) -> (i32, i32) {
    %c0_i32 = arith.constant 0 : i32
    %c0_i32_0 = arith.constant 0 : i32
    return %arg0, %c0_i32 : i32, i32
  }
  func.func @transform_1(%arg0: i32) -> (i32, i32) {
    %c0_i32 = arith.constant 0 : i32
    %c0_i32_0 = arith.constant 0 : i32
    %c0_i32_1 = arith.constant 0 : i32
    return %c0_i32, %c0_i32_0 : i32, i32
  }
  func.func @transform_2(%arg0: i32) -> (i32, i32) {
    %c0_i32 = arith.constant 0 : i32
    %c0_i32_0 = arith.constant 0 : i32
    %c0_i32_1 = arith.constant 0 : i32
    return %c0_i32, %c0_i32_0 : i32, i32
  }
  func.func @transform_3(%arg0: i32) -> (i32, i32) {
    %c0_i32 = arith.constant 0 : i32
    %c0_i32_0 = arith.constant 0 : i32
    return %arg0, %c0_i32 : i32, i32
  }
}

module attributes {stable_mosaic.version = 11 : i64} {
  func.func @_mm_kernel(%arg0: i32, %arg1: memref<56x288xbf16, #tpu.memory_space<vmem>>, %arg2: memref<288x32xbf16, #tpu.memory_space<vmem>>, %arg3: memref<1x32xf32, #tpu.memory_space<vmem>>, %arg4: memref<56x32xbf16, #tpu.memory_space<vmem>>) attributes {dimension_semantics = [#tpu.dimension_semantics<parallel>], iteration_bounds = array<i64: 1>, scalar_prefetch = 0 : i64, scratch_operands = 0 : i64, tpu.core_type = #tpu.core_type<tc>, window_params = [{transform_indices = @transform_0, window_bounds = array<i64: 56, 288>}, {pipeline_mode = #tpu.pipeline_mode<synchronous>, transform_indices = @transform_1, window_bounds = array<i64: 288, 32>}, {pipeline_mode = #tpu.pipeline_mode<synchronous>, transform_indices = @transform_2, window_bounds = array<i64: 1, 32>}, {transform_indices = @transform_3, window_bounds = array<i64: 56, 32>}]} {
    %c0 = arith.constant 0 : index
    %c0_0 = arith.constant 0 : index
    %0 = vector.load %arg1[%c0, %c0_0] : memref<56x288xbf16, #tpu.memory_space<vmem>>, vector<56x288xbf16>
    %c0_1 = arith.constant 0 : index
    %c0_2 = arith.constant 0 : index
    %1 = vector.load %arg2[%c0_1, %c0_2] : memref<288x32xbf16, #tpu.memory_space<vmem>>, vector<288x32xbf16>
    %cst = arith.constant dense<0.000000e+00> : vector<56x32xf32>
    %2 = tpu.matmul %0, %1, %cst {dimension_numbers = #tpu.dot_dimension_numbers<[1], [0], [0], [1], [0, 0, 1, 1], [], []>} : vector<56x288xbf16>, vector<288x32xbf16>, vector<56x32xf32> -> vector<56x32xf32>
    %c0_3 = arith.constant 0 : index
    %c0_4 = arith.constant 0 : index
    %3 = vector.load %arg3[%c0_3, %c0_4] : memref<1x32xf32, #tpu.memory_space<vmem>>, vector<1x32xf32>
    %4 = vector.broadcast %3 : vector<1x32xf32> to vector<56x32xf32>
    %5 = arith.addf %2, %4 : vector<56x32xf32>
    %cst_5 = arith.constant 0.000000e+00 : f32
    %6 = vector.broadcast %cst_5 : f32 to vector<56x32xf32>
    %7 = arith.maximumf %5, %6 : vector<56x32xf32>
    %8 = arith.truncf %7 : vector<56x32xf32> to vector<56x32xbf16>
    %c0_6 = arith.constant 0 : index
    %c0_7 = arith.constant 0 : index
    %9 = vector.load %arg4[%c0_6, %c0_7] : memref<56x32xbf16, #tpu.memory_space<vmem>>, vector<56x32xbf16>
    tpu.vector_store %arg4[%c0_6, %c0_7], %8 {strides = array<i32>} : memref<56x32xbf16, #tpu.memory_space<vmem>>, vector<56x32xbf16>,
    return
  }
  func.func @transform_0(%arg0: i32) -> (i32, i32) {
    %c0_i32 = arith.constant 0 : i32
    %c0_i32_0 = arith.constant 0 : i32
    return %arg0, %c0_i32 : i32, i32
  }
  func.func @transform_1(%arg0: i32) -> (i32, i32) {
    %c0_i32 = arith.constant 0 : i32
    %c0_i32_0 = arith.constant 0 : i32
    %c0_i32_1 = arith.constant 0 : i32
    return %c0_i32, %c0_i32_0 : i32, i32
  }
  func.func @transform_2(%arg0: i32) -> (i32, i32) {
    %c0_i32 = arith.constant 0 : i32
    %c0_i32_0 = arith.constant 0 : i32
    %c0_i32_1 = arith.constant 0 : i32
    return %c0_i32, %c0_i32_0 : i32, i32
  }
  func.func @transform_3(%arg0: i32) -> (i32, i32) {
    %c0_i32 = arith.constant 0 : i32
    %c0_i32_0 = arith.constant 0 : i32
    return %arg0, %c0_i32 : i32, i32
  }
}

module attributes {stable_mosaic.version = 11 : i64} {
  func.func @_mm_kernel(%arg0: i32, %arg1: memref<14x128xbf16, #tpu.memory_space<vmem>>, %arg2: memref<128x32xbf16, #tpu.memory_space<vmem>>, %arg3: memref<1x32xf32, #tpu.memory_space<vmem>>, %arg4: memref<14x32xf32, #tpu.memory_space<vmem>>) attributes {dimension_semantics = [#tpu.dimension_semantics<parallel>], iteration_bounds = array<i64: 1>, scalar_prefetch = 0 : i64, scratch_operands = 0 : i64, tpu.core_type = #tpu.core_type<tc>, window_params = [{transform_indices = @transform_0, window_bounds = array<i64: 14, 128>}, {pipeline_mode = #tpu.pipeline_mode<synchronous>, transform_indices = @transform_1, window_bounds = array<i64: 128, 32>}, {pipeline_mode = #tpu.pipeline_mode<synchronous>, transform_indices = @transform_2, window_bounds = array<i64: 1, 32>}, {transform_indices = @transform_3, window_bounds = array<i64: 14, 32>}]} {
    %c0 = arith.constant 0 : index
    %c0_0 = arith.constant 0 : index
    %0 = vector.load %arg1[%c0, %c0_0] : memref<14x128xbf16, #tpu.memory_space<vmem>>, vector<14x128xbf16>
    %c0_1 = arith.constant 0 : index
    %c0_2 = arith.constant 0 : index
    %1 = vector.load %arg2[%c0_1, %c0_2] : memref<128x32xbf16, #tpu.memory_space<vmem>>, vector<128x32xbf16>
    %cst = arith.constant dense<0.000000e+00> : vector<14x32xf32>
    %2 = tpu.matmul %0, %1, %cst {dimension_numbers = #tpu.dot_dimension_numbers<[1], [0], [0], [1], [0, 0, 1, 1], [], []>} : vector<14x128xbf16>, vector<128x32xbf16>, vector<14x32xf32> -> vector<14x32xf32>
    %c0_3 = arith.constant 0 : index
    %c0_4 = arith.constant 0 : index
    %3 = vector.load %arg3[%c0_3, %c0_4] : memref<1x32xf32, #tpu.memory_space<vmem>>, vector<1x32xf32>
    %4 = vector.broadcast %3 : vector<1x32xf32> to vector<14x32xf32>
    %5 = arith.addf %2, %4 : vector<14x32xf32>
    %c0_5 = arith.constant 0 : index
    %c0_6 = arith.constant 0 : index
    %6 = vector.load %arg4[%c0_5, %c0_6] : memref<14x32xf32, #tpu.memory_space<vmem>>, vector<14x32xf32>
    tpu.vector_store %arg4[%c0_5, %c0_6], %5 {strides = array<i32>} : memref<14x32xf32, #tpu.memory_space<vmem>>, vector<14x32xf32>,
    return
  }
  func.func @transform_0(%arg0: i32) -> (i32, i32) {
    %c0_i32 = arith.constant 0 : i32
    %c0_i32_0 = arith.constant 0 : i32
    return %arg0, %c0_i32 : i32, i32
  }
  func.func @transform_1(%arg0: i32) -> (i32, i32) {
    %c0_i32 = arith.constant 0 : i32
    %c0_i32_0 = arith.constant 0 : i32
    %c0_i32_1 = arith.constant 0 : i32
    return %c0_i32, %c0_i32_0 : i32, i32
  }
  func.func @transform_2(%arg0: i32) -> (i32, i32) {
    %c0_i32 = arith.constant 0 : i32
    %c0_i32_0 = arith.constant 0 : i32
    %c0_i32_1 = arith.constant 0 : i32
    return %c0_i32, %c0_i32_0 : i32, i32
  }
  func.func @transform_3(%arg0: i32) -> (i32, i32) {
    %c0_i32 = arith.constant 0 : i32
    %c0_i32_0 = arith.constant 0 : i32
    return %arg0, %c0_i32 : i32, i32
  }
}

module attributes {stable_mosaic.version = 11 : i64} {
  func.func @_ln_mm_kernel(%arg0: i32, %arg1: memref<14x32xf32, #tpu.memory_space<vmem>>, %arg2: memref<1x32xf32, #tpu.memory_space<vmem>>, %arg3: memref<1x32xf32, #tpu.memory_space<vmem>>, %arg4: memref<32x64xbf16, #tpu.memory_space<vmem>>, %arg5: memref<1x64xf32, #tpu.memory_space<vmem>>, %arg6: memref<14x64xbf16, #tpu.memory_space<vmem>>) attributes {dimension_semantics = [#tpu.dimension_semantics<parallel>], iteration_bounds = array<i64: 1>, scalar_prefetch = 0 : i64, scratch_operands = 0 : i64, tpu.core_type = #tpu.core_type<tc>, window_params = [{transform_indices = @transform_0, window_bounds = array<i64: 14, 32>}, {pipeline_mode = #tpu.pipeline_mode<synchronous>, transform_indices = @transform_1, window_bounds = array<i64: 1, 32>}, {pipeline_mode = #tpu.pipeline_mode<synchronous>, transform_indices = @transform_2, window_bounds = array<i64: 1, 32>}, {pipeline_mode = #tpu.pipeline_mode<synchronous>, transform_indices = @transform_3, window_bounds = array<i64: 32, 64>}, {pipeline_mode = #tpu.pipeline_mode<synchronous>, transform_indices = @transform_4, window_bounds = array<i64: 1, 64>}, {transform_indices = @transform_5, window_bounds = array<i64: 14, 64>}]} {
    %c0 = arith.constant 0 : index
    %c0_0 = arith.constant 0 : index
    %0 = vector.load %arg1[%c0, %c0_0] : memref<14x32xf32, #tpu.memory_space<vmem>>, vector<14x32xf32>
    %c0_1 = arith.constant 0 : index
    %c0_2 = arith.constant 0 : index
    %1 = vector.load %arg2[%c0_1, %c0_2] : memref<1x32xf32, #tpu.memory_space<vmem>>, vector<1x32xf32>
    %c0_3 = arith.constant 0 : index
    %c0_4 = arith.constant 0 : index
    %2 = vector.load %arg3[%c0_3, %c0_4] : memref<1x32xf32, #tpu.memory_space<vmem>>, vector<1x32xf32>
    %cst = arith.constant dense<0.000000e+00> : vector<14xf32>
    %3 = vector.multi_reduction <add>, %0, %cst [1] : vector<14x32xf32> to vector<14xf32>
    %4 = vector.shape_cast %3 : vector<14xf32> to vector<14x1xf32>
    %cst_5 = arith.constant 3.200000e+01 : f32
    %5 = vector.broadcast %cst_5 : f32 to vector<14x1xf32>
    %6 = arith.divf %4, %5 : vector<14x1xf32>
    %7 = vector.broadcast %6 : vector<14x1xf32> to vector<14x32xf32>
    %8 = arith.subf %0, %7 : vector<14x32xf32>
    %9 = arith.mulf %8, %8 : vector<14x32xf32>
    %cst_6 = arith.constant dense<0.000000e+00> : vector<14xf32>
    %10 = vector.multi_reduction <add>, %9, %cst_6 [1] : vector<14x32xf32> to vector<14xf32>
    %11 = vector.shape_cast %10 : vector<14xf32> to vector<14x1xf32>
    %cst_7 = arith.constant 3.200000e+01 : f32
    %12 = vector.broadcast %cst_7 : f32 to vector<14x1xf32>
    %13 = arith.divf %11, %12 : vector<14x1xf32>
    %14 = vector.broadcast %6 : vector<14x1xf32> to vector<14x32xf32>
    %15 = arith.subf %0, %14 : vector<14x32xf32>
    %cst_8 = arith.constant 9.99999974E-6 : f32
    %16 = vector.broadcast %cst_8 : f32 to vector<14x1xf32>
    %17 = arith.addf %13, %16 : vector<14x1xf32>
    %18 = math.rsqrt %17 : vector<14x1xf32>
    %19 = vector.broadcast %18 : vector<14x1xf32> to vector<14x32xf32>
    %20 = arith.mulf %15, %19 : vector<14x32xf32>
    %21 = vector.broadcast %1 : vector<1x32xf32> to vector<14x32xf32>
    %22 = arith.mulf %20, %21 : vector<14x32xf32>
    %23 = vector.broadcast %2 : vector<1x32xf32> to vector<14x32xf32>
    %24 = arith.addf %22, %23 : vector<14x32xf32>
    %25 = arith.truncf %24 : vector<14x32xf32> to vector<14x32xbf16>
    %c0_9 = arith.constant 0 : index
    %c0_10 = arith.constant 0 : index
    %26 = vector.load %arg4[%c0_9, %c0_10] : memref<32x64xbf16, #tpu.memory_space<vmem>>, vector<32x64xbf16>
    %cst_11 = arith.constant dense<0.000000e+00> : vector<14x64xf32>
    %27 = tpu.matmul %25, %26, %cst_11 {dimension_numbers = #tpu.dot_dimension_numbers<[1], [0], [0], [1], [0, 0, 1, 1], [], []>} : vector<14x32xbf16>, vector<32x64xbf16>, vector<14x64xf32> -> vector<14x64xf32>
    %c0_12 = arith.constant 0 : index
    %c0_13 = arith.constant 0 : index
    %28 = vector.load %arg5[%c0_12, %c0_13] : memref<1x64xf32, #tpu.memory_space<vmem>>, vector<1x64xf32>
    %29 = vector.broadcast %28 : vector<1x64xf32> to vector<14x64xf32>
    %30 = arith.addf %27, %29 : vector<14x64xf32>
    %31 = arith.negf %30 : vector<14x64xf32>
    %32 = math.exp %31 : vector<14x64xf32>
    %cst_14 = arith.constant 1.000000e+00 : f32
    %33 = vector.broadcast %cst_14 : f32 to vector<14x64xf32>
    %34 = arith.addf %33, %32 : vector<14x64xf32>
    %35 = arith.divf %33, %34 : vector<14x64xf32>
    %36 = arith.mulf %30, %35 : vector<14x64xf32>
    %37 = arith.truncf %36 : vector<14x64xf32> to vector<14x64xbf16>
    %c0_15 = arith.constant 0 : index
    %c0_16 = arith.constant 0 : index
    %38 = vector.load %arg6[%c0_15, %c0_16] : memref<14x64xbf16, #tpu.memory_space<vmem>>, vector<14x64xbf16>
    tpu.vector_store %arg6[%c0_15, %c0_16], %37 {strides = array<i32>} : memref<14x64xbf16, #tpu.memory_space<vmem>>, vector<14x64xbf16>,
    return
  }
  func.func @transform_0(%arg0: i32) -> (i32, i32) {
    %c0_i32 = arith.constant 0 : i32
    %c0_i32_0 = arith.constant 0 : i32
    return %arg0, %c0_i32 : i32, i32
  }
  func.func @transform_1(%arg0: i32) -> (i32, i32) {
    %c0_i32 = arith.constant 0 : i32
    %c0_i32_0 = arith.constant 0 : i32
    %c0_i32_1 = arith.constant 0 : i32
    return %c0_i32, %c0_i32_0 : i32, i32
  }
  func.func @transform_2(%arg0: i32) -> (i32, i32) {
    %c0_i32 = arith.constant 0 : i32
    %c0_i32_0 = arith.constant 0 : i32
    %c0_i32_1 = arith.constant 0 : i32
    return %c0_i32, %c0_i32_0 : i32, i32
  }
  func.func @transform_3(%arg0: i32) -> (i32, i32) {
    %c0_i32 = arith.constant 0 : i32
    %c0_i32_0 = arith.constant 0 : i32
    %c0_i32_1 = arith.constant 0 : i32
    return %c0_i32, %c0_i32_0 : i32, i32
  }
  func.func @transform_4(%arg0: i32) -> (i32, i32) {
    %c0_i32 = arith.constant 0 : i32
    %c0_i32_0 = arith.constant 0 : i32
    %c0_i32_1 = arith.constant 0 : i32
    return %c0_i32, %c0_i32_0 : i32, i32
  }
  func.func @transform_5(%arg0: i32) -> (i32, i32) {
    %c0_i32 = arith.constant 0 : i32
    %c0_i32_0 = arith.constant 0 : i32
    return %arg0, %c0_i32 : i32, i32
  }
}

module attributes {stable_mosaic.version = 11 : i64} {
  func.func @_ln_mm_kernel(%arg0: i32, %arg1: memref<14x32xf32, #tpu.memory_space<vmem>>, %arg2: memref<1x32xf32, #tpu.memory_space<vmem>>, %arg3: memref<1x32xf32, #tpu.memory_space<vmem>>, %arg4: memref<32x96xbf16, #tpu.memory_space<vmem>>, %arg5: memref<1x96xf32, #tpu.memory_space<vmem>>, %arg6: memref<14x96xbf16, #tpu.memory_space<vmem>>) attributes {dimension_semantics = [#tpu.dimension_semantics<parallel>], iteration_bounds = array<i64: 1>, scalar_prefetch = 0 : i64, scratch_operands = 0 : i64, tpu.core_type = #tpu.core_type<tc>, window_params = [{transform_indices = @transform_0, window_bounds = array<i64: 14, 32>}, {pipeline_mode = #tpu.pipeline_mode<synchronous>, transform_indices = @transform_1, window_bounds = array<i64: 1, 32>}, {pipeline_mode = #tpu.pipeline_mode<synchronous>, transform_indices = @transform_2, window_bounds = array<i64: 1, 32>}, {pipeline_mode = #tpu.pipeline_mode<synchronous>, transform_indices = @transform_3, window_bounds = array<i64: 32, 96>}, {pipeline_mode = #tpu.pipeline_mode<synchronous>, transform_indices = @transform_4, window_bounds = array<i64: 1, 96>}, {transform_indices = @transform_5, window_bounds = array<i64: 14, 96>}]} {
    %c0 = arith.constant 0 : index
    %c0_0 = arith.constant 0 : index
    %0 = vector.load %arg1[%c0, %c0_0] : memref<14x32xf32, #tpu.memory_space<vmem>>, vector<14x32xf32>
    %c0_1 = arith.constant 0 : index
    %c0_2 = arith.constant 0 : index
    %1 = vector.load %arg2[%c0_1, %c0_2] : memref<1x32xf32, #tpu.memory_space<vmem>>, vector<1x32xf32>
    %c0_3 = arith.constant 0 : index
    %c0_4 = arith.constant 0 : index
    %2 = vector.load %arg3[%c0_3, %c0_4] : memref<1x32xf32, #tpu.memory_space<vmem>>, vector<1x32xf32>
    %cst = arith.constant dense<0.000000e+00> : vector<14xf32>
    %3 = vector.multi_reduction <add>, %0, %cst [1] : vector<14x32xf32> to vector<14xf32>
    %4 = vector.shape_cast %3 : vector<14xf32> to vector<14x1xf32>
    %cst_5 = arith.constant 3.200000e+01 : f32
    %5 = vector.broadcast %cst_5 : f32 to vector<14x1xf32>
    %6 = arith.divf %4, %5 : vector<14x1xf32>
    %7 = vector.broadcast %6 : vector<14x1xf32> to vector<14x32xf32>
    %8 = arith.subf %0, %7 : vector<14x32xf32>
    %9 = arith.mulf %8, %8 : vector<14x32xf32>
    %cst_6 = arith.constant dense<0.000000e+00> : vector<14xf32>
    %10 = vector.multi_reduction <add>, %9, %cst_6 [1] : vector<14x32xf32> to vector<14xf32>
    %11 = vector.shape_cast %10 : vector<14xf32> to vector<14x1xf32>
    %cst_7 = arith.constant 3.200000e+01 : f32
    %12 = vector.broadcast %cst_7 : f32 to vector<14x1xf32>
    %13 = arith.divf %11, %12 : vector<14x1xf32>
    %14 = vector.broadcast %6 : vector<14x1xf32> to vector<14x32xf32>
    %15 = arith.subf %0, %14 : vector<14x32xf32>
    %cst_8 = arith.constant 9.99999974E-6 : f32
    %16 = vector.broadcast %cst_8 : f32 to vector<14x1xf32>
    %17 = arith.addf %13, %16 : vector<14x1xf32>
    %18 = math.rsqrt %17 : vector<14x1xf32>
    %19 = vector.broadcast %18 : vector<14x1xf32> to vector<14x32xf32>
    %20 = arith.mulf %15, %19 : vector<14x32xf32>
    %21 = vector.broadcast %1 : vector<1x32xf32> to vector<14x32xf32>
    %22 = arith.mulf %20, %21 : vector<14x32xf32>
    %23 = vector.broadcast %2 : vector<1x32xf32> to vector<14x32xf32>
    %24 = arith.addf %22, %23 : vector<14x32xf32>
    %25 = arith.truncf %24 : vector<14x32xf32> to vector<14x32xbf16>
    %c0_9 = arith.constant 0 : index
    %c0_10 = arith.constant 0 : index
    %26 = vector.load %arg4[%c0_9, %c0_10] : memref<32x96xbf16, #tpu.memory_space<vmem>>, vector<32x96xbf16>
    %cst_11 = arith.constant dense<0.000000e+00> : vector<14x96xf32>
    %27 = tpu.matmul %25, %26, %cst_11 {dimension_numbers = #tpu.dot_dimension_numbers<[1], [0], [0], [1], [0, 0, 1, 1], [], []>} : vector<14x32xbf16>, vector<32x96xbf16>, vector<14x96xf32> -> vector<14x96xf32>
    %c0_12 = arith.constant 0 : index
    %c0_13 = arith.constant 0 : index
    %28 = vector.load %arg5[%c0_12, %c0_13] : memref<1x96xf32, #tpu.memory_space<vmem>>, vector<1x96xf32>
    %29 = vector.broadcast %28 : vector<1x96xf32> to vector<14x96xf32>
    %30 = arith.addf %27, %29 : vector<14x96xf32>
    %31 = arith.truncf %30 : vector<14x96xf32> to vector<14x96xbf16>
    %c0_14 = arith.constant 0 : index
    %c0_15 = arith.constant 0 : index
    %32 = vector.load %arg6[%c0_14, %c0_15] : memref<14x96xbf16, #tpu.memory_space<vmem>>, vector<14x96xbf16>
    tpu.vector_store %arg6[%c0_14, %c0_15], %31 {strides = array<i32>} : memref<14x96xbf16, #tpu.memory_space<vmem>>, vector<14x96xbf16>,
    return
  }
  func.func @transform_0(%arg0: i32) -> (i32, i32) {
    %c0_i32 = arith.constant 0 : i32
    %c0_i32_0 = arith.constant 0 : i32
    return %arg0, %c0_i32 : i32, i32
  }
  func.func @transform_1(%arg0: i32) -> (i32, i32) {
    %c0_i32 = arith.constant 0 : i32
    %c0_i32_0 = arith.constant 0 : i32
    %c0_i32_1 = arith.constant 0 : i32
    return %c0_i32, %c0_i32_0 : i32, i32
  }
  func.func @transform_2(%arg0: i32) -> (i32, i32) {
    %c0_i32 = arith.constant 0 : i32
    %c0_i32_0 = arith.constant 0 : i32
    %c0_i32_1 = arith.constant 0 : i32
    return %c0_i32, %c0_i32_0 : i32, i32
  }
  func.func @transform_3(%arg0: i32) -> (i32, i32) {
    %c0_i32 = arith.constant 0 : i32
    %c0_i32_0 = arith.constant 0 : i32
    %c0_i32_1 = arith.constant 0 : i32
    return %c0_i32, %c0_i32_0 : i32, i32
  }
  func.func @transform_4(%arg0: i32) -> (i32, i32) {
    %c0_i32 = arith.constant 0 : i32
    %c0_i32_0 = arith.constant 0 : i32
    %c0_i32_1 = arith.constant 0 : i32
    return %c0_i32, %c0_i32_0 : i32, i32
  }
  func.func @transform_5(%arg0: i32) -> (i32, i32) {
    %c0_i32 = arith.constant 0 : i32
    %c0_i32_0 = arith.constant 0 : i32
    return %arg0, %c0_i32 : i32, i32
  }
}

module attributes {stable_mosaic.version = 11 : i64} {
  func.func @_mm_res_kernel(%arg0: i32, %arg1: memref<14x64xbf16, #tpu.memory_space<vmem>>, %arg2: memref<64x32xbf16, #tpu.memory_space<vmem>>, %arg3: memref<1x32xf32, #tpu.memory_space<vmem>>, %arg4: memref<14x32xf32, #tpu.memory_space<vmem>>, %arg5: memref<1x32xf32, #tpu.memory_space<vmem>>, %arg6: memref<1x32xf32, #tpu.memory_space<vmem>>, %arg7: memref<14x32xf32, #tpu.memory_space<vmem>>) attributes {dimension_semantics = [#tpu.dimension_semantics<parallel>], iteration_bounds = array<i64: 1>, scalar_prefetch = 0 : i64, scratch_operands = 0 : i64, tpu.core_type = #tpu.core_type<tc>, window_params = [{transform_indices = @transform_0, window_bounds = array<i64: 14, 64>}, {pipeline_mode = #tpu.pipeline_mode<synchronous>, transform_indices = @transform_1, window_bounds = array<i64: 64, 32>}, {pipeline_mode = #tpu.pipeline_mode<synchronous>, transform_indices = @transform_2, window_bounds = array<i64: 1, 32>}, {transform_indices = @transform_3, window_bounds = array<i64: 14, 32>}, {pipeline_mode = #tpu.pipeline_mode<synchronous>, transform_indices = @transform_4, window_bounds = array<i64: 1, 32>}, {pipeline_mode = #tpu.pipeline_mode<synchronous>, transform_indices = @transform_5, window_bounds = array<i64: 1, 32>}, {transform_indices = @transform_6, window_bounds = array<i64: 14, 32>}]} {
    %c0 = arith.constant 0 : index
    %c0_0 = arith.constant 0 : index
    %0 = vector.load %arg1[%c0, %c0_0] : memref<14x64xbf16, #tpu.memory_space<vmem>>, vector<14x64xbf16>
    %c0_1 = arith.constant 0 : index
    %c0_2 = arith.constant 0 : index
    %1 = vector.load %arg2[%c0_1, %c0_2] : memref<64x32xbf16, #tpu.memory_space<vmem>>, vector<64x32xbf16>
    %cst = arith.constant dense<0.000000e+00> : vector<14x32xf32>
    %2 = tpu.matmul %0, %1, %cst {dimension_numbers = #tpu.dot_dimension_numbers<[1], [0], [0], [1], [0, 0, 1, 1], [], []>} : vector<14x64xbf16>, vector<64x32xbf16>, vector<14x32xf32> -> vector<14x32xf32>
    %c0_3 = arith.constant 0 : index
    %c0_4 = arith.constant 0 : index
    %3 = vector.load %arg3[%c0_3, %c0_4] : memref<1x32xf32, #tpu.memory_space<vmem>>, vector<1x32xf32>
    %4 = vector.broadcast %3 : vector<1x32xf32> to vector<14x32xf32>
    %5 = arith.addf %2, %4 : vector<14x32xf32>
    %c0_5 = arith.constant 0 : index
    %c0_6 = arith.constant 0 : index
    %6 = vector.load %arg4[%c0_5, %c0_6] : memref<14x32xf32, #tpu.memory_space<vmem>>, vector<14x32xf32>
    %cst_7 = arith.constant 5.000000e-01 : f32
    %7 = vector.broadcast %cst_7 : f32 to vector<14x32xf32>
    %8 = arith.mulf %7, %5 : vector<14x32xf32>
    %9 = arith.addf %6, %8 : vector<14x32xf32>
    %c0_8 = arith.constant 0 : index
    %c0_9 = arith.constant 0 : index
    %10 = vector.load %arg7[%c0_8, %c0_9] : memref<14x32xf32, #tpu.memory_space<vmem>>, vector<14x32xf32>
    tpu.vector_store %arg7[%c0_8, %c0_9], %9 {strides = array<i32>} : memref<14x32xf32, #tpu.memory_space<vmem>>, vector<14x32xf32>,
    return
  }
  func.func @transform_0(%arg0: i32) -> (i32, i32) {
    %c0_i32 = arith.constant 0 : i32
    %c0_i32_0 = arith.constant 0 : i32
    return %arg0, %c0_i32 : i32, i32
  }
  func.func @transform_1(%arg0: i32) -> (i32, i32) {
    %c0_i32 = arith.constant 0 : i32
    %c0_i32_0 = arith.constant 0 : i32
    %c0_i32_1 = arith.constant 0 : i32
    return %c0_i32, %c0_i32_0 : i32, i32
  }
  func.func @transform_2(%arg0: i32) -> (i32, i32) {
    %c0_i32 = arith.constant 0 : i32
    %c0_i32_0 = arith.constant 0 : i32
    %c0_i32_1 = arith.constant 0 : i32
    return %c0_i32, %c0_i32_0 : i32, i32
  }
  func.func @transform_3(%arg0: i32) -> (i32, i32) {
    %c0_i32 = arith.constant 0 : i32
    %c0_i32_0 = arith.constant 0 : i32
    return %arg0, %c0_i32 : i32, i32
  }
  func.func @transform_4(%arg0: i32) -> (i32, i32) {
    %c0_i32 = arith.constant 0 : i32
    %c0_i32_0 = arith.constant 0 : i32
    %c0_i32_1 = arith.constant 0 : i32
    return %c0_i32, %c0_i32_0 : i32, i32
  }
  func.func @transform_5(%arg0: i32) -> (i32, i32) {
    %c0_i32 = arith.constant 0 : i32
    %c0_i32_0 = arith.constant 0 : i32
    %c0_i32_1 = arith.constant 0 : i32
    return %c0_i32, %c0_i32_0 : i32, i32
  }
  func.func @transform_6(%arg0: i32) -> (i32, i32) {
    %c0_i32 = arith.constant 0 : i32
    %c0_i32_0 = arith.constant 0 : i32
    return %arg0, %c0_i32 : i32, i32
  }
}

module attributes {stable_mosaic.version = 11 : i64} {
  func.func @_mm_res_kernel(%arg0: i32, %arg1: memref<14x32xbf16, #tpu.memory_space<vmem>>, %arg2: memref<32x32xbf16, #tpu.memory_space<vmem>>, %arg3: memref<1x32xf32, #tpu.memory_space<vmem>>, %arg4: memref<14x32xf32, #tpu.memory_space<vmem>>, %arg5: memref<1x32xf32, #tpu.memory_space<vmem>>, %arg6: memref<1x32xf32, #tpu.memory_space<vmem>>, %arg7: memref<14x32xf32, #tpu.memory_space<vmem>>) attributes {dimension_semantics = [#tpu.dimension_semantics<parallel>], iteration_bounds = array<i64: 1>, scalar_prefetch = 0 : i64, scratch_operands = 0 : i64, tpu.core_type = #tpu.core_type<tc>, window_params = [{transform_indices = @transform_0, window_bounds = array<i64: 14, 32>}, {pipeline_mode = #tpu.pipeline_mode<synchronous>, transform_indices = @transform_1, window_bounds = array<i64: 32, 32>}, {pipeline_mode = #tpu.pipeline_mode<synchronous>, transform_indices = @transform_2, window_bounds = array<i64: 1, 32>}, {transform_indices = @transform_3, window_bounds = array<i64: 14, 32>}, {pipeline_mode = #tpu.pipeline_mode<synchronous>, transform_indices = @transform_4, window_bounds = array<i64: 1, 32>}, {pipeline_mode = #tpu.pipeline_mode<synchronous>, transform_indices = @transform_5, window_bounds = array<i64: 1, 32>}, {transform_indices = @transform_6, window_bounds = array<i64: 14, 32>}]} {
    %c0 = arith.constant 0 : index
    %c0_0 = arith.constant 0 : index
    %0 = vector.load %arg1[%c0, %c0_0] : memref<14x32xbf16, #tpu.memory_space<vmem>>, vector<14x32xbf16>
    %c0_1 = arith.constant 0 : index
    %c0_2 = arith.constant 0 : index
    %1 = vector.load %arg2[%c0_1, %c0_2] : memref<32x32xbf16, #tpu.memory_space<vmem>>, vector<32x32xbf16>
    %cst = arith.constant dense<0.000000e+00> : vector<14x32xf32>
    %2 = tpu.matmul %0, %1, %cst {dimension_numbers = #tpu.dot_dimension_numbers<[1], [0], [0], [1], [0, 0, 1, 1], [], []>} : vector<14x32xbf16>, vector<32x32xbf16>, vector<14x32xf32> -> vector<14x32xf32>
    %c0_3 = arith.constant 0 : index
    %c0_4 = arith.constant 0 : index
    %3 = vector.load %arg3[%c0_3, %c0_4] : memref<1x32xf32, #tpu.memory_space<vmem>>, vector<1x32xf32>
    %4 = vector.broadcast %3 : vector<1x32xf32> to vector<14x32xf32>
    %5 = arith.addf %2, %4 : vector<14x32xf32>
    %c0_5 = arith.constant 0 : index
    %c0_6 = arith.constant 0 : index
    %6 = vector.load %arg4[%c0_5, %c0_6] : memref<14x32xf32, #tpu.memory_space<vmem>>, vector<14x32xf32>
    %cst_7 = arith.constant 1.000000e+00 : f32
    %7 = vector.broadcast %cst_7 : f32 to vector<14x32xf32>
    %8 = arith.mulf %7, %5 : vector<14x32xf32>
    %9 = arith.addf %6, %8 : vector<14x32xf32>
    %c0_8 = arith.constant 0 : index
    %c0_9 = arith.constant 0 : index
    %10 = vector.load %arg7[%c0_8, %c0_9] : memref<14x32xf32, #tpu.memory_space<vmem>>, vector<14x32xf32>
    tpu.vector_store %arg7[%c0_8, %c0_9], %9 {strides = array<i32>} : memref<14x32xf32, #tpu.memory_space<vmem>>, vector<14x32xf32>,
    return
  }
  func.func @transform_0(%arg0: i32) -> (i32, i32) {
    %c0_i32 = arith.constant 0 : i32
    %c0_i32_0 = arith.constant 0 : i32
    return %arg0, %c0_i32 : i32, i32
  }
  func.func @transform_1(%arg0: i32) -> (i32, i32) {
    %c0_i32 = arith.constant 0 : i32
    %c0_i32_0 = arith.constant 0 : i32
    %c0_i32_1 = arith.constant 0 : i32
    return %c0_i32, %c0_i32_0 : i32, i32
  }
  func.func @transform_2(%arg0: i32) -> (i32, i32) {
    %c0_i32 = arith.constant 0 : i32
    %c0_i32_0 = arith.constant 0 : i32
    %c0_i32_1 = arith.constant 0 : i32
    return %c0_i32, %c0_i32_0 : i32, i32
  }
  func.func @transform_3(%arg0: i32) -> (i32, i32) {
    %c0_i32 = arith.constant 0 : i32
    %c0_i32_0 = arith.constant 0 : i32
    return %arg0, %c0_i32 : i32, i32
  }
  func.func @transform_4(%arg0: i32) -> (i32, i32) {
    %c0_i32 = arith.constant 0 : i32
    %c0_i32_0 = arith.constant 0 : i32
    %c0_i32_1 = arith.constant 0 : i32
    return %c0_i32, %c0_i32_0 : i32, i32
  }
  func.func @transform_5(%arg0: i32) -> (i32, i32) {
    %c0_i32 = arith.constant 0 : i32
    %c0_i32_0 = arith.constant 0 : i32
    %c0_i32_1 = arith.constant 0 : i32
    return %c0_i32, %c0_i32_0 : i32, i32
  }
  func.func @transform_6(%arg0: i32) -> (i32, i32) {
    %c0_i32 = arith.constant 0 : i32
    %c0_i32_0 = arith.constant 0 : i32
    return %arg0, %c0_i32 : i32, i32
  }
}

module attributes {stable_mosaic.version = 11 : i64} {
  func.func @_attn_kernel(%arg0: i32, %arg1: memref<1x4x7x8xbf16, #tpu.memory_space<vmem>>, %arg2: memref<1x4x7x8xbf16, #tpu.memory_space<vmem>>, %arg3: memref<1x4x7x8xbf16, #tpu.memory_space<vmem>>, %arg4: memref<1x1x7xf32, #tpu.memory_space<vmem>>, %arg5: memref<1x4x7x8xbf16, #tpu.memory_space<vmem>>) attributes {dimension_semantics = [#tpu.dimension_semantics<parallel>], iteration_bounds = array<i64: 2>, scalar_prefetch = 0 : i64, scratch_operands = 0 : i64, tpu.core_type = #tpu.core_type<tc>, window_params = [{transform_indices = @transform_0, window_bounds = array<i64: 1, 4, 7, 8>}, {transform_indices = @transform_1, window_bounds = array<i64: 1, 4, 7, 8>}, {transform_indices = @transform_2, window_bounds = array<i64: 1, 4, 7, 8>}, {transform_indices = @transform_3, window_bounds = array<i64: 1, 1, 7>}, {transform_indices = @transform_4, window_bounds = array<i64: 1, 4, 7, 8>}]} {
    %c0 = arith.constant 0 : index
    %c0_0 = arith.constant 0 : index
    %c0_1 = arith.constant 0 : index
    %c0_2 = arith.constant 0 : index
    %0 = vector.load %arg1[%c0, %c0_0, %c0_1, %c0_2] : memref<1x4x7x8xbf16, #tpu.memory_space<vmem>>, vector<1x4x7x8xbf16>
    %1 = vector.shape_cast %0 : vector<1x4x7x8xbf16> to vector<4x7x8xbf16>
    %c0_3 = arith.constant 0 : index
    %c0_4 = arith.constant 0 : index
    %c0_5 = arith.constant 0 : index
    %c0_6 = arith.constant 0 : index
    %2 = vector.load %arg2[%c0_3, %c0_4, %c0_5, %c0_6] : memref<1x4x7x8xbf16, #tpu.memory_space<vmem>>, vector<1x4x7x8xbf16>
    %3 = vector.shape_cast %2 : vector<1x4x7x8xbf16> to vector<4x7x8xbf16>
    %c0_7 = arith.constant 0 : index
    %c0_8 = arith.constant 0 : index
    %c0_9 = arith.constant 0 : index
    %c0_10 = arith.constant 0 : index
    %4 = vector.load %arg3[%c0_7, %c0_8, %c0_9, %c0_10] : memref<1x4x7x8xbf16, #tpu.memory_space<vmem>>, vector<1x4x7x8xbf16>
    %5 = vector.shape_cast %4 : vector<1x4x7x8xbf16> to vector<4x7x8xbf16>
    %c0_11 = arith.constant 0 : index
    %c0_12 = arith.constant 0 : index
    %c0_13 = arith.constant 0 : index
    %6 = vector.load %arg4[%c0_11, %c0_12, %c0_13] : memref<1x1x7xf32, #tpu.memory_space<vmem>>, vector<1x1x7xf32>
    %7 = vector.shape_cast %6 : vector<1x1x7xf32> to vector<1x7xf32>
    "tpu.trace_start"() <{level = 10 : i32, message = "htd,hsd->hts"}> : () -> ()
    %cst = arith.constant dense<0.000000e+00> : vector<4x7x7xf32>
    %8 = tpu.matmul %1, %3, %cst {dimension_numbers = #tpu.dot_dimension_numbers<[2], [2], [1], [1], [0, 0, 0, 1, 1, 1], [0], [0]>} : vector<4x7x8xbf16>, vector<4x7x8xbf16>, vector<4x7x7xf32> -> vector<4x7x7xf32>
    "tpu.trace_stop"() : () -> ()
    %cst_14 = arith.constant 0.353553385 : f32
    %9 = vector.broadcast %cst_14 : f32 to vector<4x7x7xf32>
    %10 = arith.mulf %8, %9 : vector<4x7x7xf32>
    %11 = vector.shape_cast %7 : vector<1x7xf32> to vector<1x1x7xf32>
    %12 = vector.broadcast %11 : vector<1x1x7xf32> to vector<4x7x7xf32>
    %13 = arith.addf %10, %12 : vector<4x7x7xf32>
    %cst_15 = arith.constant dense<0xFF800000> : vector<4x7xf32>
    %14 = vector.multi_reduction <maximumf>, %13, %cst_15 [2] : vector<4x7x7xf32> to vector<4x7xf32>
    %15 = vector.shape_cast %14 : vector<4x7xf32> to vector<4x7x1xf32>
    %16 = vector.broadcast %15 : vector<4x7x1xf32> to vector<4x7x7xf32>
    %17 = arith.subf %13, %16 : vector<4x7x7xf32>
    %18 = math.exp %17 : vector<4x7x7xf32>
    %cst_16 = arith.constant dense<0.000000e+00> : vector<4x7xf32>
    %19 = vector.multi_reduction <add>, %18, %cst_16 [2] : vector<4x7x7xf32> to vector<4x7xf32>
    %20 = vector.shape_cast %19 : vector<4x7xf32> to vector<4x7x1xf32>
    %21 = tpu.reciprocal %20 {approx = true} : vector<4x7x1xf32> -> vector<4x7x1xf32>
    %22 = vector.broadcast %21 : vector<4x7x1xf32> to vector<4x7x7xf32>
    %23 = arith.mulf %18, %22 : vector<4x7x7xf32>
    %24 = arith.truncf %23 : vector<4x7x7xf32> to vector<4x7x7xbf16>
    "tpu.trace_start"() <{level = 10 : i32, message = "hts,hsd->htd"}> : () -> ()
    %cst_17 = arith.constant dense<0.000000e+00> : vector<4x7x8xf32>
    %25 = tpu.matmul %24, %5, %cst_17 {dimension_numbers = #tpu.dot_dimension_numbers<[2], [1], [1], [2], [0, 0, 0, 1, 1, 2], [0], [0]>} : vector<4x7x7xbf16>, vector<4x7x8xbf16>, vector<4x7x8xf32> -> vector<4x7x8xf32>
    "tpu.trace_stop"() : () -> ()
    %26 = arith.truncf %25 : vector<4x7x8xf32> to vector<4x7x8xbf16>
    %c0_18 = arith.constant 0 : index
    %c0_19 = arith.constant 0 : index
    %c0_20 = arith.constant 0 : index
    %c0_21 = arith.constant 0 : index
    %27 = vector.load %arg5[%c0_18, %c0_19, %c0_20, %c0_21] : memref<1x4x7x8xbf16, #tpu.memory_space<vmem>>, vector<1x4x7x8xbf16>
    %28 = vector.shape_cast %27 : vector<1x4x7x8xbf16> to vector<4x7x8xbf16>
    %29 = vector.shape_cast %26 : vector<4x7x8xbf16> to vector<1x4x7x8xbf16>
    tpu.vector_store %arg5[%c0_18, %c0_19, %c0_20, %c0_21], %29 {strides = array<i32>} : memref<1x4x7x8xbf16, #tpu.memory_space<vmem>>, vector<1x4x7x8xbf16>,
    return
  }
  func.func @transform_0(%arg0: i32) -> (i32, i32, i32, i32) {
    %c0_i32 = arith.constant 0 : i32
    %c0_i32_0 = arith.constant 0 : i32
    %c0_i32_1 = arith.constant 0 : i32
    %c0_i32_2 = arith.constant 0 : i32
    return %arg0, %c0_i32, %c0_i32_0, %c0_i32_1 : i32, i32, i32, i32
  }
  func.func @transform_1(%arg0: i32) -> (i32, i32, i32, i32) {
    %c0_i32 = arith.constant 0 : i32
    %c0_i32_0 = arith.constant 0 : i32
    %c0_i32_1 = arith.constant 0 : i32
    %c0_i32_2 = arith.constant 0 : i32
    return %arg0, %c0_i32, %c0_i32_0, %c0_i32_1 : i32, i32, i32, i32
  }
  func.func @transform_2(%arg0: i32) -> (i32, i32, i32, i32) {
    %c0_i32 = arith.constant 0 : i32
    %c0_i32_0 = arith.constant 0 : i32
    %c0_i32_1 = arith.constant 0 : i32
    %c0_i32_2 = arith.constant 0 : i32
    return %arg0, %c0_i32, %c0_i32_0, %c0_i32_1 : i32, i32, i32, i32
  }
  func.func @transform_3(%arg0: i32) -> (i32, i32, i32) {
    %c0_i32 = arith.constant 0 : i32
    %c0_i32_0 = arith.constant 0 : i32
    %c0_i32_1 = arith.constant 0 : i32
    return %arg0, %c0_i32, %c0_i32_0 : i32, i32, i32
  }
  func.func @transform_4(%arg0: i32) -> (i32, i32, i32, i32) {
    %c0_i32 = arith.constant 0 : i32
    %c0_i32_0 = arith.constant 0 : i32
    %c0_i32_1 = arith.constant 0 : i32
    %c0_i32_2 = arith.constant 0 : i32
    return %arg0, %c0_i32, %c0_i32_0, %c0_i32_1 : i32, i32, i32, i32
  }
}

module attributes {stable_mosaic.version = 11 : i64} {
  func.func @_ln_mm_glu_kernel(%arg0: i32, %arg1: memref<14x32xf32, #tpu.memory_space<vmem>>, %arg2: memref<1x32xf32, #tpu.memory_space<vmem>>, %arg3: memref<1x32xf32, #tpu.memory_space<vmem>>, %arg4: memref<32x32xbf16, #tpu.memory_space<vmem>>, %arg5: memref<1x32xf32, #tpu.memory_space<vmem>>, %arg6: memref<32x32xbf16, #tpu.memory_space<vmem>>, %arg7: memref<1x32xf32, #tpu.memory_space<vmem>>, %arg8: memref<14x32xbf16, #tpu.memory_space<vmem>>) attributes {dimension_semantics = [#tpu.dimension_semantics<parallel>], iteration_bounds = array<i64: 1>, scalar_prefetch = 0 : i64, scratch_operands = 0 : i64, tpu.core_type = #tpu.core_type<tc>, window_params = [{transform_indices = @transform_0, window_bounds = array<i64: 14, 32>}, {pipeline_mode = #tpu.pipeline_mode<synchronous>, transform_indices = @transform_1, window_bounds = array<i64: 1, 32>}, {pipeline_mode = #tpu.pipeline_mode<synchronous>, transform_indices = @transform_2, window_bounds = array<i64: 1, 32>}, {pipeline_mode = #tpu.pipeline_mode<synchronous>, transform_indices = @transform_3, window_bounds = array<i64: 32, 32>}, {pipeline_mode = #tpu.pipeline_mode<synchronous>, transform_indices = @transform_4, window_bounds = array<i64: 1, 32>}, {pipeline_mode = #tpu.pipeline_mode<synchronous>, transform_indices = @transform_5, window_bounds = array<i64: 32, 32>}, {pipeline_mode = #tpu.pipeline_mode<synchronous>, transform_indices = @transform_6, window_bounds = array<i64: 1, 32>}, {transform_indices = @transform_7, window_bounds = array<i64: 14, 32>}]} {
    %c0 = arith.constant 0 : index
    %c0_0 = arith.constant 0 : index
    %0 = vector.load %arg1[%c0, %c0_0] : memref<14x32xf32, #tpu.memory_space<vmem>>, vector<14x32xf32>
    %c0_1 = arith.constant 0 : index
    %c0_2 = arith.constant 0 : index
    %1 = vector.load %arg2[%c0_1, %c0_2] : memref<1x32xf32, #tpu.memory_space<vmem>>, vector<1x32xf32>
    %c0_3 = arith.constant 0 : index
    %c0_4 = arith.constant 0 : index
    %2 = vector.load %arg3[%c0_3, %c0_4] : memref<1x32xf32, #tpu.memory_space<vmem>>, vector<1x32xf32>
    %cst = arith.constant dense<0.000000e+00> : vector<14xf32>
    %3 = vector.multi_reduction <add>, %0, %cst [1] : vector<14x32xf32> to vector<14xf32>
    %4 = vector.shape_cast %3 : vector<14xf32> to vector<14x1xf32>
    %cst_5 = arith.constant 3.200000e+01 : f32
    %5 = vector.broadcast %cst_5 : f32 to vector<14x1xf32>
    %6 = arith.divf %4, %5 : vector<14x1xf32>
    %7 = vector.broadcast %6 : vector<14x1xf32> to vector<14x32xf32>
    %8 = arith.subf %0, %7 : vector<14x32xf32>
    %9 = arith.mulf %8, %8 : vector<14x32xf32>
    %cst_6 = arith.constant dense<0.000000e+00> : vector<14xf32>
    %10 = vector.multi_reduction <add>, %9, %cst_6 [1] : vector<14x32xf32> to vector<14xf32>
    %11 = vector.shape_cast %10 : vector<14xf32> to vector<14x1xf32>
    %cst_7 = arith.constant 3.200000e+01 : f32
    %12 = vector.broadcast %cst_7 : f32 to vector<14x1xf32>
    %13 = arith.divf %11, %12 : vector<14x1xf32>
    %14 = vector.broadcast %6 : vector<14x1xf32> to vector<14x32xf32>
    %15 = arith.subf %0, %14 : vector<14x32xf32>
    %cst_8 = arith.constant 9.99999974E-6 : f32
    %16 = vector.broadcast %cst_8 : f32 to vector<14x1xf32>
    %17 = arith.addf %13, %16 : vector<14x1xf32>
    %18 = math.rsqrt %17 : vector<14x1xf32>
    %19 = vector.broadcast %18 : vector<14x1xf32> to vector<14x32xf32>
    %20 = arith.mulf %15, %19 : vector<14x32xf32>
    %21 = vector.broadcast %1 : vector<1x32xf32> to vector<14x32xf32>
    %22 = arith.mulf %20, %21 : vector<14x32xf32>
    %23 = vector.broadcast %2 : vector<1x32xf32> to vector<14x32xf32>
    %24 = arith.addf %22, %23 : vector<14x32xf32>
    %25 = arith.truncf %24 : vector<14x32xf32> to vector<14x32xbf16>
    %c0_9 = arith.constant 0 : index
    %c0_10 = arith.constant 0 : index
    %26 = vector.load %arg4[%c0_9, %c0_10] : memref<32x32xbf16, #tpu.memory_space<vmem>>, vector<32x32xbf16>
    %cst_11 = arith.constant dense<0.000000e+00> : vector<14x32xf32>
    %27 = tpu.matmul %25, %26, %cst_11 {dimension_numbers = #tpu.dot_dimension_numbers<[1], [0], [0], [1], [0, 0, 1, 1], [], []>} : vector<14x32xbf16>, vector<32x32xbf16>, vector<14x32xf32> -> vector<14x32xf32>
    %c0_12 = arith.constant 0 : index
    %c0_13 = arith.constant 0 : index
    %28 = vector.load %arg5[%c0_12, %c0_13] : memref<1x32xf32, #tpu.memory_space<vmem>>, vector<1x32xf32>
    %29 = vector.broadcast %28 : vector<1x32xf32> to vector<14x32xf32>
    %30 = arith.addf %27, %29 : vector<14x32xf32>
    %c0_14 = arith.constant 0 : index
    %c0_15 = arith.constant 0 : index
    %31 = vector.load %arg6[%c0_14, %c0_15] : memref<32x32xbf16, #tpu.memory_space<vmem>>, vector<32x32xbf16>
    %cst_16 = arith.constant dense<0.000000e+00> : vector<14x32xf32>
    %32 = tpu.matmul %25, %31, %cst_16 {dimension_numbers = #tpu.dot_dimension_numbers<[1], [0], [0], [1], [0, 0, 1, 1], [], []>} : vector<14x32xbf16>, vector<32x32xbf16>, vector<14x32xf32> -> vector<14x32xf32>
    %c0_17 = arith.constant 0 : index
    %c0_18 = arith.constant 0 : index
    %33 = vector.load %arg7[%c0_17, %c0_18] : memref<1x32xf32, #tpu.memory_space<vmem>>, vector<1x32xf32>
    %34 = vector.broadcast %33 : vector<1x32xf32> to vector<14x32xf32>
    %35 = arith.addf %32, %34 : vector<14x32xf32>
    %36 = arith.negf %35 : vector<14x32xf32>
    %37 = math.exp %36 : vector<14x32xf32>
    %cst_19 = arith.constant 1.000000e+00 : f32
    %38 = vector.broadcast %cst_19 : f32 to vector<14x32xf32>
    %39 = arith.addf %38, %37 : vector<14x32xf32>
    %40 = arith.divf %38, %39 : vector<14x32xf32>
    %41 = arith.mulf %30, %40 : vector<14x32xf32>
    %42 = arith.truncf %41 : vector<14x32xf32> to vector<14x32xbf16>
    %c0_20 = arith.constant 0 : index
    %c0_21 = arith.constant 0 : index
    %43 = vector.load %arg8[%c0_20, %c0_21] : memref<14x32xbf16, #tpu.memory_space<vmem>>, vector<14x32xbf16>
    tpu.vector_store %arg8[%c0_20, %c0_21], %42 {strides = array<i32>} : memref<14x32xbf16, #tpu.memory_space<vmem>>, vector<14x32xbf16>,
    return
  }
  func.func @transform_0(%arg0: i32) -> (i32, i32) {
    %c0_i32 = arith.constant 0 : i32
    %c0_i32_0 = arith.constant 0 : i32
    return %arg0, %c0_i32 : i32, i32
  }
  func.func @transform_1(%arg0: i32) -> (i32, i32) {
    %c0_i32 = arith.constant 0 : i32
    %c0_i32_0 = arith.constant 0 : i32
    %c0_i32_1 = arith.constant 0 : i32
    return %c0_i32, %c0_i32_0 : i32, i32
  }
  func.func @transform_2(%arg0: i32) -> (i32, i32) {
    %c0_i32 = arith.constant 0 : i32
    %c0_i32_0 = arith.constant 0 : i32
    %c0_i32_1 = arith.constant 0 : i32
    return %c0_i32, %c0_i32_0 : i32, i32
  }
  func.func @transform_3(%arg0: i32) -> (i32, i32) {
    %c0_i32 = arith.constant 0 : i32
    %c0_i32_0 = arith.constant 0 : i32
    %c0_i32_1 = arith.constant 0 : i32
    return %c0_i32, %c0_i32_0 : i32, i32
  }
  func.func @transform_4(%arg0: i32) -> (i32, i32) {
    %c0_i32 = arith.constant 0 : i32
    %c0_i32_0 = arith.constant 0 : i32
    %c0_i32_1 = arith.constant 0 : i32
    return %c0_i32, %c0_i32_0 : i32, i32
  }
  func.func @transform_5(%arg0: i32) -> (i32, i32) {
    %c0_i32 = arith.constant 0 : i32
    %c0_i32_0 = arith.constant 0 : i32
    %c0_i32_1 = arith.constant 0 : i32
    return %c0_i32, %c0_i32_0 : i32, i32
  }
  func.func @transform_6(%arg0: i32) -> (i32, i32) {
    %c0_i32 = arith.constant 0 : i32
    %c0_i32_0 = arith.constant 0 : i32
    %c0_i32_1 = arith.constant 0 : i32
    return %c0_i32, %c0_i32_0 : i32, i32
  }
  func.func @transform_7(%arg0: i32) -> (i32, i32) {
    %c0_i32 = arith.constant 0 : i32
    %c0_i32_0 = arith.constant 0 : i32
    return %arg0, %c0_i32 : i32, i32
  }
}

module attributes {stable_mosaic.version = 11 : i64} {
  func.func @_dwconv_kernel(%arg0: i32, %arg1: memref<1x13x32xbf16, #tpu.memory_space<vmem>>, %arg2: memref<7x32xf32, #tpu.memory_space<vmem>>, %arg3: memref<1x32xf32, #tpu.memory_space<vmem>>, %arg4: memref<1x7x32xbf16, #tpu.memory_space<vmem>>) attributes {dimension_semantics = [#tpu.dimension_semantics<parallel>], iteration_bounds = array<i64: 2>, scalar_prefetch = 0 : i64, scratch_operands = 0 : i64, tpu.core_type = #tpu.core_type<tc>, window_params = [{transform_indices = @transform_0, window_bounds = array<i64: 1, 13, 32>}, {pipeline_mode = #tpu.pipeline_mode<synchronous>, transform_indices = @transform_1, window_bounds = array<i64: 7, 32>}, {pipeline_mode = #tpu.pipeline_mode<synchronous>, transform_indices = @transform_2, window_bounds = array<i64: 1, 32>}, {transform_indices = @transform_3, window_bounds = array<i64: 1, 7, 32>}]} {
    %c0 = arith.constant 0 : index
    %c0_0 = arith.constant 0 : index
    %c0_1 = arith.constant 0 : index
    %0 = vector.load %arg1[%c0, %c0_0, %c0_1] : memref<1x13x32xbf16, #tpu.memory_space<vmem>>, vector<1x7x32xbf16>
    %1 = vector.shape_cast %0 : vector<1x7x32xbf16> to vector<7x32xbf16>
    %2 = arith.extf %1 : vector<7x32xbf16> to vector<7x32xf32>
    %c0_2 = arith.constant 0 : index
    %c0_3 = arith.constant 0 : index
    %3 = vector.load %arg2[%c0_2, %c0_3] : memref<7x32xf32, #tpu.memory_space<vmem>>, vector<1x32xf32>
    %4 = vector.shape_cast %3 : vector<1x32xf32> to vector<32xf32>
    %5 = vector.shape_cast %4 : vector<32xf32> to vector<1x32xf32>
    %6 = vector.broadcast %5 : vector<1x32xf32> to vector<7x32xf32>
    %7 = arith.mulf %2, %6 : vector<7x32xf32>
    %c0_4 = arith.constant 0 : index
    %c1 = arith.constant 1 : index
    %c0_5 = arith.constant 0 : index
    %8 = vector.load %arg1[%c0_4, %c1, %c0_5] : memref<1x13x32xbf16, #tpu.memory_space<vmem>>, vector<1x7x32xbf16>
    %9 = vector.shape_cast %8 : vector<1x7x32xbf16> to vector<7x32xbf16>
    %10 = arith.extf %9 : vector<7x32xbf16> to vector<7x32xf32>
    %c1_6 = arith.constant 1 : index
    %c0_7 = arith.constant 0 : index
    %11 = vector.load %arg2[%c1_6, %c0_7] : memref<7x32xf32, #tpu.memory_space<vmem>>, vector<1x32xf32>
    %12 = vector.shape_cast %11 : vector<1x32xf32> to vector<32xf32>
    %13 = vector.shape_cast %12 : vector<32xf32> to vector<1x32xf32>
    %14 = vector.broadcast %13 : vector<1x32xf32> to vector<7x32xf32>
    %15 = arith.mulf %10, %14 : vector<7x32xf32>
    %16 = arith.addf %7, %15 : vector<7x32xf32>
    %c0_8 = arith.constant 0 : index
    %c2 = arith.constant 2 : index
    %c0_9 = arith.constant 0 : index
    %17 = vector.load %arg1[%c0_8, %c2, %c0_9] : memref<1x13x32xbf16, #tpu.memory_space<vmem>>, vector<1x7x32xbf16>
    %18 = vector.shape_cast %17 : vector<1x7x32xbf16> to vector<7x32xbf16>
    %19 = arith.extf %18 : vector<7x32xbf16> to vector<7x32xf32>
    %c2_10 = arith.constant 2 : index
    %c0_11 = arith.constant 0 : index
    %20 = vector.load %arg2[%c2_10, %c0_11] : memref<7x32xf32, #tpu.memory_space<vmem>>, vector<1x32xf32>
    %21 = vector.shape_cast %20 : vector<1x32xf32> to vector<32xf32>
    %22 = vector.shape_cast %21 : vector<32xf32> to vector<1x32xf32>
    %23 = vector.broadcast %22 : vector<1x32xf32> to vector<7x32xf32>
    %24 = arith.mulf %19, %23 : vector<7x32xf32>
    %25 = arith.addf %16, %24 : vector<7x32xf32>
    %c0_12 = arith.constant 0 : index
    %c3 = arith.constant 3 : index
    %c0_13 = arith.constant 0 : index
    %26 = vector.load %arg1[%c0_12, %c3, %c0_13] : memref<1x13x32xbf16, #tpu.memory_space<vmem>>, vector<1x7x32xbf16>
    %27 = vector.shape_cast %26 : vector<1x7x32xbf16> to vector<7x32xbf16>
    %28 = arith.extf %27 : vector<7x32xbf16> to vector<7x32xf32>
    %c3_14 = arith.constant 3 : index
    %c0_15 = arith.constant 0 : index
    %29 = vector.load %arg2[%c3_14, %c0_15] : memref<7x32xf32, #tpu.memory_space<vmem>>, vector<1x32xf32>
    %30 = vector.shape_cast %29 : vector<1x32xf32> to vector<32xf32>
    %31 = vector.shape_cast %30 : vector<32xf32> to vector<1x32xf32>
    %32 = vector.broadcast %31 : vector<1x32xf32> to vector<7x32xf32>
    %33 = arith.mulf %28, %32 : vector<7x32xf32>
    %34 = arith.addf %25, %33 : vector<7x32xf32>
    %c0_16 = arith.constant 0 : index
    %c4 = arith.constant 4 : index
    %c0_17 = arith.constant 0 : index
    %35 = vector.load %arg1[%c0_16, %c4, %c0_17] : memref<1x13x32xbf16, #tpu.memory_space<vmem>>, vector<1x7x32xbf16>
    %36 = vector.shape_cast %35 : vector<1x7x32xbf16> to vector<7x32xbf16>
    %37 = arith.extf %36 : vector<7x32xbf16> to vector<7x32xf32>
    %c4_18 = arith.constant 4 : index
    %c0_19 = arith.constant 0 : index
    %38 = vector.load %arg2[%c4_18, %c0_19] : memref<7x32xf32, #tpu.memory_space<vmem>>, vector<1x32xf32>
    %39 = vector.shape_cast %38 : vector<1x32xf32> to vector<32xf32>
    %40 = vector.shape_cast %39 : vector<32xf32> to vector<1x32xf32>
    %41 = vector.broadcast %40 : vector<1x32xf32> to vector<7x32xf32>
    %42 = arith.mulf %37, %41 : vector<7x32xf32>
    %43 = arith.addf %34, %42 : vector<7x32xf32>
    %c0_20 = arith.constant 0 : index
    %c5 = arith.constant 5 : index
    %c0_21 = arith.constant 0 : index
    %44 = vector.load %arg1[%c0_20, %c5, %c0_21] : memref<1x13x32xbf16, #tpu.memory_space<vmem>>, vector<1x7x32xbf16>
    %45 = vector.shape_cast %44 : vector<1x7x32xbf16> to vector<7x32xbf16>
    %46 = arith.extf %45 : vector<7x32xbf16> to vector<7x32xf32>
    %c5_22 = arith.constant 5 : index
    %c0_23 = arith.constant 0 : index
    %47 = vector.load %arg2[%c5_22, %c0_23] : memref<7x32xf32, #tpu.memory_space<vmem>>, vector<1x32xf32>
    %48 = vector.shape_cast %47 : vector<1x32xf32> to vector<32xf32>
    %49 = vector.shape_cast %48 : vector<32xf32> to vector<1x32xf32>
    %50 = vector.broadcast %49 : vector<1x32xf32> to vector<7x32xf32>
    %51 = arith.mulf %46, %50 : vector<7x32xf32>
    %52 = arith.addf %43, %51 : vector<7x32xf32>
    %c0_24 = arith.constant 0 : index
    %c6 = arith.constant 6 : index
    %c0_25 = arith.constant 0 : index
    %53 = vector.load %arg1[%c0_24, %c6, %c0_25] : memref<1x13x32xbf16, #tpu.memory_space<vmem>>, vector<1x7x32xbf16>
    %54 = vector.shape_cast %53 : vector<1x7x32xbf16> to vector<7x32xbf16>
    %55 = arith.extf %54 : vector<7x32xbf16> to vector<7x32xf32>
    %c6_26 = arith.constant 6 : index
    %c0_27 = arith.constant 0 : index
    %56 = vector.load %arg2[%c6_26, %c0_27] : memref<7x32xf32, #tpu.memory_space<vmem>>, vector<1x32xf32>
    %57 = vector.shape_cast %56 : vector<1x32xf32> to vector<32xf32>
    %58 = vector.shape_cast %57 : vector<32xf32> to vector<1x32xf32>
    %59 = vector.broadcast %58 : vector<1x32xf32> to vector<7x32xf32>
    %60 = arith.mulf %55, %59 : vector<7x32xf32>
    %61 = arith.addf %52, %60 : vector<7x32xf32>
    %c0_28 = arith.constant 0 : index
    %c0_29 = arith.constant 0 : index
    %62 = vector.load %arg3[%c0_28, %c0_29] : memref<1x32xf32, #tpu.memory_space<vmem>>, vector<1x32xf32>
    %63 = vector.broadcast %62 : vector<1x32xf32> to vector<7x32xf32>
    %64 = arith.addf %61, %63 : vector<7x32xf32>
    %65 = arith.negf %64 : vector<7x32xf32>
    %66 = math.exp %65 : vector<7x32xf32>
    %cst = arith.constant 1.000000e+00 : f32
    %67 = vector.broadcast %cst : f32 to vector<7x32xf32>
    %68 = arith.addf %67, %66 : vector<7x32xf32>
    %69 = arith.divf %67, %68 : vector<7x32xf32>
    %70 = arith.mulf %64, %69 : vector<7x32xf32>
    %71 = arith.truncf %70 : vector<7x32xf32> to vector<7x32xbf16>
    %c0_30 = arith.constant 0 : index
    %c0_31 = arith.constant 0 : index
    %c0_32 = arith.constant 0 : index
    %72 = vector.load %arg4[%c0_30, %c0_31, %c0_32] : memref<1x7x32xbf16, #tpu.memory_space<vmem>>, vector<1x7x32xbf16>
    %73 = vector.shape_cast %72 : vector<1x7x32xbf16> to vector<7x32xbf16>
    %74 = vector.shape_cast %71 : vector<7x32xbf16> to vector<1x7x32xbf16>
    tpu.vector_store %arg4[%c0_30, %c0_31, %c0_32], %74 {strides = array<i32>} : memref<1x7x32xbf16, #tpu.memory_space<vmem>>, vector<1x7x32xbf16>,
    return
  }
  func.func @transform_0(%arg0: i32) -> (i32, i32, i32) {
    %c0_i32 = arith.constant 0 : i32
    %c0_i32_0 = arith.constant 0 : i32
    %c0_i32_1 = arith.constant 0 : i32
    return %arg0, %c0_i32, %c0_i32_0 : i32, i32, i32
  }
  func.func @transform_1(%arg0: i32) -> (i32, i32) {
    %c0_i32 = arith.constant 0 : i32
    %c0_i32_0 = arith.constant 0 : i32
    %c0_i32_1 = arith.constant 0 : i32
    return %c0_i32, %c0_i32_0 : i32, i32
  }
  func.func @transform_2(%arg0: i32) -> (i32, i32) {
    %c0_i32 = arith.constant 0 : i32
    %c0_i32_0 = arith.constant 0 : i32
    %c0_i32_1 = arith.constant 0 : i32
    return %c0_i32, %c0_i32_0 : i32, i32
  }
  func.func @transform_3(%arg0: i32) -> (i32, i32, i32) {
    %c0_i32 = arith.constant 0 : i32
    %c0_i32_0 = arith.constant 0 : i32
    %c0_i32_1 = arith.constant 0 : i32
    return %arg0, %c0_i32, %c0_i32_0 : i32, i32, i32
  }
}

module attributes {stable_mosaic.version = 11 : i64} {
  func.func @_mm_res_kernel(%arg0: i32, %arg1: memref<14x64xbf16, #tpu.memory_space<vmem>>, %arg2: memref<64x32xbf16, #tpu.memory_space<vmem>>, %arg3: memref<1x32xf32, #tpu.memory_space<vmem>>, %arg4: memref<14x32xf32, #tpu.memory_space<vmem>>, %arg5: memref<1x32xf32, #tpu.memory_space<vmem>>, %arg6: memref<1x32xf32, #tpu.memory_space<vmem>>, %arg7: memref<14x32xf32, #tpu.memory_space<vmem>>) attributes {dimension_semantics = [#tpu.dimension_semantics<parallel>], iteration_bounds = array<i64: 1>, scalar_prefetch = 0 : i64, scratch_operands = 0 : i64, tpu.core_type = #tpu.core_type<tc>, window_params = [{transform_indices = @transform_0, window_bounds = array<i64: 14, 64>}, {pipeline_mode = #tpu.pipeline_mode<synchronous>, transform_indices = @transform_1, window_bounds = array<i64: 64, 32>}, {pipeline_mode = #tpu.pipeline_mode<synchronous>, transform_indices = @transform_2, window_bounds = array<i64: 1, 32>}, {transform_indices = @transform_3, window_bounds = array<i64: 14, 32>}, {pipeline_mode = #tpu.pipeline_mode<synchronous>, transform_indices = @transform_4, window_bounds = array<i64: 1, 32>}, {pipeline_mode = #tpu.pipeline_mode<synchronous>, transform_indices = @transform_5, window_bounds = array<i64: 1, 32>}, {transform_indices = @transform_6, window_bounds = array<i64: 14, 32>}]} {
    %c0 = arith.constant 0 : index
    %c0_0 = arith.constant 0 : index
    %0 = vector.load %arg1[%c0, %c0_0] : memref<14x64xbf16, #tpu.memory_space<vmem>>, vector<14x64xbf16>
    %c0_1 = arith.constant 0 : index
    %c0_2 = arith.constant 0 : index
    %1 = vector.load %arg2[%c0_1, %c0_2] : memref<64x32xbf16, #tpu.memory_space<vmem>>, vector<64x32xbf16>
    %cst = arith.constant dense<0.000000e+00> : vector<14x32xf32>
    %2 = tpu.matmul %0, %1, %cst {dimension_numbers = #tpu.dot_dimension_numbers<[1], [0], [0], [1], [0, 0, 1, 1], [], []>} : vector<14x64xbf16>, vector<64x32xbf16>, vector<14x32xf32> -> vector<14x32xf32>
    %c0_3 = arith.constant 0 : index
    %c0_4 = arith.constant 0 : index
    %3 = vector.load %arg3[%c0_3, %c0_4] : memref<1x32xf32, #tpu.memory_space<vmem>>, vector<1x32xf32>
    %4 = vector.broadcast %3 : vector<1x32xf32> to vector<14x32xf32>
    %5 = arith.addf %2, %4 : vector<14x32xf32>
    %c0_5 = arith.constant 0 : index
    %c0_6 = arith.constant 0 : index
    %6 = vector.load %arg4[%c0_5, %c0_6] : memref<14x32xf32, #tpu.memory_space<vmem>>, vector<14x32xf32>
    %cst_7 = arith.constant 5.000000e-01 : f32
    %7 = vector.broadcast %cst_7 : f32 to vector<14x32xf32>
    %8 = arith.mulf %7, %5 : vector<14x32xf32>
    %9 = arith.addf %6, %8 : vector<14x32xf32>
    %c0_8 = arith.constant 0 : index
    %c0_9 = arith.constant 0 : index
    %10 = vector.load %arg5[%c0_8, %c0_9] : memref<1x32xf32, #tpu.memory_space<vmem>>, vector<1x32xf32>
    %c0_10 = arith.constant 0 : index
    %c0_11 = arith.constant 0 : index
    %11 = vector.load %arg6[%c0_10, %c0_11] : memref<1x32xf32, #tpu.memory_space<vmem>>, vector<1x32xf32>
    %cst_12 = arith.constant dense<0.000000e+00> : vector<14xf32>
    %12 = vector.multi_reduction <add>, %9, %cst_12 [1] : vector<14x32xf32> to vector<14xf32>
    %13 = vector.shape_cast %12 : vector<14xf32> to vector<14x1xf32>
    %cst_13 = arith.constant 3.200000e+01 : f32
    %14 = vector.broadcast %cst_13 : f32 to vector<14x1xf32>
    %15 = arith.divf %13, %14 : vector<14x1xf32>
    %16 = vector.broadcast %15 : vector<14x1xf32> to vector<14x32xf32>
    %17 = arith.subf %9, %16 : vector<14x32xf32>
    %18 = arith.mulf %17, %17 : vector<14x32xf32>
    %cst_14 = arith.constant dense<0.000000e+00> : vector<14xf32>
    %19 = vector.multi_reduction <add>, %18, %cst_14 [1] : vector<14x32xf32> to vector<14xf32>
    %20 = vector.shape_cast %19 : vector<14xf32> to vector<14x1xf32>
    %cst_15 = arith.constant 3.200000e+01 : f32
    %21 = vector.broadcast %cst_15 : f32 to vector<14x1xf32>
    %22 = arith.divf %20, %21 : vector<14x1xf32>
    %23 = vector.broadcast %15 : vector<14x1xf32> to vector<14x32xf32>
    %24 = arith.subf %9, %23 : vector<14x32xf32>
    %cst_16 = arith.constant 9.99999974E-6 : f32
    %25 = vector.broadcast %cst_16 : f32 to vector<14x1xf32>
    %26 = arith.addf %22, %25 : vector<14x1xf32>
    %27 = math.rsqrt %26 : vector<14x1xf32>
    %28 = vector.broadcast %27 : vector<14x1xf32> to vector<14x32xf32>
    %29 = arith.mulf %24, %28 : vector<14x32xf32>
    %30 = vector.broadcast %10 : vector<1x32xf32> to vector<14x32xf32>
    %31 = arith.mulf %29, %30 : vector<14x32xf32>
    %32 = vector.broadcast %11 : vector<1x32xf32> to vector<14x32xf32>
    %33 = arith.addf %31, %32 : vector<14x32xf32>
    %c0_17 = arith.constant 0 : index
    %c0_18 = arith.constant 0 : index
    %34 = vector.load %arg7[%c0_17, %c0_18] : memref<14x32xf32, #tpu.memory_space<vmem>>, vector<14x32xf32>
    tpu.vector_store %arg7[%c0_17, %c0_18], %33 {strides = array<i32>} : memref<14x32xf32, #tpu.memory_space<vmem>>, vector<14x32xf32>,
    return
  }
  func.func @transform_0(%arg0: i32) -> (i32, i32) {
    %c0_i32 = arith.constant 0 : i32
    %c0_i32_0 = arith.constant 0 : i32
    return %arg0, %c0_i32 : i32, i32
  }
  func.func @transform_1(%arg0: i32) -> (i32, i32) {
    %c0_i32 = arith.constant 0 : i32
    %c0_i32_0 = arith.constant 0 : i32
    %c0_i32_1 = arith.constant 0 : i32
    return %c0_i32, %c0_i32_0 : i32, i32
  }
  func.func @transform_2(%arg0: i32) -> (i32, i32) {
    %c0_i32 = arith.constant 0 : i32
    %c0_i32_0 = arith.constant 0 : i32
    %c0_i32_1 = arith.constant 0 : i32
    return %c0_i32, %c0_i32_0 : i32, i32
  }
  func.func @transform_3(%arg0: i32) -> (i32, i32) {
    %c0_i32 = arith.constant 0 : i32
    %c0_i32_0 = arith.constant 0 : i32
    return %arg0, %c0_i32 : i32, i32
  }
  func.func @transform_4(%arg0: i32) -> (i32, i32) {
    %c0_i32 = arith.constant 0 : i32
    %c0_i32_0 = arith.constant 0 : i32
    %c0_i32_1 = arith.constant 0 : i32
    return %c0_i32, %c0_i32_0 : i32, i32
  }
  func.func @transform_5(%arg0: i32) -> (i32, i32) {
    %c0_i32 = arith.constant 0 : i32
    %c0_i32_0 = arith.constant 0 : i32
    %c0_i32_1 = arith.constant 0 : i32
    return %c0_i32, %c0_i32_0 : i32, i32
  }
  func.func @transform_6(%arg0: i32) -> (i32, i32) {
    %c0_i32 = arith.constant 0 : i32
    %c0_i32_0 = arith.constant 0 : i32
    return %arg0, %c0_i32 : i32, i32
  }
}

module attributes {stable_mosaic.version = 11 : i64} {
  func.func @_cross_kv_kernel(%arg0: i32, %arg1: i32, %arg2: memref<14x32xf32, #tpu.memory_space<vmem>>, %arg3: memref<1x32x32xbf16, #tpu.memory_space<vmem>>, %arg4: memref<1x1x32xf32, #tpu.memory_space<vmem>>, %arg5: memref<1x32x32xbf16, #tpu.memory_space<vmem>>, %arg6: memref<1x1x32xf32, #tpu.memory_space<vmem>>, %arg7: memref<1x14x32xf32, #tpu.memory_space<vmem>>, %arg8: memref<1x14x32xf32, #tpu.memory_space<vmem>>) attributes {dimension_semantics = [#tpu.dimension_semantics<parallel>, #tpu.dimension_semantics<parallel>], iteration_bounds = array<i64: 3, 1>, scalar_prefetch = 0 : i64, scratch_operands = 0 : i64, tpu.core_type = #tpu.core_type<tc>, window_params = [{transform_indices = @transform_0, window_bounds = array<i64: 14, 32>}, {transform_indices = @transform_1, window_bounds = array<i64: 1, 32, 32>}, {transform_indices = @transform_2, window_bounds = array<i64: 1, 1, 32>}, {transform_indices = @transform_3, window_bounds = array<i64: 1, 32, 32>}, {transform_indices = @transform_4, window_bounds = array<i64: 1, 1, 32>}, {transform_indices = @transform_5, window_bounds = array<i64: 1, 14, 32>}, {transform_indices = @transform_6, window_bounds = array<i64: 1, 14, 32>}]} {
    %c0 = arith.constant 0 : index
    %c0_0 = arith.constant 0 : index
    %0 = vector.load %arg2[%c0, %c0_0] : memref<14x32xf32, #tpu.memory_space<vmem>>, vector<14x32xf32>
    %1 = arith.truncf %0 : vector<14x32xf32> to vector<14x32xbf16>
    %c0_1 = arith.constant 0 : index
    %c0_2 = arith.constant 0 : index
    %c0_3 = arith.constant 0 : index
    %2 = vector.load %arg3[%c0_1, %c0_2, %c0_3] : memref<1x32x32xbf16, #tpu.memory_space<vmem>>, vector<1x32x32xbf16>
    %3 = vector.shape_cast %2 : vector<1x32x32xbf16> to vector<32x32xbf16>
    %cst = arith.constant dense<0.000000e+00> : vector<14x32xf32>
    %4 = tpu.matmul %1, %3, %cst {dimension_numbers = #tpu.dot_dimension_numbers<[1], [0], [0], [1], [0, 0, 1, 1], [], []>} : vector<14x32xbf16>, vector<32x32xbf16>, vector<14x32xf32> -> vector<14x32xf32>
    %c0_4 = arith.constant 0 : index
    %c0_5 = arith.constant 0 : index
    %c0_6 = arith.constant 0 : index
    %5 = vector.load %arg4[%c0_4, %c0_5, %c0_6] : memref<1x1x32xf32, #tpu.memory_space<vmem>>, vector<1x1x32xf32>
    %6 = vector.shape_cast %5 : vector<1x1x32xf32> to vector<1x32xf32>
    %7 = vector.broadcast %6 : vector<1x32xf32> to vector<14x32xf32>
    %8 = arith.addf %4, %7 : vector<14x32xf32>
    %c0_7 = arith.constant 0 : index
    %c0_8 = arith.constant 0 : index
    %c0_9 = arith.constant 0 : index
    %9 = vector.load %arg7[%c0_7, %c0_8, %c0_9] : memref<1x14x32xf32, #tpu.memory_space<vmem>>, vector<1x14x32xf32>
    %10 = vector.shape_cast %9 : vector<1x14x32xf32> to vector<14x32xf32>
    %11 = vector.shape_cast %8 : vector<14x32xf32> to vector<1x14x32xf32>
    tpu.vector_store %arg7[%c0_7, %c0_8, %c0_9], %11 {strides = array<i32>} : memref<1x14x32xf32, #tpu.memory_space<vmem>>, vector<1x14x32xf32>,
    %c0_10 = arith.constant 0 : index
    %c0_11 = arith.constant 0 : index
    %c0_12 = arith.constant 0 : index
    %12 = vector.load %arg5[%c0_10, %c0_11, %c0_12] : memref<1x32x32xbf16, #tpu.memory_space<vmem>>, vector<1x32x32xbf16>
    %13 = vector.shape_cast %12 : vector<1x32x32xbf16> to vector<32x32xbf16>
    %cst_13 = arith.constant dense<0.000000e+00> : vector<14x32xf32>
    %14 = tpu.matmul %1, %13, %cst_13 {dimension_numbers = #tpu.dot_dimension_numbers<[1], [0], [0], [1], [0, 0, 1, 1], [], []>} : vector<14x32xbf16>, vector<32x32xbf16>, vector<14x32xf32> -> vector<14x32xf32>
    %c0_14 = arith.constant 0 : index
    %c0_15 = arith.constant 0 : index
    %c0_16 = arith.constant 0 : index
    %15 = vector.load %arg6[%c0_14, %c0_15, %c0_16] : memref<1x1x32xf32, #tpu.memory_space<vmem>>, vector<1x1x32xf32>
    %16 = vector.shape_cast %15 : vector<1x1x32xf32> to vector<1x32xf32>
    %17 = vector.broadcast %16 : vector<1x32xf32> to vector<14x32xf32>
    %18 = arith.addf %14, %17 : vector<14x32xf32>
    %c0_17 = arith.constant 0 : index
    %c0_18 = arith.constant 0 : index
    %c0_19 = arith.constant 0 : index
    %19 = vector.load %arg8[%c0_17, %c0_18, %c0_19] : memref<1x14x32xf32, #tpu.memory_space<vmem>>, vector<1x14x32xf32>
    %20 = vector.shape_cast %19 : vector<1x14x32xf32> to vector<14x32xf32>
    %21 = vector.shape_cast %18 : vector<14x32xf32> to vector<1x14x32xf32>
    tpu.vector_store %arg8[%c0_17, %c0_18, %c0_19], %21 {strides = array<i32>} : memref<1x14x32xf32, #tpu.memory_space<vmem>>, vector<1x14x32xf32>,
    return
  }
  func.func @transform_0(%arg0: i32, %arg1: i32) -> (i32, i32) {
    %c0_i32 = arith.constant 0 : i32
    %c0_i32_0 = arith.constant 0 : i32
    return %arg1, %c0_i32 : i32, i32
  }
  func.func @transform_1(%arg0: i32, %arg1: i32) -> (i32, i32, i32) {
    %c0_i32 = arith.constant 0 : i32
    %c0_i32_0 = arith.constant 0 : i32
    %c0_i32_1 = arith.constant 0 : i32
    return %arg0, %c0_i32, %c0_i32_0 : i32, i32, i32
  }
  func.func @transform_2(%arg0: i32, %arg1: i32) -> (i32, i32, i32) {
    %c0_i32 = arith.constant 0 : i32
    %c0_i32_0 = arith.constant 0 : i32
    %c0_i32_1 = arith.constant 0 : i32
    return %arg0, %c0_i32, %c0_i32_0 : i32, i32, i32
  }
  func.func @transform_3(%arg0: i32, %arg1: i32) -> (i32, i32, i32) {
    %c0_i32 = arith.constant 0 : i32
    %c0_i32_0 = arith.constant 0 : i32
    %c0_i32_1 = arith.constant 0 : i32
    return %arg0, %c0_i32, %c0_i32_0 : i32, i32, i32
  }
  func.func @transform_4(%arg0: i32, %arg1: i32) -> (i32, i32, i32) {
    %c0_i32 = arith.constant 0 : i32
    %c0_i32_0 = arith.constant 0 : i32
    %c0_i32_1 = arith.constant 0 : i32
    return %arg0, %c0_i32, %c0_i32_0 : i32, i32, i32
  }
  func.func @transform_5(%arg0: i32, %arg1: i32) -> (i32, i32, i32) {
    %c0_i32 = arith.constant 0 : i32
    %c0_i32_0 = arith.constant 0 : i32
    return %arg0, %arg1, %c0_i32 : i32, i32, i32
  }
  func.func @transform_6(%arg0: i32, %arg1: i32) -> (i32, i32, i32) {
    %c0_i32 = arith.constant 0 : i32
    %c0_i32_0 = arith.constant 0 : i32
    return %arg0, %arg1, %c0_i32 : i32, i32, i32
  }
}

</mosaic_0001>

<bundles_post_ra>
// kernel: audio_encoder_tensor_cache.24
= control target key start
LH: loop header
LB: loop body
LE: loop exit
PB: predicated region body
PF: predicated region fallthrough
CT: control target
= control target key end

     0   :  { %vm129_vm0 = vcmask 1043456   ;;  %vm130_vm1 = vcmask 1044480   ;;  %v365_v2 = vmov 65535   ;;  %vm77_vm2 = vcmask 72704   ;;  %s685_s1 = inlined_call_operand.vmem [shape: bf16[9,32], index: 1, kind: input, shape index: {}]   ;;  %s686_s0 = inlined_call_operand.vmem [shape: f32[270,9], index: 0, kind: input, shape index: {}]   ;;  %s687_s2 = inlined_call_operand.vmem [shape: f32[1,32], index: 2, kind: input, shape index: {}]   ;;  %s688_s3 = inlined_call_operand.vmem [shape: bf16[270,32], index: 3, kind: output, shape index: {}]  }
   0x1   :  { %v340_v0 = vld [vmem:[%s685_s1] sm:$0xf]  ;;  %v359_v1 = vld [vmem:[%s685_s1] sm:$0x10]  ;;  %v131_v3 = vsel %vm129_vm0, 4294967295, %v365_v2  ;;  %v16_v7 = vld [vmem:[%s686_s0 + $0x8] sm:$0xff] }
   0x2   :  { %v15_v4 = vld [vmem:[%s686_s0] sm:$0xff]  ;;  %v341_v5 = vor.u32 %v359_v1, %v340_v0  ;;  %v132_v6 = vsel %vm130_vm1, %v131_v3, 0  ;;  %v25_v8 = vld [vmem:[%s686_s0 + $0x50] sm:$0xff]  ;;  %v26_v9 = vld [vmem:[%s686_s0 + $0x58] sm:$0xff]  ;;  %vm298_vm3 = vcmask 257024   ;;  %vm332_vm4 = vcmask 256000  }
   0x3   :  { %v35_v10 = vld [vmem:[%s686_s0 + $0xa0] sm:$0xff]  ;;  %v36_v11 = vld [vmem:[%s686_s0 + $0xa8] sm:$0xff]  ;;  %v49_v13 = vpack.c.bf16 %v16_v7, %v15_v4  ;;  %v54_v14 = vpack.c.bf16 %v26_v9, %v25_v8  ;;  %v45_v16 = vld [vmem:[%s686_s0 + $0xf0] sm:$0xff] }
   0x4   :  { %v134_v12 = vand.u32 %v341_v5, %v132_v6  ;;  %v59_v15 = vpack.c.bf16 %v36_v11, %v35_v10  ;;  %v46_v17 = vld [vmem:[%s686_s0 + $0xf8] sm:$0xff]  ;;  %v17_v19 = vld [vmem:[%s686_s0 + $0x10] sm:$0xff]  ;;  %v27_v21 = vld [vmem:[%s686_s0 + $0x60] sm:$0xff] }
   0x5   :  { %v64_v18 = vpack.c.bf16 %v46_v17, %v45_v16  ;;  %v18_v20 = vld [vmem:[%s686_s0 + $0x18] sm:$0xff]  ;;  %v28_v22 = vld [vmem:[%s686_s0 + $0x68] sm:$0xff]  ;;  %v37_v23 = vld [vmem:[%s686_s0 + $0xb0] sm:$0xff] }
   0x6   :  { %143 = vmatpush.bf16.msra.mxu0 %v134_v12  ;;  %360 = vmatpush.bf16.msra.mxu1 %v134_v12  ;;  %v38_v24 = vld [vmem:[%s686_s0 + $0xb8] sm:$0xff]  ;;  %v50_v25 = vpack.c.bf16 %v18_v20, %v17_v19  ;;  %v55_v26 = vpack.c.bf16 %v28_v22, %v27_v21  ;;  %v47_v28 = vld [vmem:[%s686_s0 + $0x100] sm:$0xff]  ;;  %v48_v29 = vld [vmem:[%s686_s0 + $0x108] sm:$0x3f] }
   0x7   :  { %361 = vmatpush.bf16.msra.mxu2 %v134_v12  ;;  %362 = vmatpush.bf16.msra.mxu3 %v134_v12  ;;  %v60_v27 = vpack.c.bf16 %v38_v24, %v37_v23  ;;  %v65_v30 = vpack.c.bf16 %v48_v29, %v47_v28  ;;  %v19_v31 = vld [vmem:[%s686_s0 + $0x20] sm:$0xff]  ;;  %v20_v32 = vld [vmem:[%s686_s0 + $0x28] sm:$0xff]  ;;  %v29_v33 = vld [vmem:[%s686_s0 + $0x70] sm:$0xff] }
   0x8   :  { %v30_v34 = vld [vmem:[%s686_s0 + $0x78] sm:$0xff]  ;;  %v39_v35 = vld [vmem:[%s686_s0 + $0xc0] sm:$0xff]  ;;  %v40_v36 = vld [vmem:[%s686_s0 + $0xc8] sm:$0xff]  ;;  %v51_v37 = vpack.c.bf16 %v20_v32, %v19_v31 }
   0x9   :  { %342 = vmatmul.msk.bf16.vlgmr.msra.gmra.mxu0 %vm77_vm2, %v49_v13  ;;  %347 = vmatmul.msk.bf16.vlgmr.msra.gmra.mxu1 %vm77_vm2, %v54_v14  ;;  %v56_v38 = vpack.c.bf16 %v30_v34, %v29_v33  ;;  %v61_v39 = vpack.c.bf16 %v40_v36, %v39_v35  ;;  %v21_v40 = vld [vmem:[%s686_s0 + $0x30] sm:$0xff]  ;;  %v22_v41 = vld [vmem:[%s686_s0 + $0x38] sm:$0xff]  ;;  %v31_v42 = vld [vmem:[%s686_s0 + $0x80] sm:$0xff] }
   0xa   :  { %352 = vmatmul.msk.bf16.vlgmr.msra.gmra.mxu2 %vm77_vm2, %v59_v15  ;;  %357 = vmatmul.msk.bf16.vlgmr.msra.gmra.mxu3 %vm77_vm2, %v64_v18  ;;  %v32_v43 = vld [vmem:[%s686_s0 + $0x88] sm:$0xff]  ;;  %v41_v44 = vld [vmem:[%s686_s0 + $0xd0] sm:$0xff]  ;;  %v42_v45 = vld [vmem:[%s686_s0 + $0xd8] sm:$0xff]  ;;  %v52_v46 = vpack.c.bf16 %v22_v41, %v21_v40 }
   0xb   :  { %v57_v47 = vpack.c.bf16 %v32_v43, %v31_v42  ;;  %v62_v48 = vpack.c.bf16 %v42_v45, %v41_v44  ;;  %v23_v49 = vld [vmem:[%s686_s0 + $0x40] sm:$0xff]  ;;  %v24_v50 = vld [vmem:[%s686_s0 + $0x48] sm:$0xff]  ;;  %v33_v51 = vld [vmem:[%s686_s0 + $0x90] sm:$0xff] }
   0xc   :  { %v34_v52 = vld [vmem:[%s686_s0 + $0x98] sm:$0xff]  ;;  %v43_v53 = vld [vmem:[%s686_s0 + $0xe0] sm:$0xff]  ;;  %v44_v54 = vld [vmem:[%s686_s0 + $0xe8] sm:$0xff]  ;;  %v53_v55 = vpack.c.bf16 %v24_v50, %v23_v49 }
   0xd   :  { %v58_v56 = vpack.c.bf16 %v34_v52, %v33_v51  ;;  %v63_v57 = vpack.c.bf16 %v44_v54, %v43_v53  ;;  %v514_v58 = vld [vmem:[%s687_s2] ss:$0 sm:$0xff] }
  0x19   :  { %343 = vmatmul.msk.bf16.gmra.mxu0 %vm77_vm2, %v50_v25  ;;  %348 = vmatmul.msk.bf16.gmra.mxu1 %vm77_vm2, %v55_v26 }
  0x1a   :  { %353 = vmatmul.msk.bf16.gmra.mxu2 %vm77_vm2, %v60_v27  ;;  %358 = vmatmul.msk.bf16.gmra.mxu3 %vm77_vm2, %v65_v30 }
  0x29   :  { %344 = vmatmul.msk.bf16.gmra.mxu0 %vm77_vm2, %v51_v37  ;;  %349 = vmatmul.msk.bf16.gmra.mxu1 %vm77_vm2, %v56_v38 }
  0x2a   :  { %354 = vmatmul.msk.bf16.gmra.mxu2 %vm77_vm2, %v61_v39 }
  0x39   :  { %345 = vmatmul.msk.bf16.gmra.mxu0 %vm77_vm2, %v52_v46  ;;  %350 = vmatmul.msk.bf16.gmra.mxu1 %vm77_vm2, %v57_v47 }
  0x3a   :  { %355 = vmatmul.msk.bf16.gmra.mxu2 %vm77_vm2, %v62_v48 }
  0x49   :  { %346 = vmatmul.msk.bf16.gmra.mxu0 %vm77_vm2, %v53_v55  ;;  %351 = vmatmul.msk.bf16.gmra.mxu1 %vm77_vm2, %v58_v56 }
  0x4a   :  { %356 = vmatmul.msk.bf16.gmra.mxu2 %vm77_vm2, %v63_v57 }
  0x86   :  { %v145_v59 = vpop.f32.mrf.mxu0  ;;  %v170_v60 = vpop.f32.mrf.mxu1 }
  0x87   :  { %v146_v61 = vadd.f32 %v514_v58, %v145_v59  ;;  %v171_v62 = vadd.f32 %v514_v58, %v170_v60 }
  0x89   :  { %v230_v63 = vmax.f32 %v146_v61, 0.0  ;;  %v240_v0 = vmax.f32 %v171_v62, 0.0 }
  0x8b   :  { %v264_v1 = vpack.c.bf16 %v230_v63, %v230_v63  ;;  %v274_v2 = vpack.c.bf16 %v240_v0, %v240_v0 }
  0x8d   :  { %299 = vst.msk [vmem:[%s688_s3] sm:$0xf] %vm298_vm3, %v264_v1  ;;  %v195_v3 = vpop.f32.mrf.mxu2  ;;  %v220_v16 = vpop.f32.mrf.mxu3 }
  0x8e   :  { %309 = vst.msk [vmem:[%s688_s3 + $0x28] sm:$0xf] %vm298_vm3, %v274_v2  ;;  %v196_v4 = vadd.f32 %v514_v58, %v195_v3  ;;  %v147_v5 = vpop.f32.mrf.mxu0  ;;  %v172_v6 = vpop.f32.mrf.mxu1  ;;  %v221_v28 = vadd.f32 %v514_v58, %v220_v16 }
  0x8f   :  { %v148_v7 = vadd.f32 %v514_v58, %v147_v5  ;;  %v173_v8 = vadd.f32 %v514_v58, %v172_v6 }
  0x90   :  { %v250_v9 = vmax.f32 %v196_v4, 0.0  ;;  %v260_v34 = vmax.f32 %v221_v28, 0.0 }
  0x91   :  { %v231_v10 = vmax.f32 %v148_v7, 0.0  ;;  %v241_v11 = vmax.f32 %v173_v8, 0.0 }
  0x92   :  { %v284_v12 = vpack.c.bf16 %v250_v9, %v250_v9  ;;  %v294_v39 = vpack.c.bf16 %v260_v34, %v260_v34 }
  0x93   :  { %v265_v13 = vpack.c.bf16 %v231_v10, %v231_v10  ;;  %v275_v14 = vpack.c.bf16 %v241_v11, %v241_v11 }
  0x94   :  { %319 = vst.msk [vmem:[%s688_s3 + $0x50] sm:$0xf] %vm298_vm3, %v284_v12 }
  0x95   :  { %300 = vst.msk [vmem:[%s688_s3 + $0x4] sm:$0xf] %vm298_vm3, %v265_v13  ;;  %v197_v15 = vpop.f32.mrf.mxu2  ;;  %v222_v30 = vpop.f32.mrf.mxu3 }
  0x96   :  { %310 = vst.msk [vmem:[%s688_s3 + $0x2c] sm:$0xf] %vm298_vm3, %v275_v14  ;;  %v198_v17 = vadd.f32 %v514_v58, %v197_v15  ;;  %v150_v18 = vpop.f32.mrf.mxu0  ;;  %v175_v19 = vpop.f32.mrf.mxu1  ;;  %v223_v35 = vadd.f32 %v514_v58, %v222_v30 }
  0x97   :  { %v151_v20 = vadd.f32 %v514_v58, %v150_v18  ;;  %v176_v21 = vadd.f32 %v514_v58, %v175_v19  ;;  %329 = vst.msk [vmem:[%s688_s3 + $0x78] sm:$0xf] %vm298_vm3, %v294_v39 }
  0x98   :  { %v251_v22 = vmax.f32 %v198_v17, 0.0  ;;  %v261_v40 = vmax.f32 %v223_v35, 0.0 }
  0x99   :  { %v232_v23 = vmax.f32 %v151_v20, 0.0  ;;  %v242_v24 = vmax.f32 %v176_v21, 0.0 }
  0x9a   :  { %v285_v25 = vpack.c.bf16 %v251_v22, %v251_v22  ;;  %v295_v46 = vpack.c.bf16 %v261_v40, %v261_v40 }
  0x9b   :  { %v266_v26 = vpack.c.bf16 %v232_v23, %v232_v23  ;;  %v276_v27 = vpack.c.bf16 %v242_v24, %v242_v24 }
  0x9c   :  { %320 = vst.msk [vmem:[%s688_s3 + $0x54] sm:$0xf] %vm298_vm3, %v285_v25 }
  0x9d   :  { %301 = vst.msk [vmem:[%s688_s3 + $0x8] sm:$0xf] %vm298_vm3, %v266_v26  ;;  %v200_v29 = vpop.f32.mrf.mxu2  ;;  %v225_v48 = vpop.f32.mrf.mxu3 }
  0x9e   :  { %311 = vst.msk [vmem:[%s688_s3 + $0x30] sm:$0xf] %vm298_vm3, %v276_v27  ;;  %v201_v31 = vadd.f32 %v514_v58, %v200_v29  ;;  %v152_v32 = vpop.f32.mrf.mxu0  ;;  %v177_v33 = vpop.f32.mrf.mxu1  ;;  %v226_v61 = vadd.f32 %v514_v58, %v225_v48 }
  0x9f   :  { %v153_v36 = vadd.f32 %v514_v58, %v152_v32  ;;  %v178_v37 = vadd.f32 %v514_v58, %v177_v33  ;;  %330 = vst.msk [vmem:[%s688_s3 + $0x7c] sm:$0xf] %vm298_vm3, %v295_v46 }
  0xa0   :  { %v252_v38 = vmax.f32 %v201_v31, 0.0  ;;  %v262_v3 = vmax.f32 %v226_v61, 0.0 }
  0xa1   :  { %v233_v41 = vmax.f32 %v153_v36, 0.0  ;;  %v243_v42 = vmax.f32 %v178_v37, 0.0 }
  0xa2   :  { %v286_v43 = vpack.c.bf16 %v252_v38, %v252_v38  ;;  %v296_v8 = vpack.c.bf16 %v262_v3, %v262_v3 }
  0xa3   :  { %v267_v44 = vpack.c.bf16 %v233_v41, %v233_v41  ;;  %v277_v45 = vpack.c.bf16 %v243_v42, %v243_v42 }
  0xa4   :  { %321 = vst.msk [vmem:[%s688_s3 + $0x58] sm:$0xf] %vm298_vm3, %v286_v43 }
  0xa5   :  { %302 = vst.msk [vmem:[%s688_s3 + $0xc] sm:$0xf] %vm298_vm3, %v267_v44  ;;  %v202_v47 = vpop.f32.mrf.mxu2  ;;  %v227_v63 = vpop.f32.mrf.mxu3 }
  0xa6   :  { %312 = vst.msk [vmem:[%s688_s3 + $0x34] sm:$0xf] %vm298_vm3, %v277_v45  ;;  %v203_v49 = vadd.f32 %v514_v58, %v202_v47  ;;  %v155_v50 = vpop.f32.mrf.mxu0  ;;  %v180_v51 = vpop.f32.mrf.mxu1  ;;  %v228_v4 = vadd.f32 %v514_v58, %v227_v63 }
  0xa7   :  { %v156_v52 = vadd.f32 %v514_v58, %v155_v50  ;;  %v181_v53 = vadd.f32 %v514_v58, %v180_v51  ;;  %331 = vst.msk [vmem:[%s688_s3 + $0x80] sm:$0xf] %vm298_vm3, %v296_v8 }
  0xa8   :  { %v253_v54 = vmax.f32 %v203_v49, 0.0  ;;  %v263_v9 = vmax.f32 %v228_v4, 0.0 }
  0xa9   :  { %v234_v55 = vmax.f32 %v156_v52, 0.0  ;;  %v244_v56 = vmax.f32 %v181_v53, 0.0 }
  0xaa   :  { %v287_v57 = vpack.c.bf16 %v253_v54, %v253_v54  ;;  %v297_v15 = vpack.c.bf16 %v263_v9, %v263_v9 }
  0xab   :  { %v268_v59 = vpack.c.bf16 %v234_v55, %v234_v55  ;;  %v278_v60 = vpack.c.bf16 %v244_v56, %v244_v56 }
  0xac   :  { %322 = vst.msk [vmem:[%s688_s3 + $0x5c] sm:$0xf] %vm298_vm3, %v287_v57 }
  0xad   :  { %303 = vst.msk [vmem:[%s688_s3 + $0x10] sm:$0xf] %vm298_vm3, %v268_v59  ;;  %v205_v62 = vpop.f32.mrf.mxu2 }
  0xae   :  { %313 = vst.msk [vmem:[%s688_s3 + $0x38] sm:$0xf] %vm298_vm3, %v278_v60  ;;  %v206_v0 = vadd.f32 %v514_v58, %v205_v62  ;;  %v157_v1 = vpop.f32.mrf.mxu0  ;;  %v182_v2 = vpop.f32.mrf.mxu1 }
  0xaf   :  { %v158_v5 = vadd.f32 %v514_v58, %v157_v1  ;;  %v183_v6 = vadd.f32 %v514_v58, %v182_v2  ;;  %333 = vst.msk [vmem:[%s688_s3 + $0x84] sm:$0x7] %vm332_vm4, %v297_v15 }
  0xb0   :  { %v254_v7 = vmax.f32 %v206_v0, 0.0 }
  0xb1   :  { %v235_v10 = vmax.f32 %v158_v5, 0.0  ;;  %v245_v11 = vmax.f32 %v183_v6, 0.0 }
  0xb2   :  { %v288_v12 = vpack.c.bf16 %v254_v7, %v254_v7 }
  0xb3   :  { %v269_v13 = vpack.c.bf16 %v235_v10, %v235_v10  ;;  %v279_v14 = vpack.c.bf16 %v245_v11, %v245_v11 }
  0xb4   :  { %323 = vst.msk [vmem:[%s688_s3 + $0x60] sm:$0xf] %vm298_vm3, %v288_v12 }
  0xb5   :  { %304 = vst.msk [vmem:[%s688_s3 + $0x14] sm:$0xf] %vm298_vm3, %v269_v13  ;;  %v207_v16 = vpop.f32.mrf.mxu2 }
  0xb6   :  { %314 = vst.msk [vmem:[%s688_s3 + $0x3c] sm:$0xf] %vm298_vm3, %v279_v14  ;;  %v208_v17 = vadd.f32 %v514_v58, %v207_v16  ;;  %v160_v18 = vpop.f32.mrf.mxu0  ;;  %v185_v19 = vpop.f32.mrf.mxu1 }
  0xb7   :  { %v161_v20 = vadd.f32 %v514_v58, %v160_v18  ;;  %v186_v21 = vadd.f32 %v514_v58, %v185_v19 }
  0xb8   :  { %v255_v22 = vmax.f32 %v208_v17, 0.0 }
  0xb9   :  { %v236_v23 = vmax.f32 %v161_v20, 0.0  ;;  %v246_v24 = vmax.f32 %v186_v21, 0.0 }
  0xba   :  { %v289_v25 = vpack.c.bf16 %v255_v22, %v255_v22 }
  0xbb   :  { %v270_v26 = vpack.c.bf16 %v236_v23, %v236_v23  ;;  %v280_v27 = vpack.c.bf16 %v246_v24, %v246_v24 }
  0xbc   :  { %324 = vst.msk [vmem:[%s688_s3 + $0x64] sm:$0xf] %vm298_vm3, %v289_v25 }
  0xbd   :  { %305 = vst.msk [vmem:[%s688_s3 + $0x18] sm:$0xf] %vm298_vm3, %v270_v26  ;;  %v210_v28 = vpop.f32.mrf.mxu2 }
  0xbe   :  { %315 = vst.msk [vmem:[%s688_s3 + $0x40] sm:$0xf] %vm298_vm3, %v280_v27  ;;  %v211_v29 = vadd.f32 %v514_v58, %v210_v28  ;;  %v162_v30 = vpop.f32.mrf.mxu0  ;;  %v187_v31 = vpop.f32.mrf.mxu1 }
  0xbf   :  { %v163_v32 = vadd.f32 %v514_v58, %v162_v30  ;;  %v188_v33 = vadd.f32 %v514_v58, %v187_v31 }
  0xc0   :  { %v256_v34 = vmax.f32 %v211_v29, 0.0 }
  0xc1   :  { %v237_v35 = vmax.f32 %v163_v32, 0.0  ;;  %v247_v36 = vmax.f32 %v188_v33, 0.0 }
  0xc2   :  { %v290_v37 = vpack.c.bf16 %v256_v34, %v256_v34 }
  0xc3   :  { %v271_v38 = vpack.c.bf16 %v237_v35, %v237_v35  ;;  %v281_v39 = vpack.c.bf16 %v247_v36, %v247_v36 }
  0xc4   :  { %325 = vst.msk [vmem:[%s688_s3 + $0x68] sm:$0xf] %vm298_vm3, %v290_v37 }
  0xc5   :  { %306 = vst.msk [vmem:[%s688_s3 + $0x1c] sm:$0xf] %vm298_vm3, %v271_v38  ;;  %v212_v40 = vpop.f32.mrf.mxu2 }
  0xc6   :  { %316 = vst.msk [vmem:[%s688_s3 + $0x44] sm:$0xf] %vm298_vm3, %v281_v39  ;;  %v213_v41 = vadd.f32 %v514_v58, %v212_v40  ;;  %v165_v42 = vpop.f32.mrf.mxu0  ;;  %v190_v43 = vpop.f32.mrf.mxu1 }
  0xc7   :  { %v166_v44 = vadd.f32 %v514_v58, %v165_v42  ;;  %v191_v45 = vadd.f32 %v514_v58, %v190_v43 }
  0xc8   :  { %v257_v46 = vmax.f32 %v213_v41, 0.0 }
  0xc9   :  { %v238_v47 = vmax.f32 %v166_v44, 0.0  ;;  %v248_v48 = vmax.f32 %v191_v45, 0.0 }
  0xca   :  { %v291_v49 = vpack.c.bf16 %v257_v46, %v257_v46 }
  0xcb   :  { %v272_v50 = vpack.c.bf16 %v238_v47, %v238_v47  ;;  %v282_v51 = vpack.c.bf16 %v248_v48, %v248_v48 }
  0xcc   :  { %326 = vst.msk [vmem:[%s688_s3 + $0x6c] sm:$0xf] %vm298_vm3, %v291_v49 }
  0xcd   :  { %307 = vst.msk [vmem:[%s688_s3 + $0x20] sm:$0xf] %vm298_vm3, %v272_v50  ;;  %v215_v52 = vpop.f32.mrf.mxu2 }
  0xce   :  { %317 = vst.msk [vmem:[%s688_s3 + $0x48] sm:$0xf] %vm298_vm3, %v282_v51  ;;  %v216_v53 = vadd.f32 %v514_v58, %v215_v52  ;;  %v167_v54 = vpop.f32.mrf.mxu0  ;;  %v192_v55 = vpop.f32.mrf.mxu1 }
  0xcf   :  { %v168_v56 = vadd.f32 %v514_v58, %v167_v54  ;;  %v193_v57 = vadd.f32 %v514_v58, %v192_v55 }
  0xd0   :  { %v258_v59 = vmax.f32 %v216_v53, 0.0 }
  0xd1   :  { %v239_v60 = vmax.f32 %v168_v56, 0.0  ;;  %v249_v61 = vmax.f32 %v193_v57, 0.0 }
  0xd2   :  { %v292_v62 = vpack.c.bf16 %v258_v59, %v258_v59 }
  0xd3   :  { %v273_v63 = vpack.c.bf16 %v239_v60, %v239_v60  ;;  %v283_v0 = vpack.c.bf16 %v249_v61, %v249_v61 }
  0xd4   :  { %327 = vst.msk [vmem:[%s688_s3 + $0x70] sm:$0xf] %vm298_vm3, %v292_v62 }
  0xd5   :  { %308 = vst.msk [vmem:[%s688_s3 + $0x24] sm:$0xf] %vm298_vm3, %v273_v63  ;;  %v217_v1 = vpop.f32.mrf.mxu2 }
  0xd6   :  { %318 = vst.msk [vmem:[%s688_s3 + $0x4c] sm:$0xf] %vm298_vm3, %v283_v0  ;;  %v218_v2 = vadd.f32 %v514_v58, %v217_v1 }
  0xd8   :  { %v259_v3 = vmax.f32 %v218_v2, 0.0 }
  0xda   :  { %v293_v4 = vpack.c.bf16 %v259_v3, %v259_v3 }
  0xdc   :  { %328 = vst.msk [vmem:[%s688_s3 + $0x74] sm:$0xf] %vm298_vm3, %v293_v4 }

// kernel: audio_encoder_tensor_cache.25
= control target key start
LH: loop header
LB: loop body
LE: loop exit
PB: predicated region body
PF: predicated region fallthrough
CT: control target
= control target key end

     0   :  { %vm232_vm0 = vcmask 261120   ;;  %vm343_vm1 = vcmask 257024   ;;  %s680_s1 = inlined_call_operand.vmem [shape: bf16[288,32], index: 1, kind: input, shape index: {}]   ;;  %s681_s0 = inlined_call_operand.vmem [shape: bf16[56,288], index: 0, kind: input, shape index: {}]   ;;  %s682_s2 = inlined_call_operand.vmem [shape: f32[1,32], index: 2, kind: input, shape index: {}]   ;;  %s683_s3 = inlined_call_operand.vmem [shape: bf16[56,32], index: 3, kind: output, shape index: {}]  }
   0x1   :  { %v483_v0 = vld [vmem:[%s680_s1 + $0x38] sm:$0xff]  ;;  %v493_v2 = vld [vmem:[%s680_s1 + $0x88] sm:$0xff]  ;;  %v482_v3 = vld [vmem:[%s680_s1 + $0x30] sm:$0xff] }
   0x2   :  { %v491_v1 = vld [vmem:[%s680_s1 + $0x78] sm:$0xff]  ;;  %245 = vmatpush.bf16.msra.mxu0 %v483_v0  ;;  %494 = vmatpush.bf16.msra.mxu3 %v483_v0  ;;  %v490_v4 = vld [vmem:[%s680_s1 + $0x70] sm:$0xff]  ;;  %v492_v5 = vld [vmem:[%s680_s1 + $0x80] sm:$0xff] }
   0x3   :  { %502 = vmatpush.bf16.msra.mxu1 %v491_v1  ;;  %307 = vmatpush.bf16.msra.mxu2 %v493_v2  ;;  %v365_v6 = vld [vmem:[%s681_s0 + $0x8] sm:$0xf]  ;;  %v469_v7 = vld [vmem:[%s681_s0 + $0x10] sm:$0xf0]  ;;  %v480_v11 = vld [vmem:[%s680_s1 + $0x20] sm:$0xff] }
   0x4   :  { %v481_v8 = vld [vmem:[%s680_s1 + $0x28] sm:$0xff]  ;;  %v366_v10 = vor.u32 %v469_v7, %v365_v6  ;;  %v488_v12 = vld [vmem:[%s680_s1 + $0x60] sm:$0xff]  ;;  %v479_v13 = vld [vmem:[%s680_s1 + $0x18] sm:$0xff] }
   0x5   :  { %v489_v9 = vld [vmem:[%s680_s1 + $0x68] sm:$0xff]  ;;  %v487_v14 = vld [vmem:[%s680_s1 + $0x58] sm:$0xff]  ;;  %v478_v15 = vld [vmem:[%s680_s1 + $0x10] sm:$0xff] }
   0x6   :  { %246 = vmatpush.bf16.msra.mxu0 %v482_v3  ;;  %495 = vmatpush.bf16.msra.mxu3 %v482_v3  ;;  %v486_v16 = vld [vmem:[%s680_s1 + $0x50] sm:$0xff]  ;;  %v377_v17 = vld [vmem:[%s681_s0 + $0x20] sm:$0xf]  ;;  %v472_v18 = vld [vmem:[%s681_s0 + $0x28] sm:$0xf0] }
   0x7   :  { %503 = vmatpush.bf16.msra.mxu1 %v490_v4  ;;  %308 = vmatpush.bf16.msra.mxu2 %v492_v5  ;;  %v477_v19 = vld [vmem:[%s680_s1 + $0x8] sm:$0xff]  ;;  %v378_v21 = vor.u32 %v472_v18, %v377_v17  ;;  %v476_v22 = vld [vmem:[%s680_s1] sm:$0xff]  ;;  %v369_v23 = vld [vmem:[%s681_s0 + $0x18] sm:$0xf] }
   0x8   :  { %v485_v20 = vld [vmem:[%s680_s1 + $0x48] sm:$0xff]  ;;  %v471_v24 = vld [vmem:[%s681_s0 + $0x20] sm:$0xf0]  ;;  %v357_v25 = vld [vmem:[%s681_s0] sm:$0xf] }
   0x9   :  { %v468_v26 = vld [vmem:[%s681_s0 + $0x8] sm:$0xf0]  ;;  %v484_v27 = vld [vmem:[%s680_s1 + $0x40] sm:$0xff]  ;;  %v470_v28 = vld [vmem:[%s681_s0 + $0x1c] sm:$0xf]  ;;  %v370_v30 = vor.u32 %v471_v24, %v369_v23 }
   0xa   :  { %247 = vmatpush.bf16.msra.mxu0 %v481_v8  ;;  %496 = vmatpush.bf16.msra.mxu3 %v481_v8  ;;  %v371_v29 = vld [vmem:[%s681_s0 + $0x24] sm:$0xf0]  ;;  %v358_v31 = vor.u32 %v468_v26, %v357_v25  ;;  %v389_v33 = vld [vmem:[%s681_s0 + $0x38] sm:$0xf]  ;;  %v475_v34 = vld [vmem:[%s681_s0 + $0x40] sm:$0xf0] }
   0xb   :  { %504 = vmatpush.bf16.msra.mxu1 %v489_v9  ;;  %463 = vmatmul.msk.bf16.vlgmr.msra.gmra.mxu2 %vm232_vm0, %v366_v10  ;;  %v374_v32 = vor.u32 %v470_v28, %v371_v29  ;;  %v390_v35 = vor.u32 %v475_v34, %v389_v33  ;;  %v381_v36 = vld [vmem:[%s681_s0 + $0x30] sm:$0xf]  ;;  %v474_v37 = vld [vmem:[%s681_s0 + $0x38] sm:$0xf0]  ;;  %v473_v38 = vld [vmem:[%s681_s0 + $0x34] sm:$0xf] }
   0xc   :  { %v383_v39 = vld [vmem:[%s681_s0 + $0x3c] sm:$0xf0]  ;;  %v382_v40 = vor.u32 %v474_v37, %v381_v36  ;;  %v28_v42 = vld [vmem:[%s681_s0 + $0x50] sm:$0xf]  ;;  %v27_v44 = vld [vmem:[%s681_s0 + $0x48] sm:$0xff] }
   0xd   :  { %v386_v41 = vor.u32 %v473_v38, %v383_v39  ;;  %v103_v43 = vunpack.c.l.b16 %v28_v42  ;;  %v467_v46 = vld [vmem:[%s681_s0 + $0x4] sm:$0xf]  ;;  %v359_v47 = vld [vmem:[%s681_s0 + $0xc] sm:$0xf0]  ;;  %v101_v48 = vunpack.c.l.b16 %v27_v44  ;;  %v102_v50 = vunpack.c.h.b16 %v27_v44  ;;  %v510_v57 = vld [vmem:[%s682_s2] ss:$0 sm:$0xff] }
   0xe   :  { %248 = vmatpush.bf16.msra.mxu0 %v480_v11  ;;  %497 = vmatpush.bf16.msra.mxu3 %v480_v11  ;;  %v362_v49 = vor.u32 %v467_v46, %v359_v47 }
   0xf   :  { %505 = vmatpush.bf16.msra.mxu1 %v488_v12  ;;  %v115_v45 = vpack.c.b16 %v103_v43, %v103_v43  ;;  %v113_v51 = vpack.c.b16 %v101_v48, %v101_v48  ;;  %v114_v52 = vpack.c.b16 %v102_v50, %v102_v50 }
  0x12   :  { %249 = vmatpush.bf16.msra.mxu0 %v479_v13  ;;  %498 = vmatpush.bf16.msra.mxu3 %v479_v13 }
  0x13   :  { %506 = vmatpush.bf16.msra.mxu1 %v487_v14 }
  0x16   :  { %250 = vmatpush.bf16.msra.mxu0 %v478_v15  ;;  %499 = vmatpush.bf16.msra.mxu3 %v478_v15 }
  0x17   :  { %507 = vmatpush.bf16.msra.mxu1 %v486_v16 }
  0x1a   :  { %251 = vmatpush.bf16.msra.mxu0 %v477_v19  ;;  %500 = vmatpush.bf16.msra.mxu3 %v477_v19 }
  0x1b   :  { %508 = vmatpush.bf16.msra.mxu1 %v485_v20  ;;  %464 = vmatmul.msk.bf16.gmra.mxu2 %vm232_vm0, %v378_v21 }
  0x1e   :  { %252 = vmatpush.bf16.msra.mxu0 %v476_v22  ;;  %501 = vmatpush.bf16.msra.mxu3 %v476_v22 }
  0x1f   :  { %509 = vmatpush.bf16.msra.mxu1 %v484_v27 }
  0x21   :  { %258 = vmatmul.bf16.vlgmr.msra.gmra.mxu3 %v370_v30  ;;  %253 = vmatmul.bf16.vlgmr.msra.gmra.mxu0 %v358_v31 }
  0x22   :  { %273 = vmatpush.bf16.msrb.mxu0 %v491_v1  ;;  %286 = vmatmul.bf16.vlgmr.msra.gmra.mxu1 %v374_v32 }
  0x26   :  { %274 = vmatpush.bf16.msrb.mxu0 %v490_v4 }
  0x2a   :  { %275 = vmatpush.bf16.msrb.mxu0 %v489_v9 }
  0x2b   :  { %465 = vmatmul.msk.bf16.gmra.mxu2 %vm232_vm0, %v390_v35 }
  0x2e   :  { %276 = vmatpush.bf16.msrb.mxu0 %v488_v12 }
  0x31   :  { %263 = vmatmul.bf16.gmra.mxu3 %v382_v40 }
  0x32   :  { %277 = vmatpush.bf16.msrb.mxu0 %v487_v14  ;;  %291 = vmatmul.bf16.gmra.mxu1 %v386_v41 }
  0x36   :  { %278 = vmatpush.bf16.msrb.mxu0 %v486_v16 }
  0x3a   :  { %279 = vmatpush.bf16.msrb.mxu0 %v485_v20 }
  0x3b   :  { %466 = vmatmul.msk.bf16.gmra.mxu2 %vm232_vm0, %v115_v45 }
  0x3e   :  { %280 = vmatpush.bf16.msrb.mxu0 %v484_v27 }
  0x41   :  { %281 = vmatmul.bf16.vlgmr.msrb.gmra.mxu0 %v362_v49  ;;  %268 = vmatmul.bf16.gmra.mxu3 %v113_v51 }
  0x42   :  { %296 = vmatmul.bf16.gmra.mxu1 %v114_v52 }
  0x8e   :  { %v310_v53 = vpop.f32.mrf.mxu2 }
  0x96   :  { %v312_v54 = vpop.f32.mrf.mxu2 }
  0x9e   :  { %v315_v55 = vpop.f32.mrf.mxu2  ;;  %v254_v0 = vpop.f32.mrf.mxu0 }
  0x9f   :  { %v287_v56 = vpop.f32.mrf.mxu1  ;;  %v255_v18 = vadd.f32 %v510_v57, %v254_v0 }
  0xa4   :  { %v259_v58 = vpop.f32.mrf.mxu3 }
  0xa5   :  { %v260_v59 = vadd.f32 %v510_v57, %v259_v58 }
  0xa6   :  { %v317_v60 = vpop.f32.mrf.mxu2  ;;  %v256_v10 = vpop.f32.mrf.mxu0 }
  0xa7   :  { %v288_v61 = vadd.f32 %v287_v56, %v260_v59  ;;  %v289_v62 = vpop.f32.mrf.mxu1  ;;  %v257_v31 = vadd.f32 %v510_v57, %v256_v10 }
  0xa9   :  { %v316_v63 = vadd.f32 %v315_v55, %v288_v61 }
  0xab   :  { %v331_v1 = vmax.f32 %v316_v63, 0.0 }
  0xac   :  { %v261_v2 = vpop.f32.mrf.mxu3 }
  0xad   :  { %v338_v3 = vpack.c.bf16 %v331_v1, %v331_v1  ;;  %v262_v4 = vadd.f32 %v510_v57, %v261_v2 }
  0xae   :  { %v320_v5 = vpop.f32.mrf.mxu2 }
  0xaf   :  { %346 = vst.msk [vmem:[%s683_s3 + $0x8] sm:$0xf] %vm343_vm1, %v338_v3  ;;  %v290_v6 = vadd.f32 %v289_v62, %v262_v4  ;;  %v292_v7 = vpop.f32.mrf.mxu1 }
  0xb1   :  { %v318_v8 = vadd.f32 %v317_v60, %v290_v6 }
  0xb3   :  { %v332_v9 = vmax.f32 %v318_v8, 0.0 }
  0xb4   :  { %v264_v11 = vpop.f32.mrf.mxu3 }
  0xb5   :  { %v339_v12 = vpack.c.bf16 %v332_v9, %v332_v9  ;;  %v265_v13 = vadd.f32 %v510_v57, %v264_v11 }
  0xb6   :  { %v322_v14 = vpop.f32.mrf.mxu2 }
  0xb7   :  { %347 = vst.msk [vmem:[%s683_s3 + $0xc] sm:$0xf] %vm343_vm1, %v339_v12  ;;  %v293_v15 = vadd.f32 %v292_v7, %v265_v13  ;;  %v294_v16 = vpop.f32.mrf.mxu1 }
  0xb9   :  { %v321_v17 = vadd.f32 %v320_v5, %v293_v15 }
  0xbb   :  { %v333_v19 = vmax.f32 %v321_v17, 0.0 }
  0xbc   :  { %v266_v22 = vpop.f32.mrf.mxu3 }
  0xbd   :  { %v340_v23 = vpack.c.bf16 %v333_v19, %v333_v19  ;;  %v267_v24 = vadd.f32 %v510_v57, %v266_v22 }
  0xbe   :  { %v282_v20 = vpop.f32.mrf.mxu0  ;;  %v325_v26 = vpop.f32.mrf.mxu2 }
  0xbf   :  { %v283_v21 = vadd.f32 %v282_v20, %v255_v18  ;;  %348 = vst.msk [vmem:[%s683_s3 + $0x10] sm:$0xf] %vm343_vm1, %v340_v23  ;;  %v295_v27 = vadd.f32 %v294_v16, %v267_v24  ;;  %v297_v28 = vpop.f32.mrf.mxu1 }
  0xc1   :  { %v311_v25 = vadd.f32 %v310_v53, %v283_v21  ;;  %v323_v30 = vadd.f32 %v322_v14, %v295_v27 }
  0xc3   :  { %v329_v29 = vmax.f32 %v311_v25, 0.0  ;;  %v334_v33 = vmax.f32 %v323_v30, 0.0 }
  0xc4   :  { %v269_v36 = vpop.f32.mrf.mxu3 }
  0xc5   :  { %v336_v32 = vpack.c.bf16 %v329_v29, %v329_v29  ;;  %v341_v37 = vpack.c.bf16 %v334_v33, %v334_v33  ;;  %v270_v38 = vadd.f32 %v510_v57, %v269_v36 }
  0xc6   :  { %v284_v34 = vpop.f32.mrf.mxu0  ;;  %v327_v40 = vpop.f32.mrf.mxu2 }
  0xc7   :  { %344 = vst.msk [vmem:[%s683_s3] sm:$0xf] %vm343_vm1, %v336_v32  ;;  %v285_v35 = vadd.f32 %v284_v34, %v257_v31  ;;  %v298_v41 = vadd.f32 %v297_v28, %v270_v38  ;;  %v299_v42 = vpop.f32.mrf.mxu1 }
  0xc8   :  { %349 = vst.msk [vmem:[%s683_s3 + $0x14] sm:$0xf] %vm343_vm1, %v341_v37 }
  0xc9   :  { %v313_v39 = vadd.f32 %v312_v54, %v285_v35  ;;  %v326_v44 = vadd.f32 %v325_v26, %v298_v41 }
  0xcb   :  { %v330_v43 = vmax.f32 %v313_v39, 0.0  ;;  %v335_v46 = vmax.f32 %v326_v44, 0.0 }
  0xcc   :  { %v271_v47 = vpop.f32.mrf.mxu3 }
  0xcd   :  { %v337_v45 = vpack.c.bf16 %v330_v43, %v330_v43  ;;  %v342_v48 = vpack.c.bf16 %v335_v46, %v335_v46 }
  0xcf   :  { %345 = vst.msk [vmem:[%s683_s3 + $0x4] sm:$0xf] %vm343_vm1, %v337_v45 }
  0xd0   :  { %350 = vst.msk [vmem:[%s683_s3 + $0x18] sm:$0xf] %vm343_vm1, %v342_v48 }

// kernel: audio_encoder_tensor_cache.26
= control target key start
LH: loop header
LB: loop body
LE: loop exit
PB: predicated region body
PF: predicated region fallthrough
CT: control target
= control target key end

     0   :  { %vm104_vm0 = vcmask 261120   ;;  %vm106_vm1 = vcmask 259072   ;;  %s217_s1 = inlined_call_operand.vmem [shape: bf16[128,32], index: 1, kind: input, shape index: {}]   ;;  %s218_s2 = inlined_call_operand.vmem [shape: f32[1,32], index: 2, kind: input, shape index: {}]   ;;  %s219_s0 = inlined_call_operand.vmem [shape: bf16[14,128], index: 0, kind: input, shape index: {}]   ;;  %s220_s3 = inlined_call_operand.vmem [shape: f32[14,32], index: 3, kind: output, shape index: {}]  }
   0x1   :  { %v156_v0 = vld [vmem:[%s217_s1 + $0x38] sm:$0xff]  ;;  %v155_v1 = vld [vmem:[%s217_s1 + $0x30] sm:$0xff]  ;;  %v154_v2 = vld [vmem:[%s217_s1 + $0x28] sm:$0xff] }
   0x2   :  { %90 = vmatpush.bf16.msra.mxu0 %v156_v0  ;;  %v153_v3 = vld [vmem:[%s217_s1 + $0x20] sm:$0xff]  ;;  %v152_v4 = vld [vmem:[%s217_s1 + $0x18] sm:$0xff]  ;;  %v151_v5 = vld [vmem:[%s217_s1 + $0x10] sm:$0xff] }
   0x3   :  { %v150_v6 = vld [vmem:[%s217_s1 + $0x8] sm:$0xff]  ;;  %v149_v7 = vld [vmem:[%s217_s1] sm:$0xff] }
   0x4   :  { %v114_v8 = vld [vmem:[%s219_s0] sm:$0xf]  ;;  %v148_v9 = vld [vmem:[%s219_s0] sm:$0x70] }
   0x5   :  { %v115_v10 = vor.u32 %v148_v9, %v114_v8  ;;  %v157_v11 = vld [vmem:[%s218_s2] ss:$0 sm:$0xff] }
   0x6   :  { %91 = vmatpush.bf16.msra.mxu0 %v155_v1 }
   0xa   :  { %92 = vmatpush.bf16.msra.mxu0 %v154_v2 }
   0xe   :  { %93 = vmatpush.bf16.msra.mxu0 %v153_v3 }
  0x12   :  { %94 = vmatpush.bf16.msra.mxu0 %v152_v4 }
  0x16   :  { %95 = vmatpush.bf16.msra.mxu0 %v151_v5 }
  0x1a   :  { %96 = vmatpush.bf16.msra.mxu0 %v150_v6 }
  0x1e   :  { %97 = vmatpush.bf16.msra.mxu0 %v149_v7 }
  0x21   :  { %98 = vmatmul.bf16.vlgmr.msra.gmra.mxu0 %v115_v10 }
  0x9e   :  { %v99_v12 = vpop.f32.mrf.mxu0 }
  0x9f   :  { %v100_v13 = vadd.f32 %v157_v11, %v99_v12 }
  0xa1   :  { %105 = vst.msk [vmem:[%s220_s3] sm:$0xff] %vm104_vm0, %v100_v13 }
  0xa6   :  { %v101_v14 = vpop.f32.mrf.mxu0 }
  0xa7   :  { %v102_v15 = vadd.f32 %v157_v11, %v101_v14 }
  0xa9   :  { %107 = vst.msk [vmem:[%s220_s3 + $0x8] sm:$0x3f] %vm106_vm1, %v102_v15 }

// kernel: audio_encoder_tensor_cache.27
= control target key start
LH: loop header
LB: loop body
LE: loop exit
PB: predicated region body
PF: predicated region fallthrough
CT: control target
= control target key end

     0   :  { %vm25_vm0 = vcmask 261120   ;;  %vm29_vm1 = vcmask 259072   ;;  %v207_v4 = vmov 32.0   ;;  %vm168_vm13 = vcmask 519168   ;;  %s270_s0 = inlined_call_operand.vmem [shape: f32[14,32], index: 0, kind: input, shape index: {}]   ;;  %s271_s1 = inlined_call_operand.vmem [shape: f32[1,32], index: 1, kind: input, shape index: {}]   ;;  %s272_s2 = inlined_call_operand.vmem [shape: f32[1,32], index: 2, kind: input, shape index: {}]   ;;  %s273_s4 = inlined_call_operand.vmem [shape: f32[1,64], index: 4, kind: input, shape index: {}]   ;;  %s274_s3 = inlined_call_operand.vmem [shape: bf16[32,64], index: 3, kind: input, shape index: {}]   ;;  %s275_s5 = inlined_call_operand.vmem [shape: bf16[14,64], index: 5, kind: output, shape index: {}]  }
   0x1   :  { %v21_v0 = vld [vmem:[%s270_s0] sm:$0xff]  ;;  %v22_v2 = vld [vmem:[%s270_s0 + $0x8] sm:$0x3f]  ;;  %193 = vrcp.f32 %v207_v4 }
   0x2   :  { %v26_v1 = vsel %vm25_vm0, %v21_v0, 0.0  ;;  %v30_v3 = vsel %vm29_vm1, %v22_v2, 0.0  ;;  %v188_v21 = vld [vmem:[%s274_s3 + $0x8] sm:$0xff]  ;;  %v187_v23 = vld [vmem:[%s274_s3] sm:$0xff] }
   0x3   :  { %27 = vadd.xlane.f32.xlu0 %v26_v1  ;;  %118 = vmatpush.bf16.msra.mxu0 %v188_v21  ;;  %v190_v42 = vld [vmem:[%s271_s1] ss:$0 sm:$0xff] }
   0x4   :  { %v191_v47 = vld [vmem:[%s272_s2] ss:$0 sm:$0xff] }
   0x5   :  { %v192_v52 = vld [vmem:[%s273_s4] ss:$0 sm:$0xff] }
   0x7   :  { %v194_v5 = vpop.eup %193  ;;  %119 = vmatpush.bf16.msra.mxu0 %v187_v23 }
   0x8   :  { %v34_v6 = vmul.f32 32.0, %v194_v5  ;;  %vm38_vm2 = vweird.f32 %v194_v5 }
   0xa   :  { %v35_v7 = vsub.f32 1.0, %v34_v6 }
   0xb   :  { %31 = vadd.xlane.f32.xlu0 %v30_v3 }
   0xc   :  { %v36_v8 = vmul.f32 %v194_v5, %v35_v7 }
   0xe   :  { %v37_v9 = vadd.f32 %v194_v5, %v36_v8 }
  0x10   :  { %v39_v10 = vsel %vm38_vm2, %v194_v5, %v37_v9  ;;  %vm170_vm2 = vcmask 518144  }
  0x76   :  { %v28_v11 = vpop.xlane.xlu0 %27 }
  0x77   :  { %v40_v12 = vmul.f32 %v39_v10, %v28_v11 }
  0x79   :  { %v42_v13 = vsub.f32 %v21_v0, %v40_v12 }
  0x7b   :  { %v44_v14 = vmul.f32 %v42_v13, %v42_v13 }
  0x7d   :  { %v46_v15 = vsel %vm25_vm0, %v44_v14, 0.0 }
  0x7e   :  { %47 = vadd.xlane.f32.xlu1 %v46_v15  ;;  %v32_v16 = vpop.xlane.xlu0 %31 }
  0x7f   :  { %v41_v17 = vmul.f32 %v39_v10, %v32_v16 }
  0x81   :  { %v43_v18 = vsub.f32 %v22_v2, %v41_v17 }
  0x83   :  { %v45_v19 = vmul.f32 %v43_v18, %v43_v18 }
  0x85   :  { %v49_v20 = vsel %vm29_vm1, %v45_v19, 0.0 }
  0x86   :  { %50 = vadd.xlane.f32.xlu1 %v49_v20 }
  0xf1   :  { %v48_v22 = vpop.xlane.xlu1 %47 }
  0xf2   :  { %v52_v24 = vmul.f32 %v48_v22, %v39_v10 }
  0xf4   :  { %v54_v25 = vadd.f32 1e-05, %v52_v24 }
  0xf6   :  { %195 = vrsqrt.f32 %v54_v25  ;;  %vm62_vm4 = vweird.f32 %v54_v25 }
  0xf9   :  { %v51_v26 = vpop.xlane.xlu1 %50 }
  0xfa   :  { %v53_v27 = vmul.f32 %v51_v26, %v39_v10 }
  0xfc   :  { %v196_v28 = vpop.eup %195  ;;  %v55_v29 = vadd.f32 1e-05, %v53_v27 }
  0xfd   :  { %v57_v30 = vmul.f32 %v196_v28, %v54_v25  ;;  %vm63_vm3 = vweird.f32 %v196_v28 }
  0xfe   :  { %197 = vrsqrt.f32 %v55_v29  ;;  %vm64_vm5 = vmor %vm62_vm4, %vm63_vm3  ;;  %vm72_vm7 = vweird.f32 %v55_v29 }
  0xff   :  { %v58_v31 = vmul.f32 %v196_v28, %v57_v30 }
 0x101   :  { %v59_v32 = vmul.f32 0.5, %v58_v31 }
 0x103   :  { %v60_v33 = vsub.f32 1.5, %v59_v32 }
 0x104   :  { %v198_v34 = vpop.eup %197 }
 0x105   :  { %v61_v35 = vmul.f32 %v196_v28, %v60_v33  ;;  %v67_v36 = vmul.f32 %v198_v34, %v55_v29  ;;  %vm73_vm6 = vweird.f32 %v198_v34 }
 0x106   :  { %vm74_vm8 = vmor %vm72_vm7, %vm73_vm6 }
 0x107   :  { %v68_v37 = vmul.f32 %v198_v34, %v67_v36  ;;  %v65_v38 = vsel %vm64_vm5, %v196_v28, %v61_v35 }
 0x108   :  { %v76_v41 = vmul.f32 %v65_v38, %v42_v13 }
 0x109   :  { %v69_v39 = vmul.f32 0.5, %v68_v37 }
 0x10a   :  { %v81_v46 = vmul.f32 %v190_v42, %v76_v41 }
 0x10b   :  { %v70_v40 = vsub.f32 1.5, %v69_v39 }
 0x10c   :  { %v86_v49 = vadd.f32 %v191_v47, %v81_v46 }
 0x10d   :  { %v71_v43 = vmul.f32 %v198_v34, %v70_v40 }
 0x10f   :  { %v75_v44 = vsel %vm74_vm8, %v198_v34, %v71_v43 }
 0x110   :  { %v77_v45 = vmul.f32 %v75_v44, %v43_v18 }
 0x112   :  { %v82_v48 = vmul.f32 %v190_v42, %v77_v45 }
 0x114   :  { %v87_v50 = vadd.f32 %v191_v47, %v82_v48 }
 0x116   :  { %v88_v51 = vpack.c.bf16 %v87_v50, %v86_v49 }
 0x118   :  { %184 = vmatmul.msk.bf16.vlgmr.msra.gmra.mxu0 %vm25_vm0, %v88_v51 }
 0x195   :  { %v121_v53 = vpop.f32.mrf.mxu0 }
 0x196   :  { %v122_v54 = vadd.f32 %v192_v52, %v121_v53 }
 0x198   :  { %v185_v55 = vmul.f32 -1.442695, %v122_v54 }
 0x19a   :  { %199 = vpow2.f32 %v185_v55 }
 0x19d   :  { %v123_v56 = vpop.f32.mrf.mxu0 }
 0x19e   :  { %v124_v57 = vadd.f32 %v192_v52, %v123_v56 }
 0x1a0   :  { %v200_v58 = vpop.eup %199  ;;  %v186_v59 = vmul.f32 -1.442695, %v124_v57 }
 0x1a1   :  { %v132_v60 = vadd.f32 1.0, %v200_v58 }
 0x1a2   :  { %201 = vpow2.f32 %v186_v59 }
 0x1a3   :  { %203 = vrcp.f32 %v132_v60  ;;  %v145_v2 = vand.u32 2147483648, %v132_v60  ;;  %v143_v4 = vand.u32 2147483647, %v132_v60  ;;  %vm139_vm10 = vweird.f32 %v132_v60 }
 0x1a5   :  { %v146_v7 = vor.u32 1.1754944e-38, %v145_v2  ;;  %vm144_vm12 = vcmp.eq.f32.partialorder %v143_v4, 8.507059e+37 }
 0x1a8   :  { %v202_v61 = vpop.eup %201 }
 0x1a9   :  { %v204_v62 = vpop.eup %203  ;;  %v133_v63 = vadd.f32 1.0, %v202_v61 }
 0x1aa   :  { %v135_v0 = vmul.f32 %v204_v62, %v132_v60  ;;  %vm140_vm9 = vweird.f32 %v204_v62 }
 0x1ab   :  { %205 = vrcp.f32 %v133_v63  ;;  %vm141_vm11 = vmor %vm139_vm10, %vm140_vm9  ;;  %v160_v13 = vand.u32 2147483648, %v133_v63  ;;  %v158_v16 = vand.u32 2147483647, %v133_v63  ;;  %vm154_vm15 = vweird.f32 %v133_v63 }
 0x1ac   :  { %v136_v1 = vsub.f32 1.0, %v135_v0 }
 0x1ad   :  { %v161_v18 = vor.u32 1.1754944e-38, %v160_v13  ;;  %vm159_vm1 = vcmp.eq.f32.partialorder %v158_v16, 8.507059e+37 }
 0x1ae   :  { %v137_v3 = vmul.f32 %v204_v62, %v136_v1 }
 0x1b0   :  { %v138_v5 = vadd.f32 %v204_v62, %v137_v3 }
 0x1b1   :  { %v206_v6 = vpop.eup %205 }
 0x1b2   :  { %v142_v8 = vsel %vm141_vm11, %v204_v62, %v138_v5  ;;  %v150_v9 = vmul.f32 %v206_v6, %v133_v63  ;;  %vm155_vm14 = vweird.f32 %v206_v6 }
 0x1b3   :  { %v147_v10 = vsel %vm144_vm12, %v146_v7, %v142_v8  ;;  %vm156_vm0 = vmor %vm154_vm15, %vm155_vm14 }
 0x1b4   :  { %v164_v11 = vmul.f32 %v147_v10, %v122_v54  ;;  %v151_v12 = vsub.f32 1.0, %v150_v9 }
 0x1b6   :  { %v166_v14 = vpack.c.bf16 %v164_v11, %v164_v11  ;;  %v152_v15 = vmul.f32 %v206_v6, %v151_v12 }
 0x1b8   :  { %169 = vst.msk [vmem:[%s275_s5] sm:$0xf] %vm168_vm13, %v166_v14  ;;  %v153_v17 = vadd.f32 %v206_v6, %v152_v15 }
 0x1ba   :  { %v157_v19 = vsel %vm156_vm0, %v206_v6, %v153_v17 }
 0x1bb   :  { %v162_v20 = vsel %vm159_vm1, %v161_v18, %v157_v19 }
 0x1bc   :  { %v165_v21 = vmul.f32 %v162_v20, %v124_v57 }
 0x1be   :  { %v167_v22 = vpack.c.bf16 %v165_v21, %v165_v21 }
 0x1c0   :  { %171 = vst.msk [vmem:[%s275_s5 + $0x4] sm:$0x7] %vm170_vm2, %v167_v22 }

// kernel: audio_encoder_tensor_cache.29
= control target key start
LH: loop header
LB: loop body
LE: loop exit
PB: predicated region body
PF: predicated region fallthrough
CT: control target
= control target key end

     0   :  { %vm25_vm0 = vcmask 261120   ;;  %vm29_vm1 = vcmask 259072   ;;  %v157_v4 = vmov 32.0   ;;  %vm128_vm9 = vcmask 781312   ;;  %s220_s0 = inlined_call_operand.vmem [shape: f32[14,32], index: 0, kind: input, shape index: {}]   ;;  %s221_s1 = inlined_call_operand.vmem [shape: f32[1,32], index: 1, kind: input, shape index: {}]   ;;  %s222_s2 = inlined_call_operand.vmem [shape: f32[1,32], index: 2, kind: input, shape index: {}]   ;;  %s223_s4 = inlined_call_operand.vmem [shape: f32[1,96], index: 4, kind: input, shape index: {}]   ;;  %s224_s3 = inlined_call_operand.vmem [shape: bf16[32,96], index: 3, kind: input, shape index: {}]   ;;  %s225_s5 = inlined_call_operand.vmem [shape: bf16[14,96], index: 5, kind: output, shape index: {}]  }
   0x1   :  { %v21_v0 = vld [vmem:[%s220_s0] sm:$0xff]  ;;  %v22_v2 = vld [vmem:[%s220_s0 + $0x8] sm:$0x3f]  ;;  %151 = vrcp.f32 %v157_v4  ;;  %vm130_vm10 = vcmask 780288  }
   0x2   :  { %v26_v1 = vsel %vm25_vm0, %v21_v0, 0.0  ;;  %v30_v3 = vsel %vm29_vm1, %v22_v2, 0.0  ;;  %v146_v21 = vld [vmem:[%s224_s3 + $0x8] sm:$0xff]  ;;  %v145_v23 = vld [vmem:[%s224_s3] sm:$0xff] }
   0x3   :  { %27 = vadd.xlane.f32.xlu0 %v26_v1  ;;  %118 = vmatpush.bf16.msra.mxu0 %v146_v21  ;;  %v148_v42 = vld [vmem:[%s221_s1] ss:$0 sm:$0xff] }
   0x4   :  { %v149_v47 = vld [vmem:[%s222_s2] ss:$0 sm:$0xff] }
   0x5   :  { %v150_v52 = vld [vmem:[%s223_s4] ss:$0 sm:$0xff] }
   0x7   :  { %v152_v5 = vpop.eup %151  ;;  %119 = vmatpush.bf16.msra.mxu0 %v145_v23 }
   0x8   :  { %v34_v6 = vmul.f32 32.0, %v152_v5  ;;  %vm38_vm2 = vweird.f32 %v152_v5 }
   0xa   :  { %v35_v7 = vsub.f32 1.0, %v34_v6 }
   0xb   :  { %31 = vadd.xlane.f32.xlu0 %v30_v3 }
   0xc   :  { %v36_v8 = vmul.f32 %v152_v5, %v35_v7 }
   0xe   :  { %v37_v9 = vadd.f32 %v152_v5, %v36_v8 }
  0x10   :  { %v39_v10 = vsel %vm38_vm2, %v152_v5, %v37_v9 }
  0x76   :  { %v28_v11 = vpop.xlane.xlu0 %27 }
  0x77   :  { %v40_v12 = vmul.f32 %v39_v10, %v28_v11 }
  0x79   :  { %v42_v13 = vsub.f32 %v21_v0, %v40_v12 }
  0x7b   :  { %v44_v14 = vmul.f32 %v42_v13, %v42_v13 }
  0x7d   :  { %v46_v15 = vsel %vm25_vm0, %v44_v14, 0.0 }
  0x7e   :  { %47 = vadd.xlane.f32.xlu1 %v46_v15  ;;  %v32_v16 = vpop.xlane.xlu0 %31 }
  0x7f   :  { %v41_v17 = vmul.f32 %v39_v10, %v32_v16 }
  0x81   :  { %v43_v18 = vsub.f32 %v22_v2, %v41_v17 }
  0x83   :  { %v45_v19 = vmul.f32 %v43_v18, %v43_v18 }
  0x85   :  { %v49_v20 = vsel %vm29_vm1, %v45_v19, 0.0 }
  0x86   :  { %50 = vadd.xlane.f32.xlu1 %v49_v20 }
  0xf1   :  { %v48_v22 = vpop.xlane.xlu1 %47 }
  0xf2   :  { %v52_v24 = vmul.f32 %v48_v22, %v39_v10 }
  0xf4   :  { %v54_v25 = vadd.f32 1e-05, %v52_v24 }
  0xf6   :  { %153 = vrsqrt.f32 %v54_v25  ;;  %vm62_vm4 = vweird.f32 %v54_v25 }
  0xf9   :  { %v51_v26 = vpop.xlane.xlu1 %50 }
  0xfa   :  { %v53_v27 = vmul.f32 %v51_v26, %v39_v10 }
  0xfc   :  { %v154_v28 = vpop.eup %153  ;;  %v55_v29 = vadd.f32 1e-05, %v53_v27 }
  0xfd   :  { %v57_v30 = vmul.f32 %v154_v28, %v54_v25  ;;  %vm63_vm3 = vweird.f32 %v154_v28 }
  0xfe   :  { %155 = vrsqrt.f32 %v55_v29  ;;  %vm64_vm5 = vmor %vm62_vm4, %vm63_vm3  ;;  %vm72_vm7 = vweird.f32 %v55_v29 }
  0xff   :  { %v58_v31 = vmul.f32 %v154_v28, %v57_v30 }
 0x101   :  { %v59_v32 = vmul.f32 0.5, %v58_v31 }
 0x103   :  { %v60_v33 = vsub.f32 1.5, %v59_v32 }
 0x104   :  { %v156_v34 = vpop.eup %155 }
 0x105   :  { %v61_v35 = vmul.f32 %v154_v28, %v60_v33  ;;  %v67_v36 = vmul.f32 %v156_v34, %v55_v29  ;;  %vm73_vm6 = vweird.f32 %v156_v34 }
 0x106   :  { %vm74_vm8 = vmor %vm72_vm7, %vm73_vm6 }
 0x107   :  { %v68_v37 = vmul.f32 %v156_v34, %v67_v36  ;;  %v65_v38 = vsel %vm64_vm5, %v154_v28, %v61_v35 }
 0x108   :  { %v76_v41 = vmul.f32 %v65_v38, %v42_v13 }
 0x109   :  { %v69_v39 = vmul.f32 0.5, %v68_v37 }
 0x10a   :  { %v81_v46 = vmul.f32 %v148_v42, %v76_v41 }
 0x10b   :  { %v70_v40 = vsub.f32 1.5, %v69_v39 }
 0x10c   :  { %v86_v49 = vadd.f32 %v149_v47, %v81_v46 }
 0x10d   :  { %v71_v43 = vmul.f32 %v156_v34, %v70_v40 }
 0x10f   :  { %v75_v44 = vsel %vm74_vm8, %v156_v34, %v71_v43 }
 0x110   :  { %v77_v45 = vmul.f32 %v75_v44, %v43_v18 }
 0x112   :  { %v82_v48 = vmul.f32 %v148_v42, %v77_v45 }
 0x114   :  { %v87_v50 = vadd.f32 %v149_v47, %v82_v48 }
 0x116   :  { %v88_v51 = vpack.c.bf16 %v87_v50, %v86_v49 }
 0x118   :  { %144 = vmatmul.msk.bf16.vlgmr.msra.gmra.mxu0 %vm25_vm0, %v88_v51 }
 0x195   :  { %v121_v53 = vpop.f32.mrf.mxu0 }
 0x196   :  { %v122_v54 = vadd.f32 %v150_v52, %v121_v53 }
 0x198   :  { %v126_v55 = vpack.c.bf16 %v122_v54, %v122_v54 }
 0x19a   :  { %129 = vst.msk [vmem:[%s225_s5] sm:$0xf] %vm128_vm9, %v126_v55 }
 0x19d   :  { %v123_v56 = vpop.f32.mrf.mxu0 }
 0x19e   :  { %v124_v57 = vadd.f32 %v150_v52, %v123_v56 }
 0x1a0   :  { %v127_v58 = vpack.c.bf16 %v124_v57, %v124_v57 }
 0x1a2   :  { %131 = vst.msk [vmem:[%s225_s5 + $0x4] sm:$0x7] %vm130_vm10, %v127_v58 }

// kernel: audio_encoder_tensor_cache.28
= control target key start
LH: loop header
LB: loop body
LE: loop exit
PB: predicated region body
PF: predicated region fallthrough
CT: control target
= control target key end

     0   :  { %vm67_vm0 = vcmask 523264   ;;  %vm91_vm1 = vcmask 261120   ;;  %vm93_vm2 = vcmask 259072   ;;  %s194_s1 = inlined_call_operand.vmem [shape: bf16[64,32], index: 1, kind: input, shape index: {}]   ;;  %s195_s4 = inlined_call_operand.vmem [shape: f32[1,32], index: 4, kind: input, shape index: {}, may-alias: {4,5}]   ;;  %s196_s5 = inlined_call_operand.vmem [shape: f32[1,32], index: 5, kind: input, shape index: {}, may-alias: {4,5}]   ;;  %s197_s2 = inlined_call_operand.vmem [shape: f32[1,32], index: 2, kind: input, shape index: {}]   ;;  %s198_s0 = inlined_call_operand.vmem [shape: bf16[14,64], index: 0, kind: input, shape index: {}]   ;;  %s199_s3 = inlined_call_operand.vmem [shape: f32[14,32], index: 3, kind: input, shape index: {}]   ;;  %s200_s6 = inlined_call_operand.vmem [shape: f32[14,32], index: 6, kind: output, shape index: {}]  }
   0x1   :  { %v124_v0 = vld [vmem:[%s194_s1 + $0x18] sm:$0xff]  ;;  %v123_v1 = vld [vmem:[%s194_s1 + $0x10] sm:$0xff]  ;;  %v122_v2 = vld [vmem:[%s194_s1 + $0x8] sm:$0xff] }
   0x2   :  { %75 = vmatpush.bf16.msra.mxu0 %v124_v0  ;;  %v121_v3 = vld [vmem:[%s194_s1] sm:$0xff]  ;;  %v86_v15 = vld [vmem:[%s199_s3 + $0x8] sm:$0x3f] }
   0x3   :  { %v101_v4 = vld [vmem:[%s198_s0] sm:$0xf]  ;;  %v120_v5 = vld [vmem:[%s198_s0] sm:$0x70] }
   0x4   :  { %v102_v6 = vor.u32 %v120_v5, %v101_v4  ;;  %v125_v7 = vld [vmem:[%s197_s2] ss:$0 sm:$0xff] }
   0x5   :  { %v85_v10 = vld [vmem:[%s199_s3] sm:$0xff] }
   0x6   :  { %76 = vmatpush.bf16.msra.mxu0 %v123_v1 }
   0xa   :  { %77 = vmatpush.bf16.msra.mxu0 %v122_v2 }
   0xe   :  { %78 = vmatpush.bf16.msra.mxu0 %v121_v3 }
  0x11   :  { %119 = vmatmul.msk.bf16.vlgmr.msra.gmra.mxu0 %vm67_vm0, %v102_v6 }
  0x8e   :  { %v80_v8 = vpop.f32.mrf.mxu0 }
  0x8f   :  { %v81_v9 = vadd.f32 %v125_v7, %v80_v8 }
  0x91   :  { %v87_v11 = vmul.f32 0.5, %v81_v9 }
  0x93   :  { %v89_v12 = vadd.f32 %v87_v11, %v85_v10 }
  0x95   :  { %92 = vst.msk [vmem:[%s200_s6] sm:$0xff] %vm91_vm1, %v89_v12 }
  0x96   :  { %v82_v13 = vpop.f32.mrf.mxu0 }
  0x97   :  { %v83_v14 = vadd.f32 %v125_v7, %v82_v13 }
  0x99   :  { %v88_v16 = vmul.f32 0.5, %v83_v14 }
  0x9b   :  { %v90_v17 = vadd.f32 %v88_v16, %v86_v15 }
  0x9d   :  { %94 = vst.msk [vmem:[%s200_s6 + $0x8] sm:$0x3f] %vm93_vm2, %v90_v17 }

// kernel: audio_encoder_tensor_cache.31
= control target key start
LH: loop header
LB: loop body
LE: loop exit
PB: predicated region body
PF: predicated region fallthrough
CT: control target
= control target key end

     0   :  { %vm51_vm0 = vcmask 261120   ;;  %vm74_vm1 = vcmask 259072   ;;  %s159_s1 = inlined_call_operand.vmem [shape: bf16[32,32], index: 1, kind: input, shape index: {}]   ;;  %s160_s4 = inlined_call_operand.vmem [shape: f32[1,32], index: 4, kind: input, shape index: {}, may-alias: {4,5}]   ;;  %s161_s5 = inlined_call_operand.vmem [shape: f32[1,32], index: 5, kind: input, shape index: {}, may-alias: {4,5}]   ;;  %s162_s0 = inlined_call_operand.vmem [shape: bf16[14,32], index: 0, kind: input, shape index: {}]   ;;  %s163_s2 = inlined_call_operand.vmem [shape: f32[1,32], index: 2, kind: input, shape index: {}]   ;;  %s164_s3 = inlined_call_operand.vmem [shape: f32[14,32], index: 3, kind: input, shape index: {}]   ;;  %s165_s6 = inlined_call_operand.vmem [shape: f32[14,32], index: 6, kind: output, shape index: {}]  }
   0x1   :  { %v95_v0 = vld [vmem:[%s159_s1 + $0x8] sm:$0xff]  ;;  %v94_v1 = vld [vmem:[%s159_s1] sm:$0xff] }
   0x2   :  { %61 = vmatpush.bf16.msra.mxu0 %v95_v0  ;;  %v82_v2 = vld [vmem:[%s162_s0] sm:$0xf]  ;;  %v93_v3 = vld [vmem:[%s162_s0] sm:$0x70]  ;;  %v70_v11 = vld [vmem:[%s164_s3 + $0x8] sm:$0x3f] }
   0x3   :  { %v83_v4 = vor.u32 %v93_v3, %v82_v2  ;;  %v96_v5 = vld [vmem:[%s163_s2] ss:$0 sm:$0xff] }
   0x4   :  { %v69_v7 = vld [vmem:[%s164_s3] sm:$0xff] }
   0x6   :  { %62 = vmatpush.bf16.msra.mxu0 %v94_v1 }
   0x9   :  { %92 = vmatmul.msk.bf16.vlgmr.msra.gmra.mxu0 %vm51_vm0, %v83_v4 }
  0x86   :  { %v64_v6 = vpop.f32.mrf.mxu0 }
  0x87   :  { %v65_v8 = vadd.f32 %v96_v5, %v64_v6 }
  0x89   :  { %v71_v9 = vadd.f32 %v69_v7, %v65_v8 }
  0x8b   :  { %73 = vst.msk [vmem:[%s165_s6] sm:$0xff] %vm51_vm0, %v71_v9 }
  0x8e   :  { %v66_v10 = vpop.f32.mrf.mxu0 }
  0x8f   :  { %v67_v12 = vadd.f32 %v96_v5, %v66_v10 }
  0x91   :  { %v72_v13 = vadd.f32 %v70_v11, %v67_v12 }
  0x93   :  { %75 = vst.msk [vmem:[%s165_s6 + $0x8] sm:$0x3f] %vm74_vm1, %v72_v13 }

// kernel: audio_encoder_tensor_cache.32
= control target key start
LH: loop header
LB: loop body
LE: loop exit
PB: predicated region body
PF: predicated region fallthrough
CT: control target
= control target key end

     0   :  { %vm31_vm0 = vcmask 261120   ;;  %vm35_vm1 = vcmask 259072   ;;  %v259_v4 = vmov 32.0   ;;  %vm208_vm13 = vcmask 257024   ;;  %s342_s0 = inlined_call_operand.vmem [shape: f32[14,32], index: 0, kind: input, shape index: {}]   ;;  %s343_s1 = inlined_call_operand.vmem [shape: f32[1,32], index: 1, kind: input, shape index: {}]   ;;  %s344_s2 = inlined_call_operand.vmem [shape: f32[1,32], index: 2, kind: input, shape index: {}]   ;;  %s345_s4 = inlined_call_operand.vmem [shape: f32[1,32], index: 4, kind: input, shape index: {}]   ;;  %s346_s3 = inlined_call_operand.vmem [shape: bf16[32,32], index: 3, kind: input, shape index: {}]   ;;  %s347_s5 = inlined_call_operand.vmem [shape: bf16[32,32], index: 5, kind: input, shape index: {}]   ;;  %s348_s6 = inlined_call_operand.vmem [shape: f32[1,32], index: 6, kind: input, shape index: {}]   ;;  %s349_s7 = inlined_call_operand.vmem [shape: bf16[14,32], index: 7, kind: output, shape index: {}]  }
   0x1   :  { %v27_v0 = vld [vmem:[%s342_s0] sm:$0xff]  ;;  %v28_v2 = vld [vmem:[%s342_s0 + $0x8] sm:$0x3f]  ;;  %245 = vrcp.f32 %v259_v4 }
   0x2   :  { %v32_v1 = vsel %vm31_vm0, %v27_v0, 0.0  ;;  %v36_v3 = vsel %vm35_vm1, %v28_v2, 0.0  ;;  %v237_v21 = vld [vmem:[%s346_s3 + $0x8] sm:$0xff]  ;;  %v236_v24 = vld [vmem:[%s346_s3] sm:$0xff] }
   0x3   :  { %33 = vadd.xlane.f32.xlu0 %v32_v1  ;;  %v239_v22 = vld [vmem:[%s347_s5 + $0x8] sm:$0xff]  ;;  %124 = vmatpush.bf16.msra.mxu0 %v237_v21  ;;  %v238_v25 = vld [vmem:[%s347_s5] sm:$0xff] }
   0x4   :  { %158 = vmatpush.bf16.msra.mxu1 %v239_v22  ;;  %v241_v44 = vld [vmem:[%s343_s1] ss:$0 sm:$0xff] }
   0x5   :  { %v242_v49 = vld [vmem:[%s344_s2] ss:$0 sm:$0xff] }
   0x6   :  { %v244_v54 = vld [vmem:[%s348_s6] ss:$0 sm:$0xff] }
   0x7   :  { %v246_v5 = vpop.eup %245  ;;  %125 = vmatpush.bf16.msra.mxu0 %v236_v24 }
   0x8   :  { %v40_v6 = vmul.f32 32.0, %v246_v5  ;;  %vm44_vm2 = vweird.f32 %v246_v5  ;;  %159 = vmatpush.bf16.msra.mxu1 %v238_v25 }
   0xa   :  { %v41_v7 = vsub.f32 1.0, %v40_v6  ;;  %v243_v6 = vld [vmem:[%s345_s4] ss:$0 sm:$0xff] }
   0xb   :  { %37 = vadd.xlane.f32.xlu0 %v36_v3 }
   0xc   :  { %v42_v8 = vmul.f32 %v246_v5, %v41_v7 }
   0xe   :  { %v43_v9 = vadd.f32 %v246_v5, %v42_v8 }
  0x10   :  { %v45_v10 = vsel %vm44_vm2, %v246_v5, %v43_v9  ;;  %vm210_vm2 = vcmask 256000  }
  0x76   :  { %v34_v11 = vpop.xlane.xlu0 %33 }
  0x77   :  { %v46_v12 = vmul.f32 %v45_v10, %v34_v11 }
  0x79   :  { %v48_v13 = vsub.f32 %v27_v0, %v46_v12 }
  0x7b   :  { %v50_v14 = vmul.f32 %v48_v13, %v48_v13 }
  0x7d   :  { %v52_v15 = vsel %vm31_vm0, %v50_v14, 0.0 }
  0x7e   :  { %53 = vadd.xlane.f32.xlu1 %v52_v15  ;;  %v38_v16 = vpop.xlane.xlu0 %37 }
  0x7f   :  { %v47_v17 = vmul.f32 %v45_v10, %v38_v16 }
  0x81   :  { %v49_v18 = vsub.f32 %v28_v2, %v47_v17 }
  0x83   :  { %v51_v19 = vmul.f32 %v49_v18, %v49_v18 }
  0x85   :  { %v55_v20 = vsel %vm35_vm1, %v51_v19, 0.0 }
  0x86   :  { %56 = vadd.xlane.f32.xlu1 %v55_v20 }
  0xf1   :  { %v54_v23 = vpop.xlane.xlu1 %53 }
  0xf2   :  { %v58_v26 = vmul.f32 %v54_v23, %v45_v10 }
  0xf4   :  { %v60_v27 = vadd.f32 1e-05, %v58_v26 }
  0xf6   :  { %247 = vrsqrt.f32 %v60_v27  ;;  %vm68_vm4 = vweird.f32 %v60_v27 }
  0xf9   :  { %v57_v28 = vpop.xlane.xlu1 %56 }
  0xfa   :  { %v59_v29 = vmul.f32 %v57_v28, %v45_v10 }
  0xfc   :  { %v248_v30 = vpop.eup %247  ;;  %v61_v31 = vadd.f32 1e-05, %v59_v29 }
  0xfd   :  { %v63_v32 = vmul.f32 %v248_v30, %v60_v27  ;;  %vm69_vm3 = vweird.f32 %v248_v30 }
  0xfe   :  { %249 = vrsqrt.f32 %v61_v31  ;;  %vm70_vm5 = vmor %vm68_vm4, %vm69_vm3  ;;  %vm78_vm7 = vweird.f32 %v61_v31 }
  0xff   :  { %v64_v33 = vmul.f32 %v248_v30, %v63_v32 }
 0x101   :  { %v65_v34 = vmul.f32 0.5, %v64_v33 }
 0x103   :  { %v66_v35 = vsub.f32 1.5, %v65_v34 }
 0x104   :  { %v250_v36 = vpop.eup %249 }
 0x105   :  { %v67_v37 = vmul.f32 %v248_v30, %v66_v35  ;;  %v73_v38 = vmul.f32 %v250_v36, %v61_v31  ;;  %vm79_vm6 = vweird.f32 %v250_v36 }
 0x106   :  { %vm80_vm8 = vmor %vm78_vm7, %vm79_vm6 }
 0x107   :  { %v74_v39 = vmul.f32 %v250_v36, %v73_v38  ;;  %v71_v40 = vsel %vm70_vm5, %v248_v30, %v67_v37 }
 0x108   :  { %v82_v43 = vmul.f32 %v71_v40, %v48_v13 }
 0x109   :  { %v75_v41 = vmul.f32 0.5, %v74_v39 }
 0x10a   :  { %v87_v48 = vmul.f32 %v241_v44, %v82_v43 }
 0x10b   :  { %v76_v42 = vsub.f32 1.5, %v75_v41 }
 0x10c   :  { %v92_v51 = vadd.f32 %v242_v49, %v87_v48 }
 0x10d   :  { %v77_v45 = vmul.f32 %v250_v36, %v76_v42 }
 0x10f   :  { %v81_v46 = vsel %vm80_vm8, %v250_v36, %v77_v45 }
 0x110   :  { %v83_v47 = vmul.f32 %v81_v46, %v49_v18 }
 0x112   :  { %v88_v50 = vmul.f32 %v241_v44, %v83_v47 }
 0x114   :  { %v93_v52 = vadd.f32 %v242_v49, %v88_v50 }
 0x116   :  { %v94_v53 = vpack.c.bf16 %v93_v52, %v92_v51 }
 0x118   :  { %224 = vmatmul.msk.bf16.vlgmr.msra.gmra.mxu0 %vm31_vm0, %v94_v53  ;;  %233 = vmatmul.msk.bf16.vlgmr.msra.gmra.mxu1 %vm31_vm0, %v94_v53 }
 0x195   :  { %v161_v55 = vpop.f32.mrf.mxu1  ;;  %v127_v4 = vpop.f32.mrf.mxu0 }
 0x196   :  { %v162_v56 = vadd.f32 %v244_v54, %v161_v55  ;;  %v128_v12 = vadd.f32 %v243_v6, %v127_v4 }
 0x198   :  { %v234_v57 = vmul.f32 -1.442695, %v162_v56 }
 0x19a   :  { %251 = vpow2.f32 %v234_v57 }
 0x19d   :  { %v163_v58 = vpop.f32.mrf.mxu1  ;;  %v129_v22 = vpop.f32.mrf.mxu0 }
 0x19e   :  { %v164_v59 = vadd.f32 %v244_v54, %v163_v58  ;;  %v130_v25 = vadd.f32 %v243_v6, %v129_v22 }
 0x1a0   :  { %v252_v60 = vpop.eup %251  ;;  %v235_v61 = vmul.f32 -1.442695, %v164_v59 }
 0x1a1   :  { %v172_v62 = vadd.f32 1.0, %v252_v60 }
 0x1a2   :  { %253 = vpow2.f32 %v235_v61 }
 0x1a3   :  { %255 = vrcp.f32 %v172_v62  ;;  %v185_v5 = vand.u32 2147483648, %v172_v62  ;;  %v183_v8 = vand.u32 2147483647, %v172_v62  ;;  %vm179_vm10 = vweird.f32 %v172_v62 }
 0x1a5   :  { %v186_v11 = vor.u32 1.1754944e-38, %v185_v5  ;;  %vm184_vm12 = vcmp.eq.f32.partialorder %v183_v8, 8.507059e+37 }
 0x1a8   :  { %v254_v63 = vpop.eup %253 }
 0x1a9   :  { %v256_v0 = vpop.eup %255  ;;  %v173_v1 = vadd.f32 1.0, %v254_v63 }
 0x1aa   :  { %v175_v2 = vmul.f32 %v256_v0, %v172_v62  ;;  %vm180_vm9 = vweird.f32 %v256_v0 }
 0x1ab   :  { %257 = vrcp.f32 %v173_v1  ;;  %vm181_vm11 = vmor %vm179_vm10, %vm180_vm9  ;;  %v200_v18 = vand.u32 2147483648, %v173_v1  ;;  %v198_v21 = vand.u32 2147483647, %v173_v1  ;;  %vm194_vm15 = vweird.f32 %v173_v1 }
 0x1ac   :  { %v176_v3 = vsub.f32 1.0, %v175_v2 }
 0x1ad   :  { %v201_v24 = vor.u32 1.1754944e-38, %v200_v18  ;;  %vm199_vm1 = vcmp.eq.f32.partialorder %v198_v21, 8.507059e+37 }
 0x1ae   :  { %v177_v7 = vmul.f32 %v256_v0, %v176_v3 }
 0x1b0   :  { %v178_v9 = vadd.f32 %v256_v0, %v177_v7 }
 0x1b1   :  { %v258_v10 = vpop.eup %257 }
 0x1b2   :  { %v182_v13 = vsel %vm181_vm11, %v256_v0, %v178_v9  ;;  %v190_v14 = vmul.f32 %v258_v10, %v173_v1  ;;  %vm195_vm14 = vweird.f32 %v258_v10 }
 0x1b3   :  { %v187_v15 = vsel %vm184_vm12, %v186_v11, %v182_v13  ;;  %vm196_vm0 = vmor %vm194_vm15, %vm195_vm14 }
 0x1b4   :  { %v204_v16 = vmul.f32 %v187_v15, %v128_v12  ;;  %v191_v17 = vsub.f32 1.0, %v190_v14 }
 0x1b6   :  { %v206_v19 = vpack.c.bf16 %v204_v16, %v204_v16  ;;  %v192_v20 = vmul.f32 %v258_v10, %v191_v17 }
 0x1b8   :  { %209 = vst.msk [vmem:[%s349_s7] sm:$0xf] %vm208_vm13, %v206_v19  ;;  %v193_v23 = vadd.f32 %v258_v10, %v192_v20 }
 0x1ba   :  { %v197_v26 = vsel %vm196_vm0, %v258_v10, %v193_v23 }
 0x1bb   :  { %v202_v27 = vsel %vm199_vm1, %v201_v24, %v197_v26 }
 0x1bc   :  { %v205_v28 = vmul.f32 %v202_v27, %v130_v25 }
 0x1be   :  { %v207_v29 = vpack.c.bf16 %v205_v28, %v205_v28 }
 0x1c0   :  { %211 = vst.msk [vmem:[%s349_s7 + $0x4] sm:$0x7] %vm210_vm2, %v207_v29 }

// kernel: audio_encoder_tensor_cache.30
= control target key start
LH: loop header
LB: loop body
LE: loop exit
PB: predicated region body
PF: predicated region fallthrough
CT: control target
= control target key end

     0   :  { %s678_s15 = smov 0   ;;  %s742_s0 = inlined_call_operand.vmem [shape: bf16[2,4,7,8], index: 0, kind: input, shape index: {}]   ;;  %s743_s1 = inlined_call_operand.vmem [shape: bf16[2,4,7,8], index: 1, kind: input, shape index: {}]   ;;  %s744_s2 = inlined_call_operand.vmem [shape: bf16[2,4,7,8], index: 2, kind: input, shape index: {}]   ;;  %s745_s3 = inlined_call_operand.vmem [shape: f32[2,1,7], index: 3, kind: input, shape index: {}]   ;;  %s746_s4 = inlined_call_operand.vmem [shape: bf16[2,4,7,8], index: 4, kind: output, shape index: {}]  }
   0x1 LB: > { %s591_s16 = sadd.s32 4294967295, %s650_s15   ;;  %p595_p0 = scmp.ge.s32.totalorder %s650_s15, 1  ;;  %s650_s15 = sphi %s678_s15, %s14_s15  }
   0x2   : > { %p190_p1 = scmp.lt.s32.totalorder %s650_s15, 3 }
   0x4   : > { %p191_p2 = pnand %p595_p0, %p190_p1 }
   0x5   : > { %p229_p3 = scmp.lt.s32.totalorder (!%p191_p2), %s591_s16, 1 }
   0x6   : > { %194 = sbr.rel (%p191_p2) target bundleno = 563 (0x233), region = 36 }
   0xb   : > { %s750_s16 = smov (!%p229_p3, %s591_s16), 1  ;;  %vm266_vm0 = vcmask 64512   ;;  %vm354_vm1 = vcmask 55296   ;;  %vm407_vm2 = vcmask 1042432   ;;  %vm408_vm3 = vcmask 1043456  }
   0xc   : > { %s686_s17 = sshll.u32 %s750_s16, 4  ;;  %s246_s26 = scalar_lea.vmem %s745_s3, %s750_s16  ;;  %v652_v53 = vmov 65535   ;;  %vm403_vm4 = vcmask 56320   ;;  %vm488_vm5 = vcmask 60416   ;;  %vm489_vm6 = vsmask.f32 3328 }
   0xd   : > { %s238_s20 = scalar_lea.vmem %s743_s1, %s686_s17  ;;  %s233_s23 = scalar_lea.vmem %s742_s0, %s686_s17  ;;  %v627_v12 = vld [vmem:[%s246_s26] ss:$0 sm:$0xff]  ;;  %v409_v54 = vsel %vm407_vm2, 4294967295, %v652_v53  ;;  %vm727_vm7 = vmand %vm488_vm5, %vm489_vm6 }
   0xe   : > { %v257_v0 = vld [vmem:[%s238_s20] sm:$0xf]  ;;  %v259_v1 = vld [vmem:[%s238_s20 + $0x8] sm:$0xf]  ;;  %v260_v2 = vld [vmem:[%s238_s20 + $0xc] sm:$0xf]  ;;  %s243_s29 = scalar_lea.vmem %s744_s2, %s686_s17  ;;  %s251_s6 = scalar_lea.vmem %s746_s4, %s686_s17 }
   0xf   : > { %v271_v3 = vsel %vm266_vm0, %v257_v0, 0  ;;  %v309_v4 = vsel %vm266_vm0, %v259_v1, 0  ;;  %v328_v5 = vsel %vm266_vm0, %v260_v2, 0  ;;  %v258_v6 = vld [vmem:[%s238_s20 + $0x4] sm:$0xf]  ;;  %v410_v56 = vsel %vm408_vm3, %v409_v54, 0 }
  0x10   : > { %280 = vmatpush.bf16.xpose.msra.mxu0 %v271_v3  ;;  %318 = vmatpush.bf16.xpose.msra.mxu2 %v309_v4  ;;  %v290_v7 = vsel %vm266_vm0, %v258_v6, 0  ;;  %v253_v8 = vld [vmem:[%s233_s23] sm:$0xf]  ;;  %v255_v9 = vld [vmem:[%s233_s23 + $0x8] sm:$0xf] }
  0x11   : > { %337 = vmatpush.bf16.xpose.msra.mxu3 %v328_v5  ;;  %299 = vmatpush.bf16.xpose.msra.mxu1 %v290_v7  ;;  %v256_v10 = vld [vmem:[%s233_s23 + $0xc] sm:$0xf]  ;;  %v254_v11 = vld [vmem:[%s233_s23 + $0x4] sm:$0xf]  ;;  %v261_v55 = vld [vmem:[%s243_s29] sm:$0xf] }
  0x12   : > { %v412_v57 = vand.u32 %v410_v56, %v261_v55  ;;  %v263_v58 = vld [vmem:[%s243_s29 + $0x8] sm:$0xf]  ;;  %v262_v60 = vld [vmem:[%s243_s29 + $0x4] sm:$0xf]  ;;  %v264_v62 = vld [vmem:[%s243_s29 + $0xc] sm:$0xf] }
  0x13   : > { %v450_v59 = vand.u32 %v410_v56, %v263_v58  ;;  %v431_v61 = vand.u32 %v410_v56, %v262_v60  ;;  %v469_v63 = vand.u32 %v410_v56, %v264_v62 }
  0x17   : > { %604 = vmatmul.msk.bf16.vlgmr.msra.gmra.mxu0 %vm266_vm0, %v253_v8  ;;  %606 = vmatmul.msk.bf16.vlgmr.msra.gmra.mxu2 %vm266_vm0, %v255_v9 }
  0x18   : > { %607 = vmatmul.msk.bf16.vlgmr.msra.gmra.mxu3 %vm266_vm0, %v256_v10  ;;  %605 = vmatmul.msk.bf16.vlgmr.msra.gmra.mxu1 %vm266_vm0, %v254_v11 }
  0x19   : > { %421 = vmatpush.bf16.msrb.mxu0 %v412_v57  ;;  %459 = vmatpush.bf16.msrb.mxu2 %v450_v59 }
  0x1a   : > { %440 = vmatpush.bf16.msrb.mxu1 %v431_v61  ;;  %478 = vmatpush.bf16.msrb.mxu3 %v469_v63 }
  0x94   : > { %v282_v13 = vpop.f32.mrf.mxu0 }
  0x95   : > { %v343_v14 = vmul.f32 0.35355338, %v282_v13  ;;  %v301_v15 = vpop.f32.mrf.mxu1 }
  0x96   : > { %v344_v17 = vmul.f32 0.35355338, %v301_v15 }
  0x97   : > { %v350_v16 = vadd.f32 %v627_v12, %v343_v14 }
  0x98   : > { %v351_v22 = vadd.f32 %v627_v12, %v344_v17 }
  0x99   : > { %v355_v18 = vsel %vm354_vm1, %v350_v16, -inf }
  0x9a   : > { %v320_v19 = vpop.f32.mrf.mxu2  ;;  %356 = vmax.xlane.f32.xlu1 %v355_v18  ;;  %v358_v28 = vsel %vm354_vm1, %v351_v22, -inf  ;;  %v491_v18 = vld [vmem:[%s251_s6] sm:$0xf] }
  0x9b   : > { %v345_v20 = vmul.f32 0.35355338, %v320_v19  ;;  %v339_v21 = vpop.f32.mrf.mxu3 }
  0x9c   : > { %v284_v23 = vpop.f32.mrf.mxu0  ;;  %v346_v24 = vmul.f32 0.35355338, %v339_v21 }
  0x9d   : > { %v352_v25 = vadd.f32 %v627_v12, %v345_v20  ;;  %v303_v26 = vpop.f32.mrf.mxu1  ;;  %v494_v23 = vld [vmem:[%s251_s6 + $0x4] sm:$0xf] }
  0x9e   : > { %v353_v29 = vadd.f32 %v627_v12, %v346_v24 }
  0x9f   : > { %v361_v27 = vsel %vm354_vm1, %v352_v25, -inf }
  0xa0   : > { %362 = vmax.xlane.f32.xlu0 %v361_v27  ;;  %v364_v32 = vsel %vm354_vm1, %v353_v29, -inf  ;;  %v497_v27 = vld [vmem:[%s251_s6 + $0x8] sm:$0xf] }
  0xa2   : > { %v322_v30 = vpop.f32.mrf.mxu2  ;;  %359 = vmax.xlane.f32.xlu1 %v358_v28 }
  0xa3   : > { %v341_v31 = vpop.f32.mrf.mxu3 }
  0xa8   : > { %365 = vmax.xlane.f32.xlu0 %v364_v32 }
 0x10d   : > { %v357_v33 = vpop.xlane.xlu1 %356 }
 0x10e   : > { %v367_v34 = vsub.f32 %v350_v16, %v357_v33  ;;  %v500_v33 = vld [vmem:[%s251_s6 + $0xc] sm:$0xf] }
 0x110   : > { %v371_v35 = vmul.f32 1.442695, %v367_v34 }
 0x112   : > { %628 = vpow2.f32 %v371_v35 }
 0x113   : > { %v363_v36 = vpop.xlane.xlu0 %362 }
 0x114   : > { %v369_v37 = vsub.f32 %v352_v25, %v363_v36 }
 0x115   : > { %v360_v38 = vpop.xlane.xlu1 %359 }
 0x116   : > { %v375_v39 = vmul.f32 1.442695, %v369_v37  ;;  %v368_v40 = vsub.f32 %v351_v22, %v360_v38 }
 0x118   : > { %v629_v41 = vpop.eup %628  ;;  %630 = vpow2.f32 %v375_v39  ;;  %v373_v42 = vmul.f32 1.442695, %v368_v40 }
 0x119   : > { %v379_v43 = vsel %vm354_vm1, %v629_v41, 0.0 }
 0x11a   : > { %632 = vpow2.f32 %v373_v42  ;;  %380 = vadd.xlane.f32.xlu0 %v379_v43 }
 0x11b   : > { %v366_v44 = vpop.xlane.xlu0 %365 }
 0x11c   : > { %v370_v45 = vsub.f32 %v353_v29, %v366_v44 }
 0x11e   : > { %v631_v46 = vpop.eup %630  ;;  %v377_v47 = vmul.f32 1.442695, %v370_v45 }
 0x11f   : > { %v385_v48 = vsel %vm354_vm1, %v631_v46, 0.0 }
 0x120   : > { %v633_v49 = vpop.eup %632  ;;  %634 = vpow2.f32 %v377_v47  ;;  %386 = vadd.xlane.f32.xlu2 %v385_v48 }
 0x121   : > { %v382_v50 = vsel %vm354_vm1, %v633_v49, 0.0 }
 0x122   : > { %383 = vadd.xlane.f32.xlu1 %v382_v50 }
 0x126   : > { %v635_v51 = vpop.eup %634 }
 0x127   : > { %v388_v52 = vsel %vm354_vm1, %v635_v51, 0.0 }
 0x128   : > { %389 = vadd.xlane.f32.xlu2 %v388_v52 }
 0x18d   : > { %v381_v0 = vpop.xlane.xlu0 %380 }
 0x18e   : > { %636 = vrcp.f32 %v381_v0 }
 0x193   : > { %v387_v1 = vpop.xlane.xlu2 %386 }
 0x194   : > { %v637_v2 = vpop.eup %636  ;;  %638 = vrcp.f32 %v387_v1 }
 0x195   : > { %v395_v3 = vmul.f32 %v637_v2, %v629_v41  ;;  %v384_v4 = vpop.xlane.xlu1 %383 }
 0x196   : > { %640 = vrcp.f32 %v384_v4 }
 0x197   : > { %v399_v5 = vpack.c.bf16 %v395_v3, %v395_v3 }
 0x199   : > { %608 = vmatmul.msk.bf16.vlgmr.msrb.gmra.mxu0 %vm403_vm4, %v399_v5 }
 0x19a   : > { %v639_v6 = vpop.eup %638 }
 0x19b   : > { %v397_v7 = vmul.f32 %v639_v6, %v631_v46  ;;  %v390_v8 = vpop.xlane.xlu2 %389 }
 0x19c   : > { %v641_v9 = vpop.eup %640  ;;  %642 = vrcp.f32 %v390_v8 }
 0x19d   : > { %v396_v10 = vmul.f32 %v641_v9, %v633_v49  ;;  %v401_v11 = vpack.c.bf16 %v397_v7, %v397_v7 }
 0x19f   : > { %v400_v12 = vpack.c.bf16 %v396_v10, %v396_v10  ;;  %610 = vmatmul.msk.bf16.vlgmr.msrb.gmra.mxu2 %vm403_vm4, %v401_v11 }
 0x1a1   : > { %609 = vmatmul.msk.bf16.vlgmr.msrb.gmra.mxu1 %vm403_vm4, %v400_v12 }
 0x1a2   : > { %v643_v13 = vpop.eup %642 }
 0x1a3   : > { %v398_v14 = vmul.f32 %v643_v13, %v635_v51 }
 0x1a5   : > { %v402_v15 = vpack.c.bf16 %v398_v14, %v398_v14 }
 0x1a7   : > { %611 = vmatmul.msk.bf16.vlgmr.msrb.gmra.mxu3 %vm403_vm4, %v402_v15 }
 0x216   : > { %v423_v16 = vpop.f32.mrf.mxu0 }
 0x217   : > { %v484_v19 = vpack.c.bf16 %v423_v16, %v423_v16 }
 0x219   : > { %v492_v20 = vsel %vm727_vm7, %v484_v19, %v491_v18 }
 0x21a   : > { %493 = vst [vmem:[%s251_s6] sm:$0xf] %v492_v20 }
 0x21e   : > { %v425_v21 = vpop.f32.mrf.mxu0  ;;  %v442_v22 = vpop.f32.mrf.mxu1 }
 0x21f   : > { %v485_v24 = vpack.c.bf16 %v442_v22, %v442_v22 }
 0x221   : > { %v495_v25 = vsel %vm727_vm7, %v485_v24, %v494_v23 }
 0x222   : > { %496 = vst [vmem:[%s251_s6 + $0x4] sm:$0xf] %v495_v25  ;;  %v461_v26 = vpop.f32.mrf.mxu2 }
 0x223   : > { %v486_v28 = vpack.c.bf16 %v461_v26, %v461_v26 }
 0x225   : > { %v498_v29 = vsel %vm727_vm7, %v486_v28, %v497_v27 }
 0x226   : > { %499 = vst [vmem:[%s251_s6 + $0x8] sm:$0xf] %v498_v29  ;;  %v444_v30 = vpop.f32.mrf.mxu1 }
 0x22a   : > { %v463_v31 = vpop.f32.mrf.mxu2  ;;  %v480_v32 = vpop.f32.mrf.mxu3 }
 0x22b   : > { %v487_v34 = vpack.c.bf16 %v480_v32, %v480_v32 }
 0x22d   : > { %v501_v35 = vsel %vm727_vm7, %v487_v34, %v500_v33 }
 0x22e   : > { %502 = vst [vmem:[%s251_s6 + $0xc] sm:$0xf] %v501_v35 }
 0x232   : > { %v482_v36 = vpop.f32.mrf.mxu3 }
 0x233 PF: > { %s14_s15 = sadd.s32 1, %s650_s15  }
 0x234   : > { %p11_p4 = scmp.ge.s32.totalorder %s14_s15, 4  }
 0x236   :  { %13 = sbr.rel (!%p11_p4) target bundleno = 1 (0x1), region = 75 }

// kernel: audio_encoder_tensor_cache.33
= control target key start
LH: loop header
LB: loop body
LE: loop exit
PB: predicated region body
PF: predicated region fallthrough
CT: control target
= control target key end

     0   :  { %s398_s12 = smov 0   ;;  %s445_s0 = inlined_call_operand.vmem [shape: bf16[2,13,32], index: 0, kind: input, shape index: {}]   ;;  %s446_s1 = inlined_call_operand.vmem [shape: f32[7,32], index: 1, kind: input, shape index: {}]   ;;  %s447_s2 = inlined_call_operand.vmem [shape: f32[1,32], index: 2, kind: input, shape index: {}]   ;;  %s448_s3 = inlined_call_operand.vmem [shape: bf16[2,7,32], index: 3, kind: output, shape index: {}]  }
   0x1 LB: > { %s338_s13 = sadd.s32 4294967295, %s376_s12   ;;  %p342_p0 = scmp.ge.s32.totalorder %s376_s12, 1  ;;  %s376_s12 = sphi %s398_s12, %s13_s12  }
   0x2   : > { %p137_p1 = scmp.lt.s32.totalorder %s376_s12, 3 }
   0x4   : > { %p138_p2 = pnand %p342_p0, %p137_p1 }
   0x5   : > { %p160_p3 = scmp.lt.s32.totalorder (!%p138_p2), %s338_s13, 1 }
   0x6   : > { %141 = sbr.rel (%p138_p2) target bundleno = 69 (0x45), region = 32 }
   0xb   : > { %s450_s13 = smov (!%p160_p3, %s338_s13), 1  ;;  %v358_v0 = vld [vmem:[%s446_s1] ss:$0 sm:$0xff]  ;;  %v359_v1 = vld [vmem:[%s446_s1 + $0x1] ss:$0 sm:$0xff]  ;;  %vm191_vm0 = vcmask 1045504  }
   0xc   : > { %v360_v2 = vld [vmem:[%s446_s1 + $0x2] ss:$0 sm:$0xff]  ;;  %s349_s20 = sshll.u32 %s450_s13, 3  ;;  %v361_v3 = vld [vmem:[%s446_s1 + $0x3] ss:$0 sm:$0xff]  ;;  %vm203_vm1 = vcmask 1044480  }
   0xd   : > { %s164_s25 = scalar_lea.vmem %s445_s0, %s349_s20  ;;  %v362_v4 = vld [vmem:[%s446_s1 + $0x4] ss:$0 sm:$0xff]  ;;  %v363_v5 = vld [vmem:[%s446_s1 + $0x5] ss:$0 sm:$0xff]  ;;  %v364_v26 = vld [vmem:[%s446_s1 + $0x6] ss:$0 sm:$0xff] }
   0xe   : > { %v169_v6 = vld [vmem:[%s164_s25] sm:$0xf]  ;;  %v182_v8 = vld [vmem:[%s164_s25 + $0x4] sm:$0x1]  ;;  %vm219_vm2 = vcmask 1043456   ;;  %vm231_vm3 = vcmask 1042432  }
   0xf   : > { %v181_v7 = vld [vmem:[%s164_s25] sm:$0xe]  ;;  %v170_v9 = vunpack.c.l.bf16 %v169_v6  ;;  %v184_v11 = vunpack.c.l.bf16 %v182_v8  ;;  %v210_v13 = vld [vmem:[%s164_s25 + $0x4] sm:$0x3]  ;;  %vm247_vm4 = vcmask 1041408   ;;  %s345_s7 = sshll.u32 %s450_s13, 2 }
  0x10   : > { %v183_v10 = vunpack.c.l.bf16 %v181_v7  ;;  %v209_v12 = vld [vmem:[%s164_s25] sm:$0xc]  ;;  %v212_v16 = vunpack.c.l.bf16 %v210_v13  ;;  %v238_v31 = vld [vmem:[%s164_s25 + $0x4] sm:$0x7]  ;;  %v365_v54 = vld [vmem:[%s447_s2] ss:$0 sm:$0xff]  ;;  %s168_s10 = scalar_lea.vmem %s448_s3, %s345_s7 }
  0x11   : > { %v237_v14 = vld [vmem:[%s164_s25] sm:$0x8]  ;;  %v211_v15 = vunpack.c.l.bf16 %v209_v12  ;;  %v173_v18 = vmul.f32 %v358_v0, %v170_v9  ;;  %v176_v19 = vmul.f32 %v359_v1, %v170_v9  ;;  %v188_v21 = vmul.f32 %v360_v2, %v184_v11 }
  0x12   : > { %v239_v17 = vunpack.c.l.bf16 %v237_v14  ;;  %v187_v20 = vmul.f32 %v360_v2, %v183_v10  ;;  %v199_v22 = vmul.f32 %v361_v3, %v183_v10  ;;  %v200_v23 = vmul.f32 %v361_v3, %v184_v11  ;;  %v282_v7 = vld [vmem:[%s168_s10] sm:$0xf] }
  0x13   : > { %v215_v24 = vmul.f32 %v362_v4, %v211_v15  ;;  %v216_v25 = vmul.f32 %v362_v4, %v212_v16  ;;  %v178_v27 = vrot.slane %v176_v19, 1  ;;  %v193_v29 = vrot.slane %v188_v21, 2 }
  0x14   : > { %v192_v28 = vrot.slane %v187_v20, 2  ;;  %v227_v30 = vmul.f32 %v363_v5, %v211_v15  ;;  %v204_v32 = vrot.slane %v199_v22, 3  ;;  %v205_v33 = vrot.slane %v200_v23, 3 }
  0x15   : > { %v220_v34 = vrot.slane %v215_v24, 4  ;;  %v221_v35 = vrot.slane %v216_v25, 4  ;;  %v180_v36 = vadd.f32 %v178_v27, %v173_v18  ;;  %v228_v38 = vmul.f32 %v363_v5, %v212_v16 }
  0x16   : > { %v194_v37 = vsel %vm191_vm0, %v192_v28, %v193_v29  ;;  %v206_v39 = vsel %vm203_vm1, %v204_v32, %v205_v33  ;;  %v232_v40 = vrot.slane %v227_v30, 5  ;;  %v240_v41 = vunpack.c.l.bf16 %v238_v31 }
  0x17   : > { %v243_v42 = vmul.f32 %v364_v26, %v239_v17  ;;  %v196_v43 = vadd.f32 %v194_v37, %v180_v36  ;;  %v233_v44 = vrot.slane %v228_v38, 5  ;;  %v222_v45 = vsel %vm219_vm2, %v220_v34, %v221_v35 }
  0x18   : > { %v244_v46 = vmul.f32 %v364_v26, %v240_v41  ;;  %vm279_vm9 = vcmask 257024   ;;  %vm280_vm10 = vsmask.f32 3328 }
  0x19   : > { %v248_v47 = vrot.slane %v243_v42, 6  ;;  %v208_v48 = vadd.f32 %v206_v39, %v196_v43  ;;  %v234_v49 = vsel %vm231_vm3, %v232_v40, %v233_v44  ;;  %vm281_vm11 = vmand %vm279_vm9, %vm280_vm10 }
  0x1a   : > { %v249_v50 = vrot.slane %v244_v46, 6 }
  0x1b   : > { %v224_v51 = vadd.f32 %v222_v45, %v208_v48 }
  0x1c   : > { %v250_v52 = vsel %vm247_vm4, %v248_v47, %v249_v50 }
  0x1d   : > { %v236_v53 = vadd.f32 %v234_v49, %v224_v51 }
  0x1f   : > { %v252_v55 = vadd.f32 %v250_v52, %v236_v53 }
  0x21   : > { %v257_v56 = vadd.f32 %v365_v54, %v252_v55 }
  0x23   : > { %v346_v57 = vmul.f32 -1.442695, %v257_v56 }
  0x25   : > { %366 = vpow2.f32 %v346_v57 }
  0x2b   : > { %v367_v58 = vpop.eup %366 }
  0x2c   : > { %v261_v59 = vadd.f32 1.0, %v367_v58 }
  0x2e   : > { %368 = vrcp.f32 %v261_v59  ;;  %v273_v62 = vand.u32 2147483648, %v261_v59  ;;  %vm267_vm5 = vweird.f32 %v261_v59  ;;  %v271_v0 = vand.u32 2147483647, %v261_v59 }
  0x30   : > { %v274_v2 = vor.u32 1.1754944e-38, %v273_v62  ;;  %vm272_vm8 = vcmp.eq.f32.partialorder %v271_v0, 8.507059e+37 }
  0x34   : > { %v369_v60 = vpop.eup %368 }
  0x35   : > { %v263_v61 = vmul.f32 %v369_v60, %v261_v59  ;;  %vm268_vm6 = vweird.f32 %v369_v60 }
  0x36   : > { %vm269_vm7 = vmor %vm267_vm5, %vm268_vm6 }
  0x37   : > { %v264_v63 = vsub.f32 1.0, %v263_v61 }
  0x39   : > { %v265_v1 = vmul.f32 %v369_v60, %v264_v63 }
  0x3b   : > { %v266_v3 = vadd.f32 %v369_v60, %v265_v1 }
  0x3d   : > { %v270_v4 = vsel %vm269_vm7, %v369_v60, %v266_v3 }
  0x3e   : > { %v275_v5 = vsel %vm272_vm8, %v274_v2, %v270_v4 }
  0x3f   : > { %v277_v6 = vmul.f32 %v275_v5, %v257_v56 }
  0x41   : > { %v278_v8 = vpack.c.bf16 %v277_v6, %v277_v6 }
  0x43   : > { %v283_v9 = vsel %vm281_vm11, %v278_v8, %v282_v7 }
  0x44   : > { %284 = vst [vmem:[%s168_s10] sm:$0xf] %v283_v9 }
  0x45 PF: > { %s13_s12 = sadd.s32 1, %s376_s12  }
  0x46   : > { %p10_p4 = scmp.ge.s32.totalorder %s13_s12, 4  }
  0x48   :  { %12 = sbr.rel (!%p10_p4) target bundleno = 1 (0x1), region = 62 }

// kernel: audio_encoder_tensor_cache.36
= control target key start
LH: loop header
LB: loop body
LE: loop exit
PB: predicated region body
PF: predicated region fallthrough
CT: control target
= control target key end

     0   :  { %vm67_vm0 = vcmask 523264   ;;  %vm93_vm1 = vcmask 261120   ;;  %vm97_vm2 = vcmask 259072   ;;  %v198_v20 = vmov 32.0   ;;  %s279_s1 = inlined_call_operand.vmem [shape: bf16[64,32], index: 1, kind: input, shape index: {}]   ;;  %s280_s2 = inlined_call_operand.vmem [shape: f32[1,32], index: 2, kind: input, shape index: {}]   ;;  %s281_s0 = inlined_call_operand.vmem [shape: bf16[14,64], index: 0, kind: input, shape index: {}]   ;;  %s282_s3 = inlined_call_operand.vmem [shape: f32[14,32], index: 3, kind: input, shape index: {}]   ;;  %s283_s4 = inlined_call_operand.vmem [shape: f32[1,32], index: 4, kind: input, shape index: {}]   ;;  %s284_s5 = inlined_call_operand.vmem [shape: f32[1,32], index: 5, kind: input, shape index: {}]   ;;  %s285_s6 = inlined_call_operand.vmem [shape: f32[14,32], index: 6, kind: output, shape index: {}]  }
   0x1   :  { %v187_v0 = vld [vmem:[%s279_s1 + $0x18] sm:$0xff]  ;;  %v186_v1 = vld [vmem:[%s279_s1 + $0x10] sm:$0xff]  ;;  %v185_v2 = vld [vmem:[%s279_s1 + $0x8] sm:$0xff]  ;;  %192 = vrcp.f32 %v198_v20 }
   0x2   :  { %75 = vmatpush.bf16.msra.mxu0 %v187_v0  ;;  %v184_v3 = vld [vmem:[%s279_s1] sm:$0xff]  ;;  %v86_v16 = vld [vmem:[%s282_s3 + $0x8] sm:$0x3f] }
   0x3   :  { %v164_v4 = vld [vmem:[%s281_s0] sm:$0xf]  ;;  %v183_v5 = vld [vmem:[%s281_s0] sm:$0x70] }
   0x4   :  { %v165_v6 = vor.u32 %v183_v5, %v164_v4  ;;  %v189_v7 = vld [vmem:[%s280_s2] ss:$0 sm:$0xff] }
   0x5   :  { %v85_v10 = vld [vmem:[%s282_s3] sm:$0xff] }
   0x6   :  { %76 = vmatpush.bf16.msra.mxu0 %v186_v1  ;;  %v190_v51 = vld [vmem:[%s283_s4] ss:$0 sm:$0xff] }
   0x7   :  { %v193_v21 = vpop.eup %192  ;;  %v191_v54 = vld [vmem:[%s284_s5] ss:$0 sm:$0xff] }
   0x8   :  { %v102_v22 = vmul.f32 32.0, %v193_v21  ;;  %vm106_vm3 = vweird.f32 %v193_v21 }
   0xa   :  { %77 = vmatpush.bf16.msra.mxu0 %v185_v2  ;;  %v103_v23 = vsub.f32 1.0, %v102_v22 }
   0xc   :  { %v104_v24 = vmul.f32 %v193_v21, %v103_v23 }
   0xe   :  { %78 = vmatpush.bf16.msra.mxu0 %v184_v3  ;;  %v105_v25 = vadd.f32 %v193_v21, %v104_v24 }
  0x10   :  { %v107_v26 = vsel %vm106_vm3, %v193_v21, %v105_v25 }
  0x11   :  { %182 = vmatmul.msk.bf16.vlgmr.msra.gmra.mxu0 %vm67_vm0, %v165_v6 }
  0x8e   :  { %v80_v8 = vpop.f32.mrf.mxu0 }
  0x8f   :  { %v81_v9 = vadd.f32 %v189_v7, %v80_v8 }
  0x91   :  { %v87_v11 = vmul.f32 0.5, %v81_v9 }
  0x93   :  { %v89_v12 = vadd.f32 %v87_v11, %v85_v10 }
  0x95   :  { %v94_v13 = vsel %vm93_vm1, %v89_v12, 0.0 }
  0x96   :  { %v82_v14 = vpop.f32.mrf.mxu0  ;;  %95 = vadd.xlane.f32.xlu0 %v94_v13 }
  0x97   :  { %v83_v15 = vadd.f32 %v189_v7, %v82_v14 }
  0x99   :  { %v88_v17 = vmul.f32 0.5, %v83_v15 }
  0x9b   :  { %v90_v18 = vadd.f32 %v88_v17, %v86_v16 }
  0x9d   :  { %v98_v19 = vsel %vm97_vm2, %v90_v18, 0.0 }
  0x9e   :  { %99 = vadd.xlane.f32.xlu0 %v98_v19 }
 0x109   :  { %v96_v27 = vpop.xlane.xlu0 %95 }
 0x10a   :  { %v108_v28 = vmul.f32 %v107_v26, %v96_v27 }
 0x10c   :  { %v110_v29 = vsub.f32 %v89_v12, %v108_v28 }
 0x10e   :  { %v112_v30 = vmul.f32 %v110_v29, %v110_v29 }
 0x110   :  { %v114_v31 = vsel %vm93_vm1, %v112_v30, 0.0 }
 0x111   :  { %115 = vadd.xlane.f32.xlu1 %v114_v31  ;;  %v100_v32 = vpop.xlane.xlu0 %99 }
 0x112   :  { %v109_v33 = vmul.f32 %v107_v26, %v100_v32 }
 0x114   :  { %v111_v34 = vsub.f32 %v90_v18, %v109_v33 }
 0x116   :  { %v113_v35 = vmul.f32 %v111_v34, %v111_v34 }
 0x118   :  { %v117_v36 = vsel %vm97_vm2, %v113_v35, 0.0 }
 0x119   :  { %118 = vadd.xlane.f32.xlu1 %v117_v36 }
 0x184   :  { %v116_v37 = vpop.xlane.xlu1 %115 }
 0x185   :  { %v120_v38 = vmul.f32 %v116_v37, %v107_v26 }
 0x187   :  { %v122_v39 = vadd.f32 1e-05, %v120_v38 }
 0x189   :  { %194 = vrsqrt.f32 %v122_v39  ;;  %vm130_vm5 = vweird.f32 %v122_v39 }
 0x18c   :  { %v119_v40 = vpop.xlane.xlu1 %118 }
 0x18d   :  { %v121_v41 = vmul.f32 %v119_v40, %v107_v26 }
 0x18f   :  { %v195_v42 = vpop.eup %194  ;;  %v123_v43 = vadd.f32 1e-05, %v121_v41 }
 0x190   :  { %v125_v44 = vmul.f32 %v195_v42, %v122_v39  ;;  %vm131_vm4 = vweird.f32 %v195_v42 }
 0x191   :  { %196 = vrsqrt.f32 %v123_v43  ;;  %vm132_vm6 = vmor %vm130_vm5, %vm131_vm4  ;;  %vm140_vm8 = vweird.f32 %v123_v43 }
 0x192   :  { %v126_v45 = vmul.f32 %v195_v42, %v125_v44 }
 0x194   :  { %v127_v46 = vmul.f32 0.5, %v126_v45 }
 0x196   :  { %v128_v47 = vsub.f32 1.5, %v127_v46 }
 0x197   :  { %v197_v48 = vpop.eup %196 }
 0x198   :  { %v129_v49 = vmul.f32 %v195_v42, %v128_v47  ;;  %v135_v50 = vmul.f32 %v197_v48, %v123_v43  ;;  %vm141_vm7 = vweird.f32 %v197_v48 }
 0x199   :  { %vm142_vm9 = vmor %vm140_vm8, %vm141_vm7 }
 0x19a   :  { %v133_v52 = vsel %vm132_vm6, %v195_v42, %v129_v49  ;;  %v136_v53 = vmul.f32 %v197_v48, %v135_v50 }
 0x19b   :  { %v144_v55 = vmul.f32 %v133_v52, %v110_v29 }
 0x19c   :  { %v137_v56 = vmul.f32 0.5, %v136_v53 }
 0x19d   :  { %v149_v57 = vmul.f32 %v190_v51, %v144_v55 }
 0x19e   :  { %v138_v58 = vsub.f32 1.5, %v137_v56 }
 0x19f   :  { %v154_v59 = vadd.f32 %v191_v54, %v149_v57 }
 0x1a0   :  { %v139_v60 = vmul.f32 %v197_v48, %v138_v58 }
 0x1a1   :  { %156 = vst.msk [vmem:[%s285_s6] sm:$0xff] %vm93_vm1, %v154_v59 }
 0x1a2   :  { %v143_v61 = vsel %vm142_vm9, %v197_v48, %v139_v60 }
 0x1a3   :  { %v145_v62 = vmul.f32 %v143_v61, %v111_v34 }
 0x1a5   :  { %v150_v63 = vmul.f32 %v190_v51, %v145_v62 }
 0x1a7   :  { %v155_v0 = vadd.f32 %v191_v54, %v150_v63 }
 0x1a9   :  { %157 = vst.msk [vmem:[%s285_s6 + $0x8] sm:$0x3f] %vm97_vm2, %v155_v0 }

// kernel: audio_encoder_tensor_cache.47
= control target key start
LH: loop header
LB: loop body
LE: loop exit
PB: predicated region body
PF: predicated region fallthrough
CT: control target
= control target key end

     0   :  { %s753_s21 = smov 0   ;;  %s755_s22 = smov 0   ;;  %s804_s0 = inlined_call_operand.vmem [shape: f32[14,32], index: 0, kind: input, shape index: {}]   ;;  %s805_s1 = inlined_call_operand.vmem [shape: bf16[3,32,32], index: 1, kind: input, shape index: {}]   ;;  %s806_s2 = inlined_call_operand.vmem [shape: f32[3,1,32], index: 2, kind: input, shape index: {}]   ;;  %s807_s3 = inlined_call_operand.vmem [shape: bf16[3,32,32], index: 3, kind: input, shape index: {}]   ;;  %s808_s4 = inlined_call_operand.vmem [shape: f32[3,1,32], index: 4, kind: input, shape index: {}]   ;;  %s809_s5 = inlined_call_operand.vmem [shape: f32[3,14,32], index: 5, kind: output, shape index: {0}]   ;;  %s810_s6 = inlined_call_operand.vmem [shape: f32[3,14,32], index: 6, kind: output, shape index: {1}]  }
   0x1   :  { %s757_s23 = smov 0  }
   0x2 LB: > { %s29_s24 = sadd.s32 1, %s712_s22  ;;  %p631_p0 = scmp.ge.s32.totalorder %s716_s23, 1  ;;  %s716_s23 = sphi %s757_s23, %s17_s23   ;;  %s712_s22 = sphi %s755_s22, %s812_s22   ;;  %s708_s21 = sphi %s753_s21, %s811_s21  }
   0x3   : > { %p31_p1 = scmp.ge.s32.totalorder %s29_s24, 3  ;;  %p268_p2 = scmp.lt.s32.totalorder %s716_s23, 4 }
   0x5   : > { %s814_s24 = smov (%p31_p1, %s29_s24), 0  ;;  %p269_p3 = pnand %p631_p0, %p268_p2 }
   0x6   : > { %p333_p4 = scmp.lt.s32.totalorder (!%p269_p3), %s708_s21, 2 }
   0x7   : > { %272 = sbr.rel (%p269_p3) target bundleno = 161 (0xa1), region = 40 }
   0xc   : > { %s816_s21 = smov (!%p333_p4, %s708_s21), 2  ;;  %v370_v2 = vld [vmem:[%s804_s0] sm:$0xff]  ;;  %v371_v5 = vld [vmem:[%s804_s0 + $0x8] sm:$0x3f]  ;;  %vm393_vm0 = vcmask 261120   ;;  %vm412_vm1 = vcmask 259072  }
   0xd   : > { %s660_s25 = sshll.u32 %s816_s21, 4  ;;  %s340_s28 = scalar_lea.vmem %s806_s2, %s816_s21  ;;  %v372_v6 = vpack.c.bf16 %v371_v5, %v370_v2 }
   0xe   : > { %s337_s7 = scalar_lea.vmem %s805_s1, %s660_s25  ;;  %s345_s10 = scalar_lea.vmem %s807_s3, %s660_s25  ;;  %v692_v7 = vld [vmem:[%s340_s28] ss:$0 sm:$0xff] }
   0xf   : > { %v665_v0 = vld [vmem:[%s337_s7 + $0x8] sm:$0xff]  ;;  %v664_v3 = vld [vmem:[%s337_s7] sm:$0xff]  ;;  %s348_s17 = scalar_lea.vmem %s808_s4, %s816_s21  ;;  %s357_s20 = scalar_lea.vmem %s809_s5, %s660_s25 }
  0x10   : > { %v667_v1 = vld [vmem:[%s345_s10 + $0x8] sm:$0xff]  ;;  %403 = vmatpush.bf16.msra.mxu0 %v665_v0  ;;  %v666_v4 = vld [vmem:[%s345_s10] sm:$0xff]  ;;  %s367_s29 = scalar_lea.vmem %s810_s6, %s660_s25 }
  0x11   : > { %440 = vmatpush.bf16.msra.mxu1 %v667_v1  ;;  %v693_v8 = vld [vmem:[%s348_s17] ss:$0 sm:$0xff] }
  0x14   : > { %404 = vmatpush.bf16.msra.mxu0 %v664_v3 }
  0x15   : > { %441 = vmatpush.bf16.msra.mxu1 %v666_v4 }
  0x17   : > { %648 = vmatmul.msk.bf16.vlgmr.msra.gmra.mxu0 %vm393_vm0, %v372_v6 }
  0x18   : > { %657 = vmatmul.msk.bf16.vlgmr.msra.gmra.mxu1 %vm393_vm0, %v372_v6 }
  0x94   : > { %v406_v9 = vpop.f32.mrf.mxu0 }
  0x95   : > { %v443_v10 = vpop.f32.mrf.mxu1  ;;  %v407_v11 = vadd.f32 %v692_v7, %v406_v9 }
  0x96   : > { %v444_v12 = vadd.f32 %v693_v8, %v443_v10 }
  0x97   : > { %411 = vst.msk [vmem:[%s357_s20] sm:$0xff] %vm393_vm0, %v407_v11 }
  0x98   : > { %448 = vst.msk [vmem:[%s367_s29] sm:$0xff] %vm393_vm0, %v444_v12 }
  0x9c   : > { %v408_v13 = vpop.f32.mrf.mxu0 }
  0x9d   : > { %v445_v14 = vpop.f32.mrf.mxu1  ;;  %v409_v15 = vadd.f32 %v692_v7, %v408_v13 }
  0x9e   : > { %v446_v16 = vadd.f32 %v693_v8, %v445_v14 }
  0x9f   : > { %413 = vst.msk [vmem:[%s357_s20 + $0x8] sm:$0x3f] %vm412_vm1, %v409_v15 }
  0xa0   : > { %449 = vst.msk [vmem:[%s367_s29 + $0x8] sm:$0x3f] %vm412_vm1, %v446_v16 }
  0xa1 PF: > { %s17_s23 = sadd.s32 1, %s716_s23   ;;  %s811_s21 = smov %s712_s22 }
  0xa2   : > { %p14_p5 = scmp.ge.s32.totalorder %s17_s23, 5   ;;  %s812_s22 = smov %s814_s24 }
  0xa4   :  { %16 = sbr.rel (!%p14_p5) target bundleno = 2 (0x2), region = 94 }

</bundles_post_ra>
